<compile_context>
chip_gen: v7x
topology: tpu7x:2x2x1
jax: 0.10.0
libtpu: 0.0.40
codegen_flags: <defaults>
</compile_context>

<pallas_src>
import functools

import jax
import jax.numpy as jnp
from jax.experimental import pallas as pl
from jax.experimental.pallas import tpu as pltpu


def _round_up(x, m):
    return ((x + m - 1) // m) * m


def _pick_vmem_limit():
    """Generation-aware VMEM limit: ~3/4 of physical, capped at 96 MiB."""
    try:
        cap = int(pltpu.get_tpu_info().vmem_capacity_bytes)
    except Exception:
        cap = 64 * 1024 * 1024
    return int(min(96 * 1024 * 1024, cap * 3 // 4))


# --------------------------------------------------------------------------
# Fused multi-layer LSTM + linear-head kernel (one grid step = one time block)
# --------------------------------------------------------------------------
def _fused_lstm_head_kernel(*refs, n_layers, hidden_dim, use_softplus):
    z_ref = refs[0]                                   # (T_BLK, B_BLK, I_pad)
    wih = refs[1:1 + n_layers]                        # per-layer (in_pad, G_pad)
    whh = refs[1 + n_layers:1 + 2 * n_layers]         # per-layer (H, G_pad)
    bias = refs[1 + 2 * n_layers:1 + 3 * n_layers]    # per-layer (1, G_pad)
    lin_w_ref = refs[1 + 3 * n_layers]                # (H, D_pad)
    lin_b_ref = refs[2 + 3 * n_layers]                # (1, D_pad)
    emask_ref = refs[3 + 3 * n_layers]                # (1, D_pad)   1.0 on even cols
    out_ref = refs[4 + 3 * n_layers]                  # (T_BLK, B_BLK, D_pad)
    gx_sc = refs[5 + 3 * n_layers]                    # (T_BLK, B_BLK, G_pad)
    hseq_sc = refs[6 + 3 * n_layers]                  # (T_BLK, B_BLK, H)
    h_st = refs[7 + 3 * n_layers]                     # (n_layers, B_BLK, H)
    c_st = refs[8 + 3 * n_layers]                     # (n_layers, B_BLK, H)

    T_BLK, B_BLK, I_pad = z_ref.shape
    H = hidden_dim
    G_pad = gx_sc.shape[-1]
    TB = T_BLK * B_BLK

    # First time block of this batch block: h0 = c0 = 0 (init_fixed=True).
    @pl.when(pl.program_id(1) == 0)
    def _():
        h_st[...] = jnp.zeros_like(h_st)
        c_st[...] = jnp.zeros_like(c_st)

    small_h = (H % 128) != 0
    if small_h:
        # Hoisted lane mask selecting the 'g' (tanh) gate columns.
        lane = jax.lax.broadcasted_iota(jnp.int32, (B_BLK, G_pad), 1)
        is_g = jnp.logical_and(lane >= 2 * H, lane < 3 * H)

    unroll = min(T_BLK, 8)

    for l in range(n_layers):
        # Input projection for ALL timesteps of this block as one big GEMM;
        # bias broadcast hoisted out of the recurrence loop.
        if l == 0:
            inp = z_ref[...].reshape(TB, I_pad)
        else:
            inp = hseq_sc[...].reshape(TB, H)
        gx_sc[...] = (
            jnp.dot(inp, wih[l][...], preferred_element_type=jnp.float32)
            + bias[l][...]
        ).reshape(T_BLK, B_BLK, G_pad)

        whh_l = whh[l]   # keep as a Ref; loaded inside step (no vreg pressure)

        # NOTE: explicit MXU weight staging (pltpu.matmul_push_rhs) could hold
        # W_hh in the MXU across the unrolled loop on v5e; not used here.
        def step(t, carry, whh_l=whh_l):
            h_prev, c_prev = carry
            gates = gx_sc[t] + jnp.dot(
                h_prev, whh_l[...], preferred_element_type=jnp.float32)
            if small_h:
                # 2 full-width EUP passes + lane-mask select, then narrow slices.
                sig = jax.nn.sigmoid(gates)
                tah = jnp.tanh(gates)
                act = jnp.where(is_g, tah, sig)
                i_g = act[:, 0 * H:1 * H]
                f_g = act[:, 1 * H:2 * H]
                g_g = act[:, 2 * H:3 * H]
                o_g = act[:, 3 * H:4 * H]
            else:
                # H is a multiple of 128 -> gate blocks are lane-aligned.
                i_g = jax.nn.sigmoid(gates[:, 0 * H:1 * H])
                f_g = jax.nn.sigmoid(gates[:, 1 * H:2 * H])
                g_g = jnp.tanh(gates[:, 2 * H:3 * H])
                o_g = jax.nn.sigmoid(gates[:, 3 * H:4 * H])
            c_new = f_g * c_prev + i_g * g_g
            h_new = o_g * jnp.tanh(c_new)
            hseq_sc[t] = h_new
            return (h_new, c_new)

        h_fin, c_fin = jax.lax.fori_loop(
            0, T_BLK, step, (h_st[l], c_st[l]), unroll=unroll)
        h_st[l] = h_fin
        c_st[l] = c_fin

    # Linear head + even/odd (identity / softplus-or-relu) split, fused.
    hflat = hseq_sc[...].reshape(TB, H)
    y = (jnp.dot(hflat, lin_w_ref[...], preferred_element_type=jnp.float32)
         + lin_b_ref[...])                            # (TB, D_pad)
    if use_softplus:
        vol = jnp.maximum(y, 0.0) + jnp.log(1.0 + jnp.exp(-jnp.abs(y)))
    else:  # relu
        vol = jnp.maximum(y, 0.0)
    m = emask_ref[...]                                # (1, D_pad)
    out = y * m + vol * (1.0 - m)
    out_ref[...] = out.reshape(T_BLK, B_BLK, out_ref.shape[-1]).astype(
        out_ref.dtype)


_WEIGHT_BUFFER_MODE_OK = None   # memo: does this JAX support pl.Buffered(1)?


def fused_lstm_generator(z_tbi, wih_list, whh_list, bias_list, lin_w, lin_b,
                         even_mask, *, t_blk, b_blk, hidden_dim, use_softplus,
                         vmem_limit_bytes):
    """z_tbi: (T_pad, B_pad, I_pad) f32, already padded & time-major."""
    global _WEIGHT_BUFFER_MODE_OK
    T_pad, B_pad, I_pad = z_tbi.shape
    n_layers = len(wih_list)
    H = hidden_dim
    G_pad = wih_list[0].shape[1]
    D_pad = lin_w.shape[1]
    nt = T_pad // t_blk
    nb = B_pad // b_blk

    kernel = functools.partial(_fused_lstm_head_kernel, n_layers=n_layers,
                               hidden_dim=H, use_softplus=use_softplus)

    def const_spec(shape, buffered):
        # Weights/biases have a constant index_map; single-buffer them so the
        # pipeline does not waste VMEM on a second copy.
        if buffered:
            return pl.BlockSpec(shape, lambda b, t: (0, 0),
                                pipeline_mode=pl.Buffered(1))
        return pl.BlockSpec(shape, lambda b, t: (0, 0))

    def build(buffered):
        in_specs = [pl.BlockSpec((t_blk, b_blk, I_pad), lambda b, t: (t, b, 0))]
        for w in wih_list:
            in_specs.append(const_spec(w.shape, buffered))
        for w in whh_list:
            in_specs.append(const_spec(w.shape, buffered))
        for bb in bias_list:
            in_specs.append(const_spec(bb.shape, buffered))
        in_specs.append(const_spec(lin_w.shape, buffered))
        in_specs.append(const_spec(lin_b.shape, buffered))
        in_specs.append(const_spec(even_mask.shape, buffered))
        return pl.pallas_call(
            kernel,
            out_shape=jax.ShapeDtypeStruct((T_pad, B_pad, D_pad), jnp.float32),
            grid_spec=pltpu.PrefetchScalarGridSpec(
                num_scalar_prefetch=0,
                grid=(nb, nt),                        # time innermost (sequential)
                in_specs=in_specs,
                out_specs=pl.BlockSpec((t_blk, b_blk, D_pad),
                                       lambda b, t: (t, b, 0)),
                scratch_shapes=[
                    pltpu.VMEM((t_blk, b_blk, G_pad), jnp.float32),   # gate in
                    pltpu.VMEM((t_blk, b_blk, H), jnp.float32),       # h seq
                    pltpu.VMEM((n_layers, b_blk, H), jnp.float32),    # h state
                    pltpu.VMEM((n_layers, b_blk, H), jnp.float32),    # c state
                ],
            ),
            compiler_params=pltpu.CompilerParams(
                dimension_semantics=("parallel", "arbitrary"),
                vmem_limit_bytes=vmem_limit_bytes,
            ),
        )

    args = (z_tbi, *wih_list, *whh_list, *bias_list, lin_w, lin_b, even_mask)
    if _WEIGHT_BUFFER_MODE_OK is not False:
        try:
            out = build(True)(*args)
            _WEIGHT_BUFFER_MODE_OK = True
            return out
        except Exception:
            _WEIGHT_BUFFER_MODE_OK = False
    return build(False)(*args)


# --------------------------------------------------------------------------
# Module wrapper with deterministic parameter init.
# --------------------------------------------------------------------------
class ConditionalLSTMGeneratorConstraintPallas:
    def __init__(self, input_dim, output_dim, hidden_dim, n_layers, key,
                 init_fixed=True, vol_activation="softplus", t_blk=64):
        if vol_activation not in ("softplus", "relu"):
            raise ValueError("Unsupported activation. Choose 'relu' or 'softplus'.")
        if not init_fixed:
            # TODO(synk): init_fixed=False (random h0/c0) not implemented in the kernel.
            raise NotImplementedError("Only init_fixed=True is supported.")
        self.input_dim = input_dim
        self.output_dim = output_dim
        self.hidden_dim = hidden_dim
        self.n_layers = n_layers
        self.init_fixed = init_fixed
        self.use_softplus = vol_activation == "softplus"
        self.t_blk = t_blk

        H = hidden_dim
        # Pad only the concatenated 4H gate vector (NOT each gate) to 128 lanes.
        self.G_pad = _round_up(4 * H, 128)
        self.D_pad = _round_up(output_dim, 128)   # lane-dense head output
        self.I_pad = _round_up(input_dim, 128)    # lane-dense layer-0 GEMM LHS

        # ---- raw (unpadded) parameters, PyTorch-style init ----------------
        k = 1.0 / jnp.sqrt(jnp.float32(hidden_dim))
        keys = jax.random.split(key, 4 * n_layers + 2)
        self.w_ih_t, self.w_hh_t, self.bias = [], [], []
        for l in range(n_layers):
            in_l = input_dim if l == 0 else hidden_dim
            kw1, kw2, kb1, kb2 = keys[4 * l: 4 * l + 4]
            w_ih = jax.random.uniform(kw1, (4 * H, in_l),
                                      minval=-k, maxval=k, dtype=jnp.float32)
            w_hh = jax.random.uniform(kw2, (4 * H, H),
                                      minval=-k, maxval=k, dtype=jnp.float32)
            b_ih = jax.random.uniform(kb1, (4 * H,),
                                      minval=-k, maxval=k, dtype=jnp.float32)
            b_hh = jax.random.uniform(kb2, (4 * H,),
                                      minval=-k, maxval=k, dtype=jnp.float32)
            self.w_ih_t.append(w_ih.T)                       # (in_l, 4H)
            self.w_hh_t.append(w_hh.T)                       # (H, 4H)
            self.bias.append((b_ih + b_hh)[None, :])         # (1, 4H)

        klw, klb = keys[-2], keys[-1]
        lin_w = jax.random.uniform(klw, (output_dim, hidden_dim),
                                   minval=-0.1, maxval=0.1, dtype=jnp.float32)
        lin_b = jax.random.uniform(klb, (output_dim,),
                                   minval=-0.1, maxval=0.1, dtype=jnp.float32)
        self.lin_w_t = lin_w.T                               # (H, D)
        self.lin_b = lin_b[None, :]                          # (1, D)

        # ---- padded parameters for the kernel ------------------------------
        def pad2(a, rows, cols):
            return jnp.pad(a, ((0, rows - a.shape[0]), (0, cols - a.shape[1])))

        self._wih_pad, self._whh_pad, self._bias_pad = [], [], []
        for l in range(n_layers):
            in_pad = self.I_pad if l == 0 else H
            self._wih_pad.append(pad2(self.w_ih_t[l], in_pad, self.G_pad))
            self._whh_pad.append(pad2(self.w_hh_t[l], H, self.G_pad))
            self._bias_pad.append(pad2(self.bias[l], 1, self.G_pad))
        self._lin_w_pad = pad2(self.lin_w_t, H, self.D_pad)
        self._lin_b_pad = pad2(self.lin_b, 1, self.D_pad)
        self._even_mask = (jnp.arange(self.D_pad) % 2 == 0
                           ).astype(jnp.float32)[None, :]    # (1, D_pad)

        self._param_bytes = 4 * (
            sum(int(a.size) for a in self._wih_pad)
            + sum(int(a.size) for a in self._whh_pad)
            + sum(int(a.size) for a in self._bias_pad)
            + int(self._lin_w_pad.size) + int(self._lin_b_pad.size)
            + int(self._even_mask.size))
        self._vmem_limit = _pick_vmem_limit()

    # -------------------- VMEM estimate for block-size selection ----------
    def _vmem_estimate(self, t_blk, b_blk):
        f = 4
        h_lane = _round_up(self.hidden_dim, 128)
        scratch = f * (t_blk * b_blk * self.G_pad
                       + t_blk * b_blk * h_lane
                       + 2 * self.n_layers * b_blk * h_lane)
        blocks = f * 2 * t_blk * b_blk * (self.I_pad + self.D_pad)
        return scratch + blocks + 2 * self._param_bytes

    # -------------------- z construction (glue, plain JAX, time-major) ----
    def _build_z(self, batch_size, n_lags, key, condition=None, z=None):
        """Returns z time-major: (n_lags, batch_size, input_dim) float32."""
        if condition is not None:
            c = condition.shape[-1]
            z = 0.1 * jax.random.normal(
                key, (n_lags, batch_size, self.input_dim - c), dtype=jnp.float32)
            z = z.at[0].set(0.0)
            z = jnp.cumsum(z, axis=0)
            cond = jnp.broadcast_to(condition[None, :, :].astype(jnp.float32),
                                    (n_lags, batch_size, c))
            z = jnp.concatenate([z, cond], axis=2)
        else:
            if z is None:
                z = 0.1 * jax.random.normal(
                    key, (n_lags, batch_size, self.input_dim), dtype=jnp.float32)
            else:
                z = jnp.transpose(z.astype(jnp.float32), (1, 0, 2))  # (B,T,I)->(T,B,I)
            z = z.at[0].set(0.0)
            z = jnp.cumsum(z, axis=0)
        return z                                              # (T, B, I)

    # -------------------- forward (fused Pallas hot path) -----------------
    def forward(self, batch_size, n_lags, key=None, condition=None, z=None):
        z_tbi = self._build_z(batch_size, n_lags, key, condition, z)  # (T, B, I)
        T, B, I = z_tbi.shape

        # Batch blocking: fill the MXU rows (cap 128); >=2 blocks for large B
        # so both v7x TensorCores get work on the "parallel" axis.
        B_pad = _round_up(B, 8)
        if B_pad <= 128:
            b_blk = B_pad
        else:
            b_blk = 128
            B_pad = _round_up(B_pad, b_blk)

        # Time blocking: big blocks amortize per-grid-step overhead; shrink
        # only if the VMEM estimate would not fit the generation's budget.
        t_blk = min(self.t_blk, T)
        budget = int(self._vmem_limit * 0.7)
        while (t_blk >= 16 and t_blk % 16 == 0
               and self._vmem_estimate(t_blk, b_blk) > budget):
            t_blk //= 2
        T_pad = _round_up(T, t_blk)

        z_p = jnp.pad(z_tbi, ((0, T_pad - T), (0, B_pad - B),
                              (0, self.I_pad - I)))

        out_p = fused_lstm_generator(
            z_p, self._wih_pad, self._whh_pad, self._bias_pad,
            self._lin_w_pad, self._lin_b_pad, self._even_mask,
            t_blk=t_blk, b_blk=b_blk, hidden_dim=self.hidden_dim,
            use_softplus=self.use_softplus,
            vmem_limit_bytes=self._vmem_limit)

        out = out_p[:T, :B, :self.output_dim].transpose(1, 0, 2)  # (B, T, D)
        assert out.shape[1] == n_lags
        return out

    # -------------------- pure-JAX reference for verification -------------
    def reference(self, batch_size, n_lags, key=None, condition=None, z=None):
        x = self._build_z(batch_size, n_lags, key, condition, z)  # (T, B, I)
        H = self.hidden_dim
        B = x.shape[1]
        for l in range(self.n_layers):
            w_ih_t, w_hh_t, b = self.w_ih_t[l], self.w_hh_t[l], self.bias[l]

            def step(carry, xt, w_ih_t=w_ih_t, w_hh_t=w_hh_t, b=b):
                h_prev, c_prev = carry
                gates = xt @ w_ih_t + h_prev @ w_hh_t + b
                i_g = jax.nn.sigmoid(gates[:, :H])
                f_g = jax.nn.sigmoid(gates[:, H:2 * H])
                g_g = jnp.tanh(gates[:, 2 * H:3 * H])
                o_g = jax.nn.sigmoid(gates[:, 3 * H:])
                c_new = f_g * c_prev + i_g * g_g
                h_new = o_g * jnp.tanh(c_new)
                return (h_new, c_new), h_new

            init = (jnp.zeros((B, H), jnp.float32),
                    jnp.zeros((B, H), jnp.float32))
            _, x = jax.lax.scan(step, init, x)
        y = x @ self.lin_w_t + self.lin_b                     # (T, B, D)
        col = jnp.arange(self.output_dim)
        act = jax.nn.softplus(y) if self.use_softplus else jax.nn.relu(y)
        y = jnp.where((col % 2) == 0, y, act)
        return jnp.transpose(y, (1, 0, 2))


if __name__ == "__main__":
    input_dim, output_dim, hidden_dim, n_layers = 5, 4, 32, 2
    key = jax.random.PRNGKey(0)
    k_params, k_z1, k_z2, k_cond = jax.random.split(key, 4)

    model = ConditionalLSTMGeneratorConstraintPallas(
        input_dim, output_dim, hidden_dim, n_layers, key=k_params,
        init_fixed=True, vol_activation="softplus")

    # --- check 1: small shapes (single time block), user-provided z --------
    batch_size, n_lags = 4, 8
    z_raw = 0.1 * jax.random.normal(k_z1, (batch_size, n_lags, input_dim),
                                    dtype=jnp.float32)
    out = jax.block_until_ready(model.forward(batch_size, n_lags, z=z_raw))
    assert out.shape == (batch_size, n_lags, output_dim)
    ref = jax.block_until_ready(model.reference(batch_size, n_lags, z=z_raw))
    assert jnp.allclose(out, ref, atol=1e-3, rtol=1e-3), (
        float(jnp.max(jnp.abs(out - ref))))

    # --- check 2: long sequence -> multiple time blocks + time padding -----
    batch_size2, n_lags2 = 6, 100
    z_raw2 = 0.1 * jax.random.normal(k_z2, (batch_size2, n_lags2, input_dim),
                                     dtype=jnp.float32)
    out2 = jax.block_until_ready(model.forward(batch_size2, n_lags2, z=z_raw2))
    assert out2.shape == (batch_size2, n_lags2, output_dim)
    ref2 = jax.block_until_ready(model.reference(batch_size2, n_lags2, z=z_raw2))
    assert jnp.allclose(out2, ref2, atol=1e-3, rtol=1e-3), (
        float(jnp.max(jnp.abs(out2 - ref2))))

    # --- check 3: condition branch (noise generated in-module from key) ----
    batch_size3, n_lags3 = 4, 20
    cond = jax.random.normal(k_cond, (batch_size3, 2), dtype=jnp.float32)
    out3 = jax.block_until_ready(
        model.forward(batch_size3, n_lags3, key=k_z1, condition=cond))
    assert out3.shape == (batch_size3, n_lags3, output_dim)
    ref3 = jax.block_until_ready(
        model.reference(batch_size3, n_lags3, key=k_z1, condition=cond))
    assert jnp.allclose(out3, ref3, atol=1e-3, rtol=1e-3), (
        float(jnp.max(jnp.abs(out3 - ref3))))

    print("KERNEL_OK")
</pallas_src>

<mosaic_0001>
module attributes {stable_mosaic.version = 11 : i64} {
  func.func @_fused_lstm_head_kernel(%arg0: i32, %arg1: i32, %arg2: memref<8x8x128xf32, #tpu.memory_space<vmem>>, %arg3: memref<128x128xf32, #tpu.memory_space<vmem>>, %arg4: memref<32x128xf32, #tpu.memory_space<vmem>>, %arg5: memref<32x128xf32, #tpu.memory_space<vmem>>, %arg6: memref<32x128xf32, #tpu.memory_space<vmem>>, %arg7: memref<1x128xf32, #tpu.memory_space<vmem>>, %arg8: memref<1x128xf32, #tpu.memory_space<vmem>>, %arg9: memref<32x128xf32, #tpu.memory_space<vmem>>, %arg10: memref<1x128xf32, #tpu.memory_space<vmem>>, %arg11: memref<1x128xf32, #tpu.memory_space<vmem>>, %arg12: memref<8x8x128xf32, #tpu.memory_space<vmem>>, %arg13: memref<8x8x128xf32, #tpu.memory_space<vmem>>, %arg14: memref<8x8x32xf32, #tpu.memory_space<vmem>>, %arg15: memref<2x8x32xf32, #tpu.memory_space<vmem>>, %arg16: memref<2x8x32xf32, #tpu.memory_space<vmem>>) attributes {dimension_semantics = [#tpu.dimension_semantics<parallel>, #tpu.dimension_semantics<arbitrary>], iteration_bounds = array<i64: 1, 1>, scalar_prefetch = 0 : i64, scratch_operands = 4 : i64, tpu.core_type = #tpu.core_type<tc>, window_params = [{transform_indices = @transform_0, window_bounds = array<i64: 8, 8, 128>}, {pipeline_mode = #tpu.pipeline_mode<synchronous>, transform_indices = @transform_1, window_bounds = array<i64: 128, 128>}, {pipeline_mode = #tpu.pipeline_mode<synchronous>, transform_indices = @transform_2, window_bounds = array<i64: 32, 128>}, {pipeline_mode = #tpu.pipeline_mode<synchronous>, transform_indices = @transform_3, window_bounds = array<i64: 32, 128>}, {pipeline_mode = #tpu.pipeline_mode<synchronous>, transform_indices = @transform_4, window_bounds = array<i64: 32, 128>}, {pipeline_mode = #tpu.pipeline_mode<synchronous>, transform_indices = @transform_5, window_bounds = array<i64: 1, 128>}, {pipeline_mode = #tpu.pipeline_mode<synchronous>, transform_indices = @transform_6, window_bounds = array<i64: 1, 128>}, {pipeline_mode = #tpu.pipeline_mode<synchronous>, transform_indices = @transform_7, window_bounds = array<i64: 32, 128>}, {pipeline_mode = #tpu.pipeline_mode<synchronous>, transform_indices = @transform_8, window_bounds = array<i64: 1, 128>}, {pipeline_mode = #tpu.pipeline_mode<synchronous>, transform_indices = @transform_9, window_bounds = array<i64: 1, 128>}, {transform_indices = @transform_10, window_bounds = array<i64: 8, 8, 128>}]} {
    %c0_i32 = arith.constant 0 : i32
    %0 = arith.cmpi eq, %arg1, %c0_i32 : i32
    %1 = arith.extui %0 : i1 to i32
    %c0_i32_0 = arith.constant 0 : i32
    %2 = arith.cmpi ne, %1, %c0_i32_0 : i32
    scf.if %2 {
      %cst_199 = arith.constant 0.000000e+00 : f32
      %490 = vector.broadcast %cst_199 : f32 to vector<2x8x32xf32>
      %c0_200 = arith.constant 0 : index
      %c0_201 = arith.constant 0 : index
      %c0_202 = arith.constant 0 : index
      %491 = vector.load %arg15[%c0_200, %c0_201, %c0_202] : memref<2x8x32xf32, #tpu.memory_space<vmem>>, vector<2x8x32xf32>
      tpu.vector_store %arg15[%c0_200, %c0_201, %c0_202], %490 {strides = array<i32>} : memref<2x8x32xf32, #tpu.memory_space<vmem>>, vector<2x8x32xf32>,
      %cst_203 = arith.constant 0.000000e+00 : f32
      %492 = vector.broadcast %cst_203 : f32 to vector<2x8x32xf32>
      %c0_204 = arith.constant 0 : index
      %c0_205 = arith.constant 0 : index
      %c0_206 = arith.constant 0 : index
      %493 = vector.load %arg16[%c0_204, %c0_205, %c0_206] : memref<2x8x32xf32, #tpu.memory_space<vmem>>, vector<2x8x32xf32>
      tpu.vector_store %arg16[%c0_204, %c0_205, %c0_206], %492 {strides = array<i32>} : memref<2x8x32xf32, #tpu.memory_space<vmem>>, vector<2x8x32xf32>,
    } else {
    }
    %3 = tpu.iota {dimensions = array<i32: 1>} : vector<8x128xi32>
    %c64_i32 = arith.constant 64 : i32
    %4 = vector.broadcast %c64_i32 : i32 to vector<8x128xi32>
    %5 = arith.cmpi sge, %3, %4 : vector<8x128xi32>
    %c96_i32 = arith.constant 96 : i32
    %6 = vector.broadcast %c96_i32 : i32 to vector<8x128xi32>
    %7 = arith.cmpi slt, %3, %6 : vector<8x128xi32>
    %8 = arith.andi %5, %7 : vector<8x128xi1>
    %c0 = arith.constant 0 : index
    %c0_1 = arith.constant 0 : index
    %c0_2 = arith.constant 0 : index
    %9 = vector.load %arg2[%c0, %c0_1, %c0_2] : memref<8x8x128xf32, #tpu.memory_space<vmem>>, vector<8x8x128xf32>
    %10 = vector.shape_cast %9 : vector<8x8x128xf32> to vector<64x128xf32>
    %c0_3 = arith.constant 0 : index
    %c0_4 = arith.constant 0 : index
    %11 = vector.load %arg3[%c0_3, %c0_4] : memref<128x128xf32, #tpu.memory_space<vmem>>, vector<128x128xf32>
    %cst = arith.constant dense<0.000000e+00> : vector<64x128xf32>
    %12 = tpu.matmul %10, %11, %cst {dimension_numbers = #tpu.dot_dimension_numbers<[1], [0], [0], [1], [0, 0, 1, 1], [], []>} : vector<64x128xf32>, vector<128x128xf32>, vector<64x128xf32> -> vector<64x128xf32>
    %c0_5 = arith.constant 0 : index
    %c0_6 = arith.constant 0 : index
    %13 = vector.load %arg7[%c0_5, %c0_6] : memref<1x128xf32, #tpu.memory_space<vmem>>, vector<1x128xf32>
    %14 = vector.broadcast %13 : vector<1x128xf32> to vector<64x128xf32>
    %15 = arith.addf %12, %14 : vector<64x128xf32>
    %16 = vector.shape_cast %15 : vector<64x128xf32> to vector<8x8x128xf32>
    %c0_7 = arith.constant 0 : index
    %c0_8 = arith.constant 0 : index
    %c0_9 = arith.constant 0 : index
    %17 = vector.load %arg13[%c0_7, %c0_8, %c0_9] : memref<8x8x128xf32, #tpu.memory_space<vmem>>, vector<8x8x128xf32>
    tpu.vector_store %arg13[%c0_7, %c0_8, %c0_9], %16 {strides = array<i32>} : memref<8x8x128xf32, #tpu.memory_space<vmem>>, vector<8x8x128xf32>,
    %c0_10 = arith.constant 0 : index
    %c0_11 = arith.constant 0 : index
    %c0_12 = arith.constant 0 : index
    %18 = vector.load %arg15[%c0_10, %c0_11, %c0_12] : memref<2x8x32xf32, #tpu.memory_space<vmem>>, vector<1x8x32xf32>
    %19 = vector.shape_cast %18 : vector<1x8x32xf32> to vector<8x32xf32>
    %c0_13 = arith.constant 0 : index
    %c0_14 = arith.constant 0 : index
    %c0_15 = arith.constant 0 : index
    %20 = vector.load %arg16[%c0_13, %c0_14, %c0_15] : memref<2x8x32xf32, #tpu.memory_space<vmem>>, vector<1x8x32xf32>
    %21 = vector.shape_cast %20 : vector<1x8x32xf32> to vector<8x32xf32>
    %c0_i32_16 = arith.constant 0 : i32
    %22 = arith.index_cast %c0_i32_16 : i32 to index
    %c0_17 = arith.constant 0 : index
    %c0_18 = arith.constant 0 : index
    %23 = vector.load %arg13[%22, %c0_17, %c0_18] : memref<8x8x128xf32, #tpu.memory_space<vmem>>, vector<1x8x128xf32>
    %24 = vector.shape_cast %23 : vector<1x8x128xf32> to vector<8x128xf32>
    %c0_19 = arith.constant 0 : index
    %c0_20 = arith.constant 0 : index
    %25 = vector.load %arg5[%c0_19, %c0_20] : memref<32x128xf32, #tpu.memory_space<vmem>>, vector<32x128xf32>
    %cst_21 = arith.constant dense<0.000000e+00> : vector<8x128xf32>
    %26 = tpu.matmul %19, %25, %cst_21 {dimension_numbers = #tpu.dot_dimension_numbers<[1], [0], [0], [1], [0, 0, 1, 1], [], []>} : vector<8x32xf32>, vector<32x128xf32>, vector<8x128xf32> -> vector<8x128xf32>
    %27 = arith.addf %24, %26 : vector<8x128xf32>
    %28 = arith.negf %27 : vector<8x128xf32>
    %29 = math.exp %28 : vector<8x128xf32>
    %cst_22 = arith.constant 1.000000e+00 : f32
    %30 = vector.broadcast %cst_22 : f32 to vector<8x128xf32>
    %31 = arith.addf %30, %29 : vector<8x128xf32>
    %32 = arith.divf %30, %31 : vector<8x128xf32>
    %33 = math.tanh %27 : vector<8x128xf32>
    %34 = arith.select %8, %33, %32 : vector<8x128xi1>, vector<8x128xf32>
    %35 = vector.extract_strided_slice %34 {offsets = [0, 0], sizes = [8, 32], strides = [1, 1]} : vector<8x128xf32> to vector<8x32xf32>
    %36 = vector.extract_strided_slice %34 {offsets = [0, 32], sizes = [8, 32], strides = [1, 1]} : vector<8x128xf32> to vector<8x32xf32>
    %37 = vector.extract_strided_slice %34 {offsets = [0, 64], sizes = [8, 32], strides = [1, 1]} : vector<8x128xf32> to vector<8x32xf32>
    %38 = vector.extract_strided_slice %34 {offsets = [0, 96], sizes = [8, 32], strides = [1, 1]} : vector<8x128xf32> to vector<8x32xf32>
    %39 = arith.mulf %36, %21 : vector<8x32xf32>
    %40 = arith.mulf %35, %37 : vector<8x32xf32>
    %41 = arith.addf %39, %40 : vector<8x32xf32>
    %42 = math.tanh %41 : vector<8x32xf32>
    %43 = arith.mulf %38, %42 : vector<8x32xf32>
    %44 = arith.index_cast %c0_i32_16 : i32 to index
    %c0_23 = arith.constant 0 : index
    %c0_24 = arith.constant 0 : index
    %45 = vector.load %arg14[%44, %c0_23, %c0_24] : memref<8x8x32xf32, #tpu.memory_space<vmem>>, vector<1x8x32xf32>
    %46 = vector.shape_cast %45 : vector<1x8x32xf32> to vector<8x32xf32>
    %47 = vector.shape_cast %43 : vector<8x32xf32> to vector<1x8x32xf32>
    tpu.vector_store %arg14[%44, %c0_23, %c0_24], %47 {strides = array<i32>} : memref<8x8x32xf32, #tpu.memory_space<vmem>>, vector<1x8x32xf32>,
    %c1_i32 = arith.constant 1 : i32
    %48 = arith.index_cast %c1_i32 : i32 to index
    %c0_25 = arith.constant 0 : index
    %c0_26 = arith.constant 0 : index
    %49 = vector.load %arg13[%48, %c0_25, %c0_26] : memref<8x8x128xf32, #tpu.memory_space<vmem>>, vector<1x8x128xf32>
    %50 = vector.shape_cast %49 : vector<1x8x128xf32> to vector<8x128xf32>
    %c0_27 = arith.constant 0 : index
    %c0_28 = arith.constant 0 : index
    %51 = vector.load %arg5[%c0_27, %c0_28] : memref<32x128xf32, #tpu.memory_space<vmem>>, vector<32x128xf32>
    %cst_29 = arith.constant dense<0.000000e+00> : vector<8x128xf32>
    %52 = tpu.matmul %43, %51, %cst_29 {dimension_numbers = #tpu.dot_dimension_numbers<[1], [0], [0], [1], [0, 0, 1, 1], [], []>} : vector<8x32xf32>, vector<32x128xf32>, vector<8x128xf32> -> vector<8x128xf32>
    %53 = arith.addf %50, %52 : vector<8x128xf32>
    %54 = arith.negf %53 : vector<8x128xf32>
    %55 = math.exp %54 : vector<8x128xf32>
    %cst_30 = arith.constant 1.000000e+00 : f32
    %56 = vector.broadcast %cst_30 : f32 to vector<8x128xf32>
    %57 = arith.addf %56, %55 : vector<8x128xf32>
    %58 = arith.divf %56, %57 : vector<8x128xf32>
    %59 = math.tanh %53 : vector<8x128xf32>
    %60 = arith.select %8, %59, %58 : vector<8x128xi1>, vector<8x128xf32>
    %61 = vector.extract_strided_slice %60 {offsets = [0, 0], sizes = [8, 32], strides = [1, 1]} : vector<8x128xf32> to vector<8x32xf32>
    %62 = vector.extract_strided_slice %60 {offsets = [0, 32], sizes = [8, 32], strides = [1, 1]} : vector<8x128xf32> to vector<8x32xf32>
    %63 = vector.extract_strided_slice %60 {offsets = [0, 64], sizes = [8, 32], strides = [1, 1]} : vector<8x128xf32> to vector<8x32xf32>
    %64 = vector.extract_strided_slice %60 {offsets = [0, 96], sizes = [8, 32], strides = [1, 1]} : vector<8x128xf32> to vector<8x32xf32>
    %65 = arith.mulf %62, %41 : vector<8x32xf32>
    %66 = arith.mulf %61, %63 : vector<8x32xf32>
    %67 = arith.addf %65, %66 : vector<8x32xf32>
    %68 = math.tanh %67 : vector<8x32xf32>
    %69 = arith.mulf %64, %68 : vector<8x32xf32>
    %70 = arith.index_cast %c1_i32 : i32 to index
    %c0_31 = arith.constant 0 : index
    %c0_32 = arith.constant 0 : index
    %71 = vector.load %arg14[%70, %c0_31, %c0_32] : memref<8x8x32xf32, #tpu.memory_space<vmem>>, vector<1x8x32xf32>
    %72 = vector.shape_cast %71 : vector<1x8x32xf32> to vector<8x32xf32>
    %73 = vector.shape_cast %69 : vector<8x32xf32> to vector<1x8x32xf32>
    tpu.vector_store %arg14[%70, %c0_31, %c0_32], %73 {strides = array<i32>} : memref<8x8x32xf32, #tpu.memory_space<vmem>>, vector<1x8x32xf32>,
    %c2_i32 = arith.constant 2 : i32
    %74 = arith.index_cast %c2_i32 : i32 to index
    %c0_33 = arith.constant 0 : index
    %c0_34 = arith.constant 0 : index
    %75 = vector.load %arg13[%74, %c0_33, %c0_34] : memref<8x8x128xf32, #tpu.memory_space<vmem>>, vector<1x8x128xf32>
    %76 = vector.shape_cast %75 : vector<1x8x128xf32> to vector<8x128xf32>
    %c0_35 = arith.constant 0 : index
    %c0_36 = arith.constant 0 : index
    %77 = vector.load %arg5[%c0_35, %c0_36] : memref<32x128xf32, #tpu.memory_space<vmem>>, vector<32x128xf32>
    %cst_37 = arith.constant dense<0.000000e+00> : vector<8x128xf32>
    %78 = tpu.matmul %69, %77, %cst_37 {dimension_numbers = #tpu.dot_dimension_numbers<[1], [0], [0], [1], [0, 0, 1, 1], [], []>} : vector<8x32xf32>, vector<32x128xf32>, vector<8x128xf32> -> vector<8x128xf32>
    %79 = arith.addf %76, %78 : vector<8x128xf32>
    %80 = arith.negf %79 : vector<8x128xf32>
    %81 = math.exp %80 : vector<8x128xf32>
    %cst_38 = arith.constant 1.000000e+00 : f32
    %82 = vector.broadcast %cst_38 : f32 to vector<8x128xf32>
    %83 = arith.addf %82, %81 : vector<8x128xf32>
    %84 = arith.divf %82, %83 : vector<8x128xf32>
    %85 = math.tanh %79 : vector<8x128xf32>
    %86 = arith.select %8, %85, %84 : vector<8x128xi1>, vector<8x128xf32>
    %87 = vector.extract_strided_slice %86 {offsets = [0, 0], sizes = [8, 32], strides = [1, 1]} : vector<8x128xf32> to vector<8x32xf32>
    %88 = vector.extract_strided_slice %86 {offsets = [0, 32], sizes = [8, 32], strides = [1, 1]} : vector<8x128xf32> to vector<8x32xf32>
    %89 = vector.extract_strided_slice %86 {offsets = [0, 64], sizes = [8, 32], strides = [1, 1]} : vector<8x128xf32> to vector<8x32xf32>
    %90 = vector.extract_strided_slice %86 {offsets = [0, 96], sizes = [8, 32], strides = [1, 1]} : vector<8x128xf32> to vector<8x32xf32>
    %91 = arith.mulf %88, %67 : vector<8x32xf32>
    %92 = arith.mulf %87, %89 : vector<8x32xf32>
    %93 = arith.addf %91, %92 : vector<8x32xf32>
    %94 = math.tanh %93 : vector<8x32xf32>
    %95 = arith.mulf %90, %94 : vector<8x32xf32>
    %96 = arith.index_cast %c2_i32 : i32 to index
    %c0_39 = arith.constant 0 : index
    %c0_40 = arith.constant 0 : index
    %97 = vector.load %arg14[%96, %c0_39, %c0_40] : memref<8x8x32xf32, #tpu.memory_space<vmem>>, vector<1x8x32xf32>
    %98 = vector.shape_cast %97 : vector<1x8x32xf32> to vector<8x32xf32>
    %99 = vector.shape_cast %95 : vector<8x32xf32> to vector<1x8x32xf32>
    tpu.vector_store %arg14[%96, %c0_39, %c0_40], %99 {strides = array<i32>} : memref<8x8x32xf32, #tpu.memory_space<vmem>>, vector<1x8x32xf32>,
    %c3_i32 = arith.constant 3 : i32
    %100 = arith.index_cast %c3_i32 : i32 to index
    %c0_41 = arith.constant 0 : index
    %c0_42 = arith.constant 0 : index
    %101 = vector.load %arg13[%100, %c0_41, %c0_42] : memref<8x8x128xf32, #tpu.memory_space<vmem>>, vector<1x8x128xf32>
    %102 = vector.shape_cast %101 : vector<1x8x128xf32> to vector<8x128xf32>
    %c0_43 = arith.constant 0 : index
    %c0_44 = arith.constant 0 : index
    %103 = vector.load %arg5[%c0_43, %c0_44] : memref<32x128xf32, #tpu.memory_space<vmem>>, vector<32x128xf32>
    %cst_45 = arith.constant dense<0.000000e+00> : vector<8x128xf32>
    %104 = tpu.matmul %95, %103, %cst_45 {dimension_numbers = #tpu.dot_dimension_numbers<[1], [0], [0], [1], [0, 0, 1, 1], [], []>} : vector<8x32xf32>, vector<32x128xf32>, vector<8x128xf32> -> vector<8x128xf32>
    %105 = arith.addf %102, %104 : vector<8x128xf32>
    %106 = arith.negf %105 : vector<8x128xf32>
    %107 = math.exp %106 : vector<8x128xf32>
    %cst_46 = arith.constant 1.000000e+00 : f32
    %108 = vector.broadcast %cst_46 : f32 to vector<8x128xf32>
    %109 = arith.addf %108, %107 : vector<8x128xf32>
    %110 = arith.divf %108, %109 : vector<8x128xf32>
    %111 = math.tanh %105 : vector<8x128xf32>
    %112 = arith.select %8, %111, %110 : vector<8x128xi1>, vector<8x128xf32>
    %113 = vector.extract_strided_slice %112 {offsets = [0, 0], sizes = [8, 32], strides = [1, 1]} : vector<8x128xf32> to vector<8x32xf32>
    %114 = vector.extract_strided_slice %112 {offsets = [0, 32], sizes = [8, 32], strides = [1, 1]} : vector<8x128xf32> to vector<8x32xf32>
    %115 = vector.extract_strided_slice %112 {offsets = [0, 64], sizes = [8, 32], strides = [1, 1]} : vector<8x128xf32> to vector<8x32xf32>
    %116 = vector.extract_strided_slice %112 {offsets = [0, 96], sizes = [8, 32], strides = [1, 1]} : vector<8x128xf32> to vector<8x32xf32>
    %117 = arith.mulf %114, %93 : vector<8x32xf32>
    %118 = arith.mulf %113, %115 : vector<8x32xf32>
    %119 = arith.addf %117, %118 : vector<8x32xf32>
    %120 = math.tanh %119 : vector<8x32xf32>
    %121 = arith.mulf %116, %120 : vector<8x32xf32>
    %122 = arith.index_cast %c3_i32 : i32 to index
    %c0_47 = arith.constant 0 : index
    %c0_48 = arith.constant 0 : index
    %123 = vector.load %arg14[%122, %c0_47, %c0_48] : memref<8x8x32xf32, #tpu.memory_space<vmem>>, vector<1x8x32xf32>
    %124 = vector.shape_cast %123 : vector<1x8x32xf32> to vector<8x32xf32>
    %125 = vector.shape_cast %121 : vector<8x32xf32> to vector<1x8x32xf32>
    tpu.vector_store %arg14[%122, %c0_47, %c0_48], %125 {strides = array<i32>} : memref<8x8x32xf32, #tpu.memory_space<vmem>>, vector<1x8x32xf32>,
    %c4_i32 = arith.constant 4 : i32
    %126 = arith.index_cast %c4_i32 : i32 to index
    %c0_49 = arith.constant 0 : index
    %c0_50 = arith.constant 0 : index
    %127 = vector.load %arg13[%126, %c0_49, %c0_50] : memref<8x8x128xf32, #tpu.memory_space<vmem>>, vector<1x8x128xf32>
    %128 = vector.shape_cast %127 : vector<1x8x128xf32> to vector<8x128xf32>
    %c0_51 = arith.constant 0 : index
    %c0_52 = arith.constant 0 : index
    %129 = vector.load %arg5[%c0_51, %c0_52] : memref<32x128xf32, #tpu.memory_space<vmem>>, vector<32x128xf32>
    %cst_53 = arith.constant dense<0.000000e+00> : vector<8x128xf32>
    %130 = tpu.matmul %121, %129, %cst_53 {dimension_numbers = #tpu.dot_dimension_numbers<[1], [0], [0], [1], [0, 0, 1, 1], [], []>} : vector<8x32xf32>, vector<32x128xf32>, vector<8x128xf32> -> vector<8x128xf32>
    %131 = arith.addf %128, %130 : vector<8x128xf32>
    %132 = arith.negf %131 : vector<8x128xf32>
    %133 = math.exp %132 : vector<8x128xf32>
    %cst_54 = arith.constant 1.000000e+00 : f32
    %134 = vector.broadcast %cst_54 : f32 to vector<8x128xf32>
    %135 = arith.addf %134, %133 : vector<8x128xf32>
    %136 = arith.divf %134, %135 : vector<8x128xf32>
    %137 = math.tanh %131 : vector<8x128xf32>
    %138 = arith.select %8, %137, %136 : vector<8x128xi1>, vector<8x128xf32>
    %139 = vector.extract_strided_slice %138 {offsets = [0, 0], sizes = [8, 32], strides = [1, 1]} : vector<8x128xf32> to vector<8x32xf32>
    %140 = vector.extract_strided_slice %138 {offsets = [0, 32], sizes = [8, 32], strides = [1, 1]} : vector<8x128xf32> to vector<8x32xf32>
    %141 = vector.extract_strided_slice %138 {offsets = [0, 64], sizes = [8, 32], strides = [1, 1]} : vector<8x128xf32> to vector<8x32xf32>
    %142 = vector.extract_strided_slice %138 {offsets = [0, 96], sizes = [8, 32], strides = [1, 1]} : vector<8x128xf32> to vector<8x32xf32>
    %143 = arith.mulf %140, %119 : vector<8x32xf32>
    %144 = arith.mulf %139, %141 : vector<8x32xf32>
    %145 = arith.addf %143, %144 : vector<8x32xf32>
    %146 = math.tanh %145 : vector<8x32xf32>
    %147 = arith.mulf %142, %146 : vector<8x32xf32>
    %148 = arith.index_cast %c4_i32 : i32 to index
    %c0_55 = arith.constant 0 : index
    %c0_56 = arith.constant 0 : index
    %149 = vector.load %arg14[%148, %c0_55, %c0_56] : memref<8x8x32xf32, #tpu.memory_space<vmem>>, vector<1x8x32xf32>
    %150 = vector.shape_cast %149 : vector<1x8x32xf32> to vector<8x32xf32>
    %151 = vector.shape_cast %147 : vector<8x32xf32> to vector<1x8x32xf32>
    tpu.vector_store %arg14[%148, %c0_55, %c0_56], %151 {strides = array<i32>} : memref<8x8x32xf32, #tpu.memory_space<vmem>>, vector<1x8x32xf32>,
    %c5_i32 = arith.constant 5 : i32
    %152 = arith.index_cast %c5_i32 : i32 to index
    %c0_57 = arith.constant 0 : index
    %c0_58 = arith.constant 0 : index
    %153 = vector.load %arg13[%152, %c0_57, %c0_58] : memref<8x8x128xf32, #tpu.memory_space<vmem>>, vector<1x8x128xf32>
    %154 = vector.shape_cast %153 : vector<1x8x128xf32> to vector<8x128xf32>
    %c0_59 = arith.constant 0 : index
    %c0_60 = arith.constant 0 : index
    %155 = vector.load %arg5[%c0_59, %c0_60] : memref<32x128xf32, #tpu.memory_space<vmem>>, vector<32x128xf32>
    %cst_61 = arith.constant dense<0.000000e+00> : vector<8x128xf32>
    %156 = tpu.matmul %147, %155, %cst_61 {dimension_numbers = #tpu.dot_dimension_numbers<[1], [0], [0], [1], [0, 0, 1, 1], [], []>} : vector<8x32xf32>, vector<32x128xf32>, vector<8x128xf32> -> vector<8x128xf32>
    %157 = arith.addf %154, %156 : vector<8x128xf32>
    %158 = arith.negf %157 : vector<8x128xf32>
    %159 = math.exp %158 : vector<8x128xf32>
    %cst_62 = arith.constant 1.000000e+00 : f32
    %160 = vector.broadcast %cst_62 : f32 to vector<8x128xf32>
    %161 = arith.addf %160, %159 : vector<8x128xf32>
    %162 = arith.divf %160, %161 : vector<8x128xf32>
    %163 = math.tanh %157 : vector<8x128xf32>
    %164 = arith.select %8, %163, %162 : vector<8x128xi1>, vector<8x128xf32>
    %165 = vector.extract_strided_slice %164 {offsets = [0, 0], sizes = [8, 32], strides = [1, 1]} : vector<8x128xf32> to vector<8x32xf32>
    %166 = vector.extract_strided_slice %164 {offsets = [0, 32], sizes = [8, 32], strides = [1, 1]} : vector<8x128xf32> to vector<8x32xf32>
    %167 = vector.extract_strided_slice %164 {offsets = [0, 64], sizes = [8, 32], strides = [1, 1]} : vector<8x128xf32> to vector<8x32xf32>
    %168 = vector.extract_strided_slice %164 {offsets = [0, 96], sizes = [8, 32], strides = [1, 1]} : vector<8x128xf32> to vector<8x32xf32>
    %169 = arith.mulf %166, %145 : vector<8x32xf32>
    %170 = arith.mulf %165, %167 : vector<8x32xf32>
    %171 = arith.addf %169, %170 : vector<8x32xf32>
    %172 = math.tanh %171 : vector<8x32xf32>
    %173 = arith.mulf %168, %172 : vector<8x32xf32>
    %174 = arith.index_cast %c5_i32 : i32 to index
    %c0_63 = arith.constant 0 : index
    %c0_64 = arith.constant 0 : index
    %175 = vector.load %arg14[%174, %c0_63, %c0_64] : memref<8x8x32xf32, #tpu.memory_space<vmem>>, vector<1x8x32xf32>
    %176 = vector.shape_cast %175 : vector<1x8x32xf32> to vector<8x32xf32>
    %177 = vector.shape_cast %173 : vector<8x32xf32> to vector<1x8x32xf32>
    tpu.vector_store %arg14[%174, %c0_63, %c0_64], %177 {strides = array<i32>} : memref<8x8x32xf32, #tpu.memory_space<vmem>>, vector<1x8x32xf32>,
    %c6_i32 = arith.constant 6 : i32
    %178 = arith.index_cast %c6_i32 : i32 to index
    %c0_65 = arith.constant 0 : index
    %c0_66 = arith.constant 0 : index
    %179 = vector.load %arg13[%178, %c0_65, %c0_66] : memref<8x8x128xf32, #tpu.memory_space<vmem>>, vector<1x8x128xf32>
    %180 = vector.shape_cast %179 : vector<1x8x128xf32> to vector<8x128xf32>
    %c0_67 = arith.constant 0 : index
    %c0_68 = arith.constant 0 : index
    %181 = vector.load %arg5[%c0_67, %c0_68] : memref<32x128xf32, #tpu.memory_space<vmem>>, vector<32x128xf32>
    %cst_69 = arith.constant dense<0.000000e+00> : vector<8x128xf32>
    %182 = tpu.matmul %173, %181, %cst_69 {dimension_numbers = #tpu.dot_dimension_numbers<[1], [0], [0], [1], [0, 0, 1, 1], [], []>} : vector<8x32xf32>, vector<32x128xf32>, vector<8x128xf32> -> vector<8x128xf32>
    %183 = arith.addf %180, %182 : vector<8x128xf32>
    %184 = arith.negf %183 : vector<8x128xf32>
    %185 = math.exp %184 : vector<8x128xf32>
    %cst_70 = arith.constant 1.000000e+00 : f32
    %186 = vector.broadcast %cst_70 : f32 to vector<8x128xf32>
    %187 = arith.addf %186, %185 : vector<8x128xf32>
    %188 = arith.divf %186, %187 : vector<8x128xf32>
    %189 = math.tanh %183 : vector<8x128xf32>
    %190 = arith.select %8, %189, %188 : vector<8x128xi1>, vector<8x128xf32>
    %191 = vector.extract_strided_slice %190 {offsets = [0, 0], sizes = [8, 32], strides = [1, 1]} : vector<8x128xf32> to vector<8x32xf32>
    %192 = vector.extract_strided_slice %190 {offsets = [0, 32], sizes = [8, 32], strides = [1, 1]} : vector<8x128xf32> to vector<8x32xf32>
    %193 = vector.extract_strided_slice %190 {offsets = [0, 64], sizes = [8, 32], strides = [1, 1]} : vector<8x128xf32> to vector<8x32xf32>
    %194 = vector.extract_strided_slice %190 {offsets = [0, 96], sizes = [8, 32], strides = [1, 1]} : vector<8x128xf32> to vector<8x32xf32>
    %195 = arith.mulf %192, %171 : vector<8x32xf32>
    %196 = arith.mulf %191, %193 : vector<8x32xf32>
    %197 = arith.addf %195, %196 : vector<8x32xf32>
    %198 = math.tanh %197 : vector<8x32xf32>
    %199 = arith.mulf %194, %198 : vector<8x32xf32>
    %200 = arith.index_cast %c6_i32 : i32 to index
    %c0_71 = arith.constant 0 : index
    %c0_72 = arith.constant 0 : index
    %201 = vector.load %arg14[%200, %c0_71, %c0_72] : memref<8x8x32xf32, #tpu.memory_space<vmem>>, vector<1x8x32xf32>
    %202 = vector.shape_cast %201 : vector<1x8x32xf32> to vector<8x32xf32>
    %203 = vector.shape_cast %199 : vector<8x32xf32> to vector<1x8x32xf32>
    tpu.vector_store %arg14[%200, %c0_71, %c0_72], %203 {strides = array<i32>} : memref<8x8x32xf32, #tpu.memory_space<vmem>>, vector<1x8x32xf32>,
    %c7_i32 = arith.constant 7 : i32
    %204 = arith.index_cast %c7_i32 : i32 to index
    %c0_73 = arith.constant 0 : index
    %c0_74 = arith.constant 0 : index
    %205 = vector.load %arg13[%204, %c0_73, %c0_74] : memref<8x8x128xf32, #tpu.memory_space<vmem>>, vector<1x8x128xf32>
    %206 = vector.shape_cast %205 : vector<1x8x128xf32> to vector<8x128xf32>
    %c0_75 = arith.constant 0 : index
    %c0_76 = arith.constant 0 : index
    %207 = vector.load %arg5[%c0_75, %c0_76] : memref<32x128xf32, #tpu.memory_space<vmem>>, vector<32x128xf32>
    %cst_77 = arith.constant dense<0.000000e+00> : vector<8x128xf32>
    %208 = tpu.matmul %199, %207, %cst_77 {dimension_numbers = #tpu.dot_dimension_numbers<[1], [0], [0], [1], [0, 0, 1, 1], [], []>} : vector<8x32xf32>, vector<32x128xf32>, vector<8x128xf32> -> vector<8x128xf32>
    %209 = arith.addf %206, %208 : vector<8x128xf32>
    %210 = arith.negf %209 : vector<8x128xf32>
    %211 = math.exp %210 : vector<8x128xf32>
    %cst_78 = arith.constant 1.000000e+00 : f32
    %212 = vector.broadcast %cst_78 : f32 to vector<8x128xf32>
    %213 = arith.addf %212, %211 : vector<8x128xf32>
    %214 = arith.divf %212, %213 : vector<8x128xf32>
    %215 = math.tanh %209 : vector<8x128xf32>
    %216 = arith.select %8, %215, %214 : vector<8x128xi1>, vector<8x128xf32>
    %217 = vector.extract_strided_slice %216 {offsets = [0, 0], sizes = [8, 32], strides = [1, 1]} : vector<8x128xf32> to vector<8x32xf32>
    %218 = vector.extract_strided_slice %216 {offsets = [0, 32], sizes = [8, 32], strides = [1, 1]} : vector<8x128xf32> to vector<8x32xf32>
    %219 = vector.extract_strided_slice %216 {offsets = [0, 64], sizes = [8, 32], strides = [1, 1]} : vector<8x128xf32> to vector<8x32xf32>
    %220 = vector.extract_strided_slice %216 {offsets = [0, 96], sizes = [8, 32], strides = [1, 1]} : vector<8x128xf32> to vector<8x32xf32>
    %221 = arith.mulf %218, %197 : vector<8x32xf32>
    %222 = arith.mulf %217, %219 : vector<8x32xf32>
    %223 = arith.addf %221, %222 : vector<8x32xf32>
    %224 = math.tanh %223 : vector<8x32xf32>
    %225 = arith.mulf %220, %224 : vector<8x32xf32>
    %226 = arith.index_cast %c7_i32 : i32 to index
    %c0_79 = arith.constant 0 : index
    %c0_80 = arith.constant 0 : index
    %227 = vector.load %arg14[%226, %c0_79, %c0_80] : memref<8x8x32xf32, #tpu.memory_space<vmem>>, vector<1x8x32xf32>
    %228 = vector.shape_cast %227 : vector<1x8x32xf32> to vector<8x32xf32>
    %229 = vector.shape_cast %225 : vector<8x32xf32> to vector<1x8x32xf32>
    tpu.vector_store %arg14[%226, %c0_79, %c0_80], %229 {strides = array<i32>} : memref<8x8x32xf32, #tpu.memory_space<vmem>>, vector<1x8x32xf32>,
    %c8_i32 = arith.constant 8 : i32
    %c0_81 = arith.constant 0 : index
    %c0_82 = arith.constant 0 : index
    %c0_83 = arith.constant 0 : index
    %230 = vector.load %arg15[%c0_81, %c0_82, %c0_83] : memref<2x8x32xf32, #tpu.memory_space<vmem>>, vector<1x8x32xf32>
    %231 = vector.shape_cast %230 : vector<1x8x32xf32> to vector<8x32xf32>
    %232 = vector.shape_cast %225 : vector<8x32xf32> to vector<1x8x32xf32>
    tpu.vector_store %arg15[%c0_81, %c0_82, %c0_83], %232 {strides = array<i32>} : memref<2x8x32xf32, #tpu.memory_space<vmem>>, vector<1x8x32xf32>,
    %c0_84 = arith.constant 0 : index
    %c0_85 = arith.constant 0 : index
    %c0_86 = arith.constant 0 : index
    %233 = vector.load %arg16[%c0_84, %c0_85, %c0_86] : memref<2x8x32xf32, #tpu.memory_space<vmem>>, vector<1x8x32xf32>
    %234 = vector.shape_cast %233 : vector<1x8x32xf32> to vector<8x32xf32>
    %235 = vector.shape_cast %223 : vector<8x32xf32> to vector<1x8x32xf32>
    tpu.vector_store %arg16[%c0_84, %c0_85, %c0_86], %235 {strides = array<i32>} : memref<2x8x32xf32, #tpu.memory_space<vmem>>, vector<1x8x32xf32>,
    %c0_87 = arith.constant 0 : index
    %c0_88 = arith.constant 0 : index
    %c0_89 = arith.constant 0 : index
    %236 = vector.load %arg14[%c0_87, %c0_88, %c0_89] : memref<8x8x32xf32, #tpu.memory_space<vmem>>, vector<8x8x32xf32>
    %237 = vector.shape_cast %236 : vector<8x8x32xf32> to vector<64x32xf32>
    %c0_90 = arith.constant 0 : index
    %c0_91 = arith.constant 0 : index
    %238 = vector.load %arg4[%c0_90, %c0_91] : memref<32x128xf32, #tpu.memory_space<vmem>>, vector<32x128xf32>
    %cst_92 = arith.constant dense<0.000000e+00> : vector<64x128xf32>
    %239 = tpu.matmul %237, %238, %cst_92 {dimension_numbers = #tpu.dot_dimension_numbers<[1], [0], [0], [1], [0, 0, 1, 1], [], []>} : vector<64x32xf32>, vector<32x128xf32>, vector<64x128xf32> -> vector<64x128xf32>
    %c0_93 = arith.constant 0 : index
    %c0_94 = arith.constant 0 : index
    %240 = vector.load %arg8[%c0_93, %c0_94] : memref<1x128xf32, #tpu.memory_space<vmem>>, vector<1x128xf32>
    %241 = vector.broadcast %240 : vector<1x128xf32> to vector<64x128xf32>
    %242 = arith.addf %239, %241 : vector<64x128xf32>
    %243 = vector.shape_cast %242 : vector<64x128xf32> to vector<8x8x128xf32>
    %c0_95 = arith.constant 0 : index
    %c0_96 = arith.constant 0 : index
    %c0_97 = arith.constant 0 : index
    %244 = vector.load %arg13[%c0_95, %c0_96, %c0_97] : memref<8x8x128xf32, #tpu.memory_space<vmem>>, vector<8x8x128xf32>
    tpu.vector_store %arg13[%c0_95, %c0_96, %c0_97], %243 {strides = array<i32>} : memref<8x8x128xf32, #tpu.memory_space<vmem>>, vector<8x8x128xf32>,
    %c1 = arith.constant 1 : index
    %c0_98 = arith.constant 0 : index
    %c0_99 = arith.constant 0 : index
    %245 = vector.load %arg15[%c1, %c0_98, %c0_99] : memref<2x8x32xf32, #tpu.memory_space<vmem>>, vector<1x8x32xf32>
    %246 = vector.shape_cast %245 : vector<1x8x32xf32> to vector<8x32xf32>
    %c1_100 = arith.constant 1 : index
    %c0_101 = arith.constant 0 : index
    %c0_102 = arith.constant 0 : index
    %247 = vector.load %arg16[%c1_100, %c0_101, %c0_102] : memref<2x8x32xf32, #tpu.memory_space<vmem>>, vector<1x8x32xf32>
    %248 = vector.shape_cast %247 : vector<1x8x32xf32> to vector<8x32xf32>
    %c0_i32_103 = arith.constant 0 : i32
    %249 = arith.index_cast %c0_i32_103 : i32 to index
    %c0_104 = arith.constant 0 : index
    %c0_105 = arith.constant 0 : index
    %250 = vector.load %arg13[%249, %c0_104, %c0_105] : memref<8x8x128xf32, #tpu.memory_space<vmem>>, vector<1x8x128xf32>
    %251 = vector.shape_cast %250 : vector<1x8x128xf32> to vector<8x128xf32>
    %c0_106 = arith.constant 0 : index
    %c0_107 = arith.constant 0 : index
    %252 = vector.load %arg6[%c0_106, %c0_107] : memref<32x128xf32, #tpu.memory_space<vmem>>, vector<32x128xf32>
    %cst_108 = arith.constant dense<0.000000e+00> : vector<8x128xf32>
    %253 = tpu.matmul %246, %252, %cst_108 {dimension_numbers = #tpu.dot_dimension_numbers<[1], [0], [0], [1], [0, 0, 1, 1], [], []>} : vector<8x32xf32>, vector<32x128xf32>, vector<8x128xf32> -> vector<8x128xf32>
    %254 = arith.addf %251, %253 : vector<8x128xf32>
    %255 = arith.negf %254 : vector<8x128xf32>
    %256 = math.exp %255 : vector<8x128xf32>
    %cst_109 = arith.constant 1.000000e+00 : f32
    %257 = vector.broadcast %cst_109 : f32 to vector<8x128xf32>
    %258 = arith.addf %257, %256 : vector<8x128xf32>
    %259 = arith.divf %257, %258 : vector<8x128xf32>
    %260 = math.tanh %254 : vector<8x128xf32>
    %261 = arith.select %8, %260, %259 : vector<8x128xi1>, vector<8x128xf32>
    %262 = vector.extract_strided_slice %261 {offsets = [0, 0], sizes = [8, 32], strides = [1, 1]} : vector<8x128xf32> to vector<8x32xf32>
    %263 = vector.extract_strided_slice %261 {offsets = [0, 32], sizes = [8, 32], strides = [1, 1]} : vector<8x128xf32> to vector<8x32xf32>
    %264 = vector.extract_strided_slice %261 {offsets = [0, 64], sizes = [8, 32], strides = [1, 1]} : vector<8x128xf32> to vector<8x32xf32>
    %265 = vector.extract_strided_slice %261 {offsets = [0, 96], sizes = [8, 32], strides = [1, 1]} : vector<8x128xf32> to vector<8x32xf32>
    %266 = arith.mulf %263, %248 : vector<8x32xf32>
    %267 = arith.mulf %262, %264 : vector<8x32xf32>
    %268 = arith.addf %266, %267 : vector<8x32xf32>
    %269 = math.tanh %268 : vector<8x32xf32>
    %270 = arith.mulf %265, %269 : vector<8x32xf32>
    %271 = arith.index_cast %c0_i32_103 : i32 to index
    %c0_110 = arith.constant 0 : index
    %c0_111 = arith.constant 0 : index
    %272 = vector.load %arg14[%271, %c0_110, %c0_111] : memref<8x8x32xf32, #tpu.memory_space<vmem>>, vector<1x8x32xf32>
    %273 = vector.shape_cast %272 : vector<1x8x32xf32> to vector<8x32xf32>
    %274 = vector.shape_cast %270 : vector<8x32xf32> to vector<1x8x32xf32>
    tpu.vector_store %arg14[%271, %c0_110, %c0_111], %274 {strides = array<i32>} : memref<8x8x32xf32, #tpu.memory_space<vmem>>, vector<1x8x32xf32>,
    %c1_i32_112 = arith.constant 1 : i32
    %275 = arith.index_cast %c1_i32_112 : i32 to index
    %c0_113 = arith.constant 0 : index
    %c0_114 = arith.constant 0 : index
    %276 = vector.load %arg13[%275, %c0_113, %c0_114] : memref<8x8x128xf32, #tpu.memory_space<vmem>>, vector<1x8x128xf32>
    %277 = vector.shape_cast %276 : vector<1x8x128xf32> to vector<8x128xf32>
    %c0_115 = arith.constant 0 : index
    %c0_116 = arith.constant 0 : index
    %278 = vector.load %arg6[%c0_115, %c0_116] : memref<32x128xf32, #tpu.memory_space<vmem>>, vector<32x128xf32>
    %cst_117 = arith.constant dense<0.000000e+00> : vector<8x128xf32>
    %279 = tpu.matmul %270, %278, %cst_117 {dimension_numbers = #tpu.dot_dimension_numbers<[1], [0], [0], [1], [0, 0, 1, 1], [], []>} : vector<8x32xf32>, vector<32x128xf32>, vector<8x128xf32> -> vector<8x128xf32>
    %280 = arith.addf %277, %279 : vector<8x128xf32>
    %281 = arith.negf %280 : vector<8x128xf32>
    %282 = math.exp %281 : vector<8x128xf32>
    %cst_118 = arith.constant 1.000000e+00 : f32
    %283 = vector.broadcast %cst_118 : f32 to vector<8x128xf32>
    %284 = arith.addf %283, %282 : vector<8x128xf32>
    %285 = arith.divf %283, %284 : vector<8x128xf32>
    %286 = math.tanh %280 : vector<8x128xf32>
    %287 = arith.select %8, %286, %285 : vector<8x128xi1>, vector<8x128xf32>
    %288 = vector.extract_strided_slice %287 {offsets = [0, 0], sizes = [8, 32], strides = [1, 1]} : vector<8x128xf32> to vector<8x32xf32>
    %289 = vector.extract_strided_slice %287 {offsets = [0, 32], sizes = [8, 32], strides = [1, 1]} : vector<8x128xf32> to vector<8x32xf32>
    %290 = vector.extract_strided_slice %287 {offsets = [0, 64], sizes = [8, 32], strides = [1, 1]} : vector<8x128xf32> to vector<8x32xf32>
    %291 = vector.extract_strided_slice %287 {offsets = [0, 96], sizes = [8, 32], strides = [1, 1]} : vector<8x128xf32> to vector<8x32xf32>
    %292 = arith.mulf %289, %268 : vector<8x32xf32>
    %293 = arith.mulf %288, %290 : vector<8x32xf32>
    %294 = arith.addf %292, %293 : vector<8x32xf32>
    %295 = math.tanh %294 : vector<8x32xf32>
    %296 = arith.mulf %291, %295 : vector<8x32xf32>
    %297 = arith.index_cast %c1_i32_112 : i32 to index
    %c0_119 = arith.constant 0 : index
    %c0_120 = arith.constant 0 : index
    %298 = vector.load %arg14[%297, %c0_119, %c0_120] : memref<8x8x32xf32, #tpu.memory_space<vmem>>, vector<1x8x32xf32>
    %299 = vector.shape_cast %298 : vector<1x8x32xf32> to vector<8x32xf32>
    %300 = vector.shape_cast %296 : vector<8x32xf32> to vector<1x8x32xf32>
    tpu.vector_store %arg14[%297, %c0_119, %c0_120], %300 {strides = array<i32>} : memref<8x8x32xf32, #tpu.memory_space<vmem>>, vector<1x8x32xf32>,
    %c2_i32_121 = arith.constant 2 : i32
    %301 = arith.index_cast %c2_i32_121 : i32 to index
    %c0_122 = arith.constant 0 : index
    %c0_123 = arith.constant 0 : index
    %302 = vector.load %arg13[%301, %c0_122, %c0_123] : memref<8x8x128xf32, #tpu.memory_space<vmem>>, vector<1x8x128xf32>
    %303 = vector.shape_cast %302 : vector<1x8x128xf32> to vector<8x128xf32>
    %c0_124 = arith.constant 0 : index
    %c0_125 = arith.constant 0 : index
    %304 = vector.load %arg6[%c0_124, %c0_125] : memref<32x128xf32, #tpu.memory_space<vmem>>, vector<32x128xf32>
    %cst_126 = arith.constant dense<0.000000e+00> : vector<8x128xf32>
    %305 = tpu.matmul %296, %304, %cst_126 {dimension_numbers = #tpu.dot_dimension_numbers<[1], [0], [0], [1], [0, 0, 1, 1], [], []>} : vector<8x32xf32>, vector<32x128xf32>, vector<8x128xf32> -> vector<8x128xf32>
    %306 = arith.addf %303, %305 : vector<8x128xf32>
    %307 = arith.negf %306 : vector<8x128xf32>
    %308 = math.exp %307 : vector<8x128xf32>
    %cst_127 = arith.constant 1.000000e+00 : f32
    %309 = vector.broadcast %cst_127 : f32 to vector<8x128xf32>
    %310 = arith.addf %309, %308 : vector<8x128xf32>
    %311 = arith.divf %309, %310 : vector<8x128xf32>
    %312 = math.tanh %306 : vector<8x128xf32>
    %313 = arith.select %8, %312, %311 : vector<8x128xi1>, vector<8x128xf32>
    %314 = vector.extract_strided_slice %313 {offsets = [0, 0], sizes = [8, 32], strides = [1, 1]} : vector<8x128xf32> to vector<8x32xf32>
    %315 = vector.extract_strided_slice %313 {offsets = [0, 32], sizes = [8, 32], strides = [1, 1]} : vector<8x128xf32> to vector<8x32xf32>
    %316 = vector.extract_strided_slice %313 {offsets = [0, 64], sizes = [8, 32], strides = [1, 1]} : vector<8x128xf32> to vector<8x32xf32>
    %317 = vector.extract_strided_slice %313 {offsets = [0, 96], sizes = [8, 32], strides = [1, 1]} : vector<8x128xf32> to vector<8x32xf32>
    %318 = arith.mulf %315, %294 : vector<8x32xf32>
    %319 = arith.mulf %314, %316 : vector<8x32xf32>
    %320 = arith.addf %318, %319 : vector<8x32xf32>
    %321 = math.tanh %320 : vector<8x32xf32>
    %322 = arith.mulf %317, %321 : vector<8x32xf32>
    %323 = arith.index_cast %c2_i32_121 : i32 to index
    %c0_128 = arith.constant 0 : index
    %c0_129 = arith.constant 0 : index
    %324 = vector.load %arg14[%323, %c0_128, %c0_129] : memref<8x8x32xf32, #tpu.memory_space<vmem>>, vector<1x8x32xf32>
    %325 = vector.shape_cast %324 : vector<1x8x32xf32> to vector<8x32xf32>
    %326 = vector.shape_cast %322 : vector<8x32xf32> to vector<1x8x32xf32>
    tpu.vector_store %arg14[%323, %c0_128, %c0_129], %326 {strides = array<i32>} : memref<8x8x32xf32, #tpu.memory_space<vmem>>, vector<1x8x32xf32>,
    %c3_i32_130 = arith.constant 3 : i32
    %327 = arith.index_cast %c3_i32_130 : i32 to index
    %c0_131 = arith.constant 0 : index
    %c0_132 = arith.constant 0 : index
    %328 = vector.load %arg13[%327, %c0_131, %c0_132] : memref<8x8x128xf32, #tpu.memory_space<vmem>>, vector<1x8x128xf32>
    %329 = vector.shape_cast %328 : vector<1x8x128xf32> to vector<8x128xf32>
    %c0_133 = arith.constant 0 : index
    %c0_134 = arith.constant 0 : index
    %330 = vector.load %arg6[%c0_133, %c0_134] : memref<32x128xf32, #tpu.memory_space<vmem>>, vector<32x128xf32>
    %cst_135 = arith.constant dense<0.000000e+00> : vector<8x128xf32>
    %331 = tpu.matmul %322, %330, %cst_135 {dimension_numbers = #tpu.dot_dimension_numbers<[1], [0], [0], [1], [0, 0, 1, 1], [], []>} : vector<8x32xf32>, vector<32x128xf32>, vector<8x128xf32> -> vector<8x128xf32>
    %332 = arith.addf %329, %331 : vector<8x128xf32>
    %333 = arith.negf %332 : vector<8x128xf32>
    %334 = math.exp %333 : vector<8x128xf32>
    %cst_136 = arith.constant 1.000000e+00 : f32
    %335 = vector.broadcast %cst_136 : f32 to vector<8x128xf32>
    %336 = arith.addf %335, %334 : vector<8x128xf32>
    %337 = arith.divf %335, %336 : vector<8x128xf32>
    %338 = math.tanh %332 : vector<8x128xf32>
    %339 = arith.select %8, %338, %337 : vector<8x128xi1>, vector<8x128xf32>
    %340 = vector.extract_strided_slice %339 {offsets = [0, 0], sizes = [8, 32], strides = [1, 1]} : vector<8x128xf32> to vector<8x32xf32>
    %341 = vector.extract_strided_slice %339 {offsets = [0, 32], sizes = [8, 32], strides = [1, 1]} : vector<8x128xf32> to vector<8x32xf32>
    %342 = vector.extract_strided_slice %339 {offsets = [0, 64], sizes = [8, 32], strides = [1, 1]} : vector<8x128xf32> to vector<8x32xf32>
    %343 = vector.extract_strided_slice %339 {offsets = [0, 96], sizes = [8, 32], strides = [1, 1]} : vector<8x128xf32> to vector<8x32xf32>
    %344 = arith.mulf %341, %320 : vector<8x32xf32>
    %345 = arith.mulf %340, %342 : vector<8x32xf32>
    %346 = arith.addf %344, %345 : vector<8x32xf32>
    %347 = math.tanh %346 : vector<8x32xf32>
    %348 = arith.mulf %343, %347 : vector<8x32xf32>
    %349 = arith.index_cast %c3_i32_130 : i32 to index
    %c0_137 = arith.constant 0 : index
    %c0_138 = arith.constant 0 : index
    %350 = vector.load %arg14[%349, %c0_137, %c0_138] : memref<8x8x32xf32, #tpu.memory_space<vmem>>, vector<1x8x32xf32>
    %351 = vector.shape_cast %350 : vector<1x8x32xf32> to vector<8x32xf32>
    %352 = vector.shape_cast %348 : vector<8x32xf32> to vector<1x8x32xf32>
    tpu.vector_store %arg14[%349, %c0_137, %c0_138], %352 {strides = array<i32>} : memref<8x8x32xf32, #tpu.memory_space<vmem>>, vector<1x8x32xf32>,
    %c4_i32_139 = arith.constant 4 : i32
    %353 = arith.index_cast %c4_i32_139 : i32 to index
    %c0_140 = arith.constant 0 : index
    %c0_141 = arith.constant 0 : index
    %354 = vector.load %arg13[%353, %c0_140, %c0_141] : memref<8x8x128xf32, #tpu.memory_space<vmem>>, vector<1x8x128xf32>
    %355 = vector.shape_cast %354 : vector<1x8x128xf32> to vector<8x128xf32>
    %c0_142 = arith.constant 0 : index
    %c0_143 = arith.constant 0 : index
    %356 = vector.load %arg6[%c0_142, %c0_143] : memref<32x128xf32, #tpu.memory_space<vmem>>, vector<32x128xf32>
    %cst_144 = arith.constant dense<0.000000e+00> : vector<8x128xf32>
    %357 = tpu.matmul %348, %356, %cst_144 {dimension_numbers = #tpu.dot_dimension_numbers<[1], [0], [0], [1], [0, 0, 1, 1], [], []>} : vector<8x32xf32>, vector<32x128xf32>, vector<8x128xf32> -> vector<8x128xf32>
    %358 = arith.addf %355, %357 : vector<8x128xf32>
    %359 = arith.negf %358 : vector<8x128xf32>
    %360 = math.exp %359 : vector<8x128xf32>
    %cst_145 = arith.constant 1.000000e+00 : f32
    %361 = vector.broadcast %cst_145 : f32 to vector<8x128xf32>
    %362 = arith.addf %361, %360 : vector<8x128xf32>
    %363 = arith.divf %361, %362 : vector<8x128xf32>
    %364 = math.tanh %358 : vector<8x128xf32>
    %365 = arith.select %8, %364, %363 : vector<8x128xi1>, vector<8x128xf32>
    %366 = vector.extract_strided_slice %365 {offsets = [0, 0], sizes = [8, 32], strides = [1, 1]} : vector<8x128xf32> to vector<8x32xf32>
    %367 = vector.extract_strided_slice %365 {offsets = [0, 32], sizes = [8, 32], strides = [1, 1]} : vector<8x128xf32> to vector<8x32xf32>
    %368 = vector.extract_strided_slice %365 {offsets = [0, 64], sizes = [8, 32], strides = [1, 1]} : vector<8x128xf32> to vector<8x32xf32>
    %369 = vector.extract_strided_slice %365 {offsets = [0, 96], sizes = [8, 32], strides = [1, 1]} : vector<8x128xf32> to vector<8x32xf32>
    %370 = arith.mulf %367, %346 : vector<8x32xf32>
    %371 = arith.mulf %366, %368 : vector<8x32xf32>
    %372 = arith.addf %370, %371 : vector<8x32xf32>
    %373 = math.tanh %372 : vector<8x32xf32>
    %374 = arith.mulf %369, %373 : vector<8x32xf32>
    %375 = arith.index_cast %c4_i32_139 : i32 to index
    %c0_146 = arith.constant 0 : index
    %c0_147 = arith.constant 0 : index
    %376 = vector.load %arg14[%375, %c0_146, %c0_147] : memref<8x8x32xf32, #tpu.memory_space<vmem>>, vector<1x8x32xf32>
    %377 = vector.shape_cast %376 : vector<1x8x32xf32> to vector<8x32xf32>
    %378 = vector.shape_cast %374 : vector<8x32xf32> to vector<1x8x32xf32>
    tpu.vector_store %arg14[%375, %c0_146, %c0_147], %378 {strides = array<i32>} : memref<8x8x32xf32, #tpu.memory_space<vmem>>, vector<1x8x32xf32>,
    %c5_i32_148 = arith.constant 5 : i32
    %379 = arith.index_cast %c5_i32_148 : i32 to index
    %c0_149 = arith.constant 0 : index
    %c0_150 = arith.constant 0 : index
    %380 = vector.load %arg13[%379, %c0_149, %c0_150] : memref<8x8x128xf32, #tpu.memory_space<vmem>>, vector<1x8x128xf32>
    %381 = vector.shape_cast %380 : vector<1x8x128xf32> to vector<8x128xf32>
    %c0_151 = arith.constant 0 : index
    %c0_152 = arith.constant 0 : index
    %382 = vector.load %arg6[%c0_151, %c0_152] : memref<32x128xf32, #tpu.memory_space<vmem>>, vector<32x128xf32>
    %cst_153 = arith.constant dense<0.000000e+00> : vector<8x128xf32>
    %383 = tpu.matmul %374, %382, %cst_153 {dimension_numbers = #tpu.dot_dimension_numbers<[1], [0], [0], [1], [0, 0, 1, 1], [], []>} : vector<8x32xf32>, vector<32x128xf32>, vector<8x128xf32> -> vector<8x128xf32>
    %384 = arith.addf %381, %383 : vector<8x128xf32>
    %385 = arith.negf %384 : vector<8x128xf32>
    %386 = math.exp %385 : vector<8x128xf32>
    %cst_154 = arith.constant 1.000000e+00 : f32
    %387 = vector.broadcast %cst_154 : f32 to vector<8x128xf32>
    %388 = arith.addf %387, %386 : vector<8x128xf32>
    %389 = arith.divf %387, %388 : vector<8x128xf32>
    %390 = math.tanh %384 : vector<8x128xf32>
    %391 = arith.select %8, %390, %389 : vector<8x128xi1>, vector<8x128xf32>
    %392 = vector.extract_strided_slice %391 {offsets = [0, 0], sizes = [8, 32], strides = [1, 1]} : vector<8x128xf32> to vector<8x32xf32>
    %393 = vector.extract_strided_slice %391 {offsets = [0, 32], sizes = [8, 32], strides = [1, 1]} : vector<8x128xf32> to vector<8x32xf32>
    %394 = vector.extract_strided_slice %391 {offsets = [0, 64], sizes = [8, 32], strides = [1, 1]} : vector<8x128xf32> to vector<8x32xf32>
    %395 = vector.extract_strided_slice %391 {offsets = [0, 96], sizes = [8, 32], strides = [1, 1]} : vector<8x128xf32> to vector<8x32xf32>
    %396 = arith.mulf %393, %372 : vector<8x32xf32>
    %397 = arith.mulf %392, %394 : vector<8x32xf32>
    %398 = arith.addf %396, %397 : vector<8x32xf32>
    %399 = math.tanh %398 : vector<8x32xf32>
    %400 = arith.mulf %395, %399 : vector<8x32xf32>
    %401 = arith.index_cast %c5_i32_148 : i32 to index
    %c0_155 = arith.constant 0 : index
    %c0_156 = arith.constant 0 : index
    %402 = vector.load %arg14[%401, %c0_155, %c0_156] : memref<8x8x32xf32, #tpu.memory_space<vmem>>, vector<1x8x32xf32>
    %403 = vector.shape_cast %402 : vector<1x8x32xf32> to vector<8x32xf32>
    %404 = vector.shape_cast %400 : vector<8x32xf32> to vector<1x8x32xf32>
    tpu.vector_store %arg14[%401, %c0_155, %c0_156], %404 {strides = array<i32>} : memref<8x8x32xf32, #tpu.memory_space<vmem>>, vector<1x8x32xf32>,
    %c6_i32_157 = arith.constant 6 : i32
    %405 = arith.index_cast %c6_i32_157 : i32 to index
    %c0_158 = arith.constant 0 : index
    %c0_159 = arith.constant 0 : index
    %406 = vector.load %arg13[%405, %c0_158, %c0_159] : memref<8x8x128xf32, #tpu.memory_space<vmem>>, vector<1x8x128xf32>
    %407 = vector.shape_cast %406 : vector<1x8x128xf32> to vector<8x128xf32>
    %c0_160 = arith.constant 0 : index
    %c0_161 = arith.constant 0 : index
    %408 = vector.load %arg6[%c0_160, %c0_161] : memref<32x128xf32, #tpu.memory_space<vmem>>, vector<32x128xf32>
    %cst_162 = arith.constant dense<0.000000e+00> : vector<8x128xf32>
    %409 = tpu.matmul %400, %408, %cst_162 {dimension_numbers = #tpu.dot_dimension_numbers<[1], [0], [0], [1], [0, 0, 1, 1], [], []>} : vector<8x32xf32>, vector<32x128xf32>, vector<8x128xf32> -> vector<8x128xf32>
    %410 = arith.addf %407, %409 : vector<8x128xf32>
    %411 = arith.negf %410 : vector<8x128xf32>
    %412 = math.exp %411 : vector<8x128xf32>
    %cst_163 = arith.constant 1.000000e+00 : f32
    %413 = vector.broadcast %cst_163 : f32 to vector<8x128xf32>
    %414 = arith.addf %413, %412 : vector<8x128xf32>
    %415 = arith.divf %413, %414 : vector<8x128xf32>
    %416 = math.tanh %410 : vector<8x128xf32>
    %417 = arith.select %8, %416, %415 : vector<8x128xi1>, vector<8x128xf32>
    %418 = vector.extract_strided_slice %417 {offsets = [0, 0], sizes = [8, 32], strides = [1, 1]} : vector<8x128xf32> to vector<8x32xf32>
    %419 = vector.extract_strided_slice %417 {offsets = [0, 32], sizes = [8, 32], strides = [1, 1]} : vector<8x128xf32> to vector<8x32xf32>
    %420 = vector.extract_strided_slice %417 {offsets = [0, 64], sizes = [8, 32], strides = [1, 1]} : vector<8x128xf32> to vector<8x32xf32>
    %421 = vector.extract_strided_slice %417 {offsets = [0, 96], sizes = [8, 32], strides = [1, 1]} : vector<8x128xf32> to vector<8x32xf32>
    %422 = arith.mulf %419, %398 : vector<8x32xf32>
    %423 = arith.mulf %418, %420 : vector<8x32xf32>
    %424 = arith.addf %422, %423 : vector<8x32xf32>
    %425 = math.tanh %424 : vector<8x32xf32>
    %426 = arith.mulf %421, %425 : vector<8x32xf32>
    %427 = arith.index_cast %c6_i32_157 : i32 to index
    %c0_164 = arith.constant 0 : index
    %c0_165 = arith.constant 0 : index
    %428 = vector.load %arg14[%427, %c0_164, %c0_165] : memref<8x8x32xf32, #tpu.memory_space<vmem>>, vector<1x8x32xf32>
    %429 = vector.shape_cast %428 : vector<1x8x32xf32> to vector<8x32xf32>
    %430 = vector.shape_cast %426 : vector<8x32xf32> to vector<1x8x32xf32>
    tpu.vector_store %arg14[%427, %c0_164, %c0_165], %430 {strides = array<i32>} : memref<8x8x32xf32, #tpu.memory_space<vmem>>, vector<1x8x32xf32>,
    %c7_i32_166 = arith.constant 7 : i32
    %431 = arith.index_cast %c7_i32_166 : i32 to index
    %c0_167 = arith.constant 0 : index
    %c0_168 = arith.constant 0 : index
    %432 = vector.load %arg13[%431, %c0_167, %c0_168] : memref<8x8x128xf32, #tpu.memory_space<vmem>>, vector<1x8x128xf32>
    %433 = vector.shape_cast %432 : vector<1x8x128xf32> to vector<8x128xf32>
    %c0_169 = arith.constant 0 : index
    %c0_170 = arith.constant 0 : index
    %434 = vector.load %arg6[%c0_169, %c0_170] : memref<32x128xf32, #tpu.memory_space<vmem>>, vector<32x128xf32>
    %cst_171 = arith.constant dense<0.000000e+00> : vector<8x128xf32>
    %435 = tpu.matmul %426, %434, %cst_171 {dimension_numbers = #tpu.dot_dimension_numbers<[1], [0], [0], [1], [0, 0, 1, 1], [], []>} : vector<8x32xf32>, vector<32x128xf32>, vector<8x128xf32> -> vector<8x128xf32>
    %436 = arith.addf %433, %435 : vector<8x128xf32>
    %437 = arith.negf %436 : vector<8x128xf32>
    %438 = math.exp %437 : vector<8x128xf32>
    %cst_172 = arith.constant 1.000000e+00 : f32
    %439 = vector.broadcast %cst_172 : f32 to vector<8x128xf32>
    %440 = arith.addf %439, %438 : vector<8x128xf32>
    %441 = arith.divf %439, %440 : vector<8x128xf32>
    %442 = math.tanh %436 : vector<8x128xf32>
    %443 = arith.select %8, %442, %441 : vector<8x128xi1>, vector<8x128xf32>
    %444 = vector.extract_strided_slice %443 {offsets = [0, 0], sizes = [8, 32], strides = [1, 1]} : vector<8x128xf32> to vector<8x32xf32>
    %445 = vector.extract_strided_slice %443 {offsets = [0, 32], sizes = [8, 32], strides = [1, 1]} : vector<8x128xf32> to vector<8x32xf32>
    %446 = vector.extract_strided_slice %443 {offsets = [0, 64], sizes = [8, 32], strides = [1, 1]} : vector<8x128xf32> to vector<8x32xf32>
    %447 = vector.extract_strided_slice %443 {offsets = [0, 96], sizes = [8, 32], strides = [1, 1]} : vector<8x128xf32> to vector<8x32xf32>
    %448 = arith.mulf %445, %424 : vector<8x32xf32>
    %449 = arith.mulf %444, %446 : vector<8x32xf32>
    %450 = arith.addf %448, %449 : vector<8x32xf32>
    %451 = math.tanh %450 : vector<8x32xf32>
    %452 = arith.mulf %447, %451 : vector<8x32xf32>
    %453 = arith.index_cast %c7_i32_166 : i32 to index
    %c0_173 = arith.constant 0 : index
    %c0_174 = arith.constant 0 : index
    %454 = vector.load %arg14[%453, %c0_173, %c0_174] : memref<8x8x32xf32, #tpu.memory_space<vmem>>, vector<1x8x32xf32>
    %455 = vector.shape_cast %454 : vector<1x8x32xf32> to vector<8x32xf32>
    %456 = vector.shape_cast %452 : vector<8x32xf32> to vector<1x8x32xf32>
    tpu.vector_store %arg14[%453, %c0_173, %c0_174], %456 {strides = array<i32>} : memref<8x8x32xf32, #tpu.memory_space<vmem>>, vector<1x8x32xf32>,
    %c8_i32_175 = arith.constant 8 : i32
    %c1_176 = arith.constant 1 : index
    %c0_177 = arith.constant 0 : index
    %c0_178 = arith.constant 0 : index
    %457 = vector.load %arg15[%c1_176, %c0_177, %c0_178] : memref<2x8x32xf32, #tpu.memory_space<vmem>>, vector<1x8x32xf32>
    %458 = vector.shape_cast %457 : vector<1x8x32xf32> to vector<8x32xf32>
    %459 = vector.shape_cast %452 : vector<8x32xf32> to vector<1x8x32xf32>
    tpu.vector_store %arg15[%c1_176, %c0_177, %c0_178], %459 {strides = array<i32>} : memref<2x8x32xf32, #tpu.memory_space<vmem>>, vector<1x8x32xf32>,
    %c1_179 = arith.constant 1 : index
    %c0_180 = arith.constant 0 : index
    %c0_181 = arith.constant 0 : index
    %460 = vector.load %arg16[%c1_179, %c0_180, %c0_181] : memref<2x8x32xf32, #tpu.memory_space<vmem>>, vector<1x8x32xf32>
    %461 = vector.shape_cast %460 : vector<1x8x32xf32> to vector<8x32xf32>
    %462 = vector.shape_cast %450 : vector<8x32xf32> to vector<1x8x32xf32>
    tpu.vector_store %arg16[%c1_179, %c0_180, %c0_181], %462 {strides = array<i32>} : memref<2x8x32xf32, #tpu.memory_space<vmem>>, vector<1x8x32xf32>,
    %c0_182 = arith.constant 0 : index
    %c0_183 = arith.constant 0 : index
    %c0_184 = arith.constant 0 : index
    %463 = vector.load %arg14[%c0_182, %c0_183, %c0_184] : memref<8x8x32xf32, #tpu.memory_space<vmem>>, vector<8x8x32xf32>
    %464 = vector.shape_cast %463 : vector<8x8x32xf32> to vector<64x32xf32>
    %c0_185 = arith.constant 0 : index
    %c0_186 = arith.constant 0 : index
    %465 = vector.load %arg9[%c0_185, %c0_186] : memref<32x128xf32, #tpu.memory_space<vmem>>, vector<32x128xf32>
    %cst_187 = arith.constant dense<0.000000e+00> : vector<64x128xf32>
    %466 = tpu.matmul %464, %465, %cst_187 {dimension_numbers = #tpu.dot_dimension_numbers<[1], [0], [0], [1], [0, 0, 1, 1], [], []>} : vector<64x32xf32>, vector<32x128xf32>, vector<64x128xf32> -> vector<64x128xf32>
    %c0_188 = arith.constant 0 : index
    %c0_189 = arith.constant 0 : index
    %467 = vector.load %arg10[%c0_188, %c0_189] : memref<1x128xf32, #tpu.memory_space<vmem>>, vector<1x128xf32>
    %468 = vector.broadcast %467 : vector<1x128xf32> to vector<64x128xf32>
    %469 = arith.addf %466, %468 : vector<64x128xf32>
    %cst_190 = arith.constant 0.000000e+00 : f32
    %470 = vector.broadcast %cst_190 : f32 to vector<64x128xf32>
    %471 = arith.maximumf %469, %470 : vector<64x128xf32>
    %472 = math.absf %469 : vector<64x128xf32>
    %cst_191 = arith.constant 0.000000e+00 : f32
    %473 = vector.broadcast %cst_191 : f32 to vector<64x128xf32>
    %474 = arith.subf %473, %472 : vector<64x128xf32>
    %475 = math.exp %474 : vector<64x128xf32>
    %cst_192 = arith.constant 1.000000e+00 : f32
    %476 = vector.broadcast %cst_192 : f32 to vector<64x128xf32>
    %477 = arith.addf %476, %475 : vector<64x128xf32>
    %478 = math.log %477 : vector<64x128xf32>
    %479 = arith.addf %471, %478 : vector<64x128xf32>
    %c0_193 = arith.constant 0 : index
    %c0_194 = arith.constant 0 : index
    %480 = vector.load %arg11[%c0_193, %c0_194] : memref<1x128xf32, #tpu.memory_space<vmem>>, vector<1x128xf32>
    %481 = vector.broadcast %480 : vector<1x128xf32> to vector<64x128xf32>
    %482 = arith.mulf %469, %481 : vector<64x128xf32>
    %cst_195 = arith.constant 1.000000e+00 : f32
    %483 = vector.broadcast %cst_195 : f32 to vector<1x128xf32>
    %484 = arith.subf %483, %480 : vector<1x128xf32>
    %485 = vector.broadcast %484 : vector<1x128xf32> to vector<64x128xf32>
    %486 = arith.mulf %479, %485 : vector<64x128xf32>
    %487 = arith.addf %482, %486 : vector<64x128xf32>
    %488 = vector.shape_cast %487 : vector<64x128xf32> to vector<8x8x128xf32>
    %c0_196 = arith.constant 0 : index
    %c0_197 = arith.constant 0 : index
    %c0_198 = arith.constant 0 : index
    %489 = vector.load %arg12[%c0_196, %c0_197, %c0_198] : memref<8x8x128xf32, #tpu.memory_space<vmem>>, vector<8x8x128xf32>
    tpu.vector_store %arg12[%c0_196, %c0_197, %c0_198], %488 {strides = array<i32>} : memref<8x8x128xf32, #tpu.memory_space<vmem>>, vector<8x8x128xf32>,
    return
  }
  func.func @transform_0(%arg0: i32, %arg1: i32) -> (i32, i32, i32) {
    %c0_i32 = arith.constant 0 : i32
    %c0_i32_0 = arith.constant 0 : i32
    return %arg1, %arg0, %c0_i32 : i32, i32, i32
  }
  func.func @transform_1(%arg0: i32, %arg1: i32) -> (i32, i32) {
    %c0_i32 = arith.constant 0 : i32
    %c0_i32_0 = arith.constant 0 : i32
    %c0_i32_1 = arith.constant 0 : i32
    return %c0_i32, %c0_i32_0 : i32, i32
  }
  func.func @transform_2(%arg0: i32, %arg1: i32) -> (i32, i32) {
    %c0_i32 = arith.constant 0 : i32
    %c0_i32_0 = arith.constant 0 : i32
    %c0_i32_1 = arith.constant 0 : i32
    return %c0_i32, %c0_i32_0 : i32, i32
  }
  func.func @transform_3(%arg0: i32, %arg1: i32) -> (i32, i32) {
    %c0_i32 = arith.constant 0 : i32
    %c0_i32_0 = arith.constant 0 : i32
    %c0_i32_1 = arith.constant 0 : i32
    return %c0_i32, %c0_i32_0 : i32, i32
  }
  func.func @transform_4(%arg0: i32, %arg1: i32) -> (i32, i32) {
    %c0_i32 = arith.constant 0 : i32
    %c0_i32_0 = arith.constant 0 : i32
    %c0_i32_1 = arith.constant 0 : i32
    return %c0_i32, %c0_i32_0 : i32, i32
  }
  func.func @transform_5(%arg0: i32, %arg1: i32) -> (i32, i32) {
    %c0_i32 = arith.constant 0 : i32
    %c0_i32_0 = arith.constant 0 : i32
    %c0_i32_1 = arith.constant 0 : i32
    return %c0_i32, %c0_i32_0 : i32, i32
  }
  func.func @transform_6(%arg0: i32, %arg1: i32) -> (i32, i32) {
    %c0_i32 = arith.constant 0 : i32
    %c0_i32_0 = arith.constant 0 : i32
    %c0_i32_1 = arith.constant 0 : i32
    return %c0_i32, %c0_i32_0 : i32, i32
  }
  func.func @transform_7(%arg0: i32, %arg1: i32) -> (i32, i32) {
    %c0_i32 = arith.constant 0 : i32
    %c0_i32_0 = arith.constant 0 : i32
    %c0_i32_1 = arith.constant 0 : i32
    return %c0_i32, %c0_i32_0 : i32, i32
  }
  func.func @transform_8(%arg0: i32, %arg1: i32) -> (i32, i32) {
    %c0_i32 = arith.constant 0 : i32
    %c0_i32_0 = arith.constant 0 : i32
    %c0_i32_1 = arith.constant 0 : i32
    return %c0_i32, %c0_i32_0 : i32, i32
  }
  func.func @transform_9(%arg0: i32, %arg1: i32) -> (i32, i32) {
    %c0_i32 = arith.constant 0 : i32
    %c0_i32_0 = arith.constant 0 : i32
    %c0_i32_1 = arith.constant 0 : i32
    return %c0_i32, %c0_i32_0 : i32, i32
  }
  func.func @transform_10(%arg0: i32, %arg1: i32) -> (i32, i32, i32) {
    %c0_i32 = arith.constant 0 : i32
    %c0_i32_0 = arith.constant 0 : i32
    return %arg1, %arg0, %c0_i32 : i32, i32, i32
  }
}

module attributes {stable_mosaic.version = 11 : i64} {
  func.func @_fused_lstm_head_kernel(%arg0: i32, %arg1: i32, %arg2: memref<8x8x128xf32, #tpu.memory_space<vmem>>, %arg3: memref<128x128xf32, #tpu.memory_space<vmem>>, %arg4: memref<32x128xf32, #tpu.memory_space<vmem>>, %arg5: memref<32x128xf32, #tpu.memory_space<vmem>>, %arg6: memref<32x128xf32, #tpu.memory_space<vmem>>, %arg7: memref<1x128xf32, #tpu.memory_space<vmem>>, %arg8: memref<1x128xf32, #tpu.memory_space<vmem>>, %arg9: memref<32x128xf32, #tpu.memory_space<vmem>>, %arg10: memref<1x128xf32, #tpu.memory_space<vmem>>, %arg11: memref<1x128xf32, #tpu.memory_space<vmem>>, %arg12: memref<8x8x128xf32, #tpu.memory_space<vmem>>, %arg13: memref<8x8x128xf32, #tpu.memory_space<vmem>>, %arg14: memref<8x8x32xf32, #tpu.memory_space<vmem>>, %arg15: memref<2x8x32xf32, #tpu.memory_space<vmem>>, %arg16: memref<2x8x32xf32, #tpu.memory_space<vmem>>) attributes {dimension_semantics = [#tpu.dimension_semantics<parallel>, #tpu.dimension_semantics<arbitrary>], iteration_bounds = array<i64: 1, 1>, scalar_prefetch = 0 : i64, scratch_operands = 4 : i64, tpu.core_type = #tpu.core_type<tc>, window_params = [{transform_indices = @transform_0, window_bounds = array<i64: 8, 8, 128>}, {pipeline_mode = #tpu.pipeline_mode<synchronous>, transform_indices = @transform_1, window_bounds = array<i64: 128, 128>}, {pipeline_mode = #tpu.pipeline_mode<synchronous>, transform_indices = @transform_2, window_bounds = array<i64: 32, 128>}, {pipeline_mode = #tpu.pipeline_mode<synchronous>, transform_indices = @transform_3, window_bounds = array<i64: 32, 128>}, {pipeline_mode = #tpu.pipeline_mode<synchronous>, transform_indices = @transform_4, window_bounds = array<i64: 32, 128>}, {pipeline_mode = #tpu.pipeline_mode<synchronous>, transform_indices = @transform_5, window_bounds = array<i64: 1, 128>}, {pipeline_mode = #tpu.pipeline_mode<synchronous>, transform_indices = @transform_6, window_bounds = array<i64: 1, 128>}, {pipeline_mode = #tpu.pipeline_mode<synchronous>, transform_indices = @transform_7, window_bounds = array<i64: 32, 128>}, {pipeline_mode = #tpu.pipeline_mode<synchronous>, transform_indices = @transform_8, window_bounds = array<i64: 1, 128>}, {pipeline_mode = #tpu.pipeline_mode<synchronous>, transform_indices = @transform_9, window_bounds = array<i64: 1, 128>}, {transform_indices = @transform_10, window_bounds = array<i64: 8, 8, 128>}]} {
    %c0_i32 = arith.constant 0 : i32
    %0 = arith.cmpi eq, %arg1, %c0_i32 : i32
    %1 = arith.extui %0 : i1 to i32
    %c0_i32_0 = arith.constant 0 : i32
    %2 = arith.cmpi ne, %1, %c0_i32_0 : i32
    scf.if %2 {
      %cst_199 = arith.constant 0.000000e+00 : f32
      %490 = vector.broadcast %cst_199 : f32 to vector<2x8x32xf32>
      %c0_200 = arith.constant 0 : index
      %c0_201 = arith.constant 0 : index
      %c0_202 = arith.constant 0 : index
      %491 = vector.load %arg15[%c0_200, %c0_201, %c0_202] : memref<2x8x32xf32, #tpu.memory_space<vmem>>, vector<2x8x32xf32>
      tpu.vector_store %arg15[%c0_200, %c0_201, %c0_202], %490 {strides = array<i32>} : memref<2x8x32xf32, #tpu.memory_space<vmem>>, vector<2x8x32xf32>,
      %cst_203 = arith.constant 0.000000e+00 : f32
      %492 = vector.broadcast %cst_203 : f32 to vector<2x8x32xf32>
      %c0_204 = arith.constant 0 : index
      %c0_205 = arith.constant 0 : index
      %c0_206 = arith.constant 0 : index
      %493 = vector.load %arg16[%c0_204, %c0_205, %c0_206] : memref<2x8x32xf32, #tpu.memory_space<vmem>>, vector<2x8x32xf32>
      tpu.vector_store %arg16[%c0_204, %c0_205, %c0_206], %492 {strides = array<i32>} : memref<2x8x32xf32, #tpu.memory_space<vmem>>, vector<2x8x32xf32>,
    } else {
    }
    %3 = tpu.iota {dimensions = array<i32: 1>} : vector<8x128xi32>
    %c64_i32 = arith.constant 64 : i32
    %4 = vector.broadcast %c64_i32 : i32 to vector<8x128xi32>
    %5 = arith.cmpi sge, %3, %4 : vector<8x128xi32>
    %c96_i32 = arith.constant 96 : i32
    %6 = vector.broadcast %c96_i32 : i32 to vector<8x128xi32>
    %7 = arith.cmpi slt, %3, %6 : vector<8x128xi32>
    %8 = arith.andi %5, %7 : vector<8x128xi1>
    %c0 = arith.constant 0 : index
    %c0_1 = arith.constant 0 : index
    %c0_2 = arith.constant 0 : index
    %9 = vector.load %arg2[%c0, %c0_1, %c0_2] : memref<8x8x128xf32, #tpu.memory_space<vmem>>, vector<8x8x128xf32>
    %10 = vector.shape_cast %9 : vector<8x8x128xf32> to vector<64x128xf32>
    %c0_3 = arith.constant 0 : index
    %c0_4 = arith.constant 0 : index
    %11 = vector.load %arg3[%c0_3, %c0_4] : memref<128x128xf32, #tpu.memory_space<vmem>>, vector<128x128xf32>
    %cst = arith.constant dense<0.000000e+00> : vector<64x128xf32>
    %12 = tpu.matmul %10, %11, %cst {dimension_numbers = #tpu.dot_dimension_numbers<[1], [0], [0], [1], [0, 0, 1, 1], [], []>} : vector<64x128xf32>, vector<128x128xf32>, vector<64x128xf32> -> vector<64x128xf32>
    %c0_5 = arith.constant 0 : index
    %c0_6 = arith.constant 0 : index
    %13 = vector.load %arg7[%c0_5, %c0_6] : memref<1x128xf32, #tpu.memory_space<vmem>>, vector<1x128xf32>
    %14 = vector.broadcast %13 : vector<1x128xf32> to vector<64x128xf32>
    %15 = arith.addf %12, %14 : vector<64x128xf32>
    %16 = vector.shape_cast %15 : vector<64x128xf32> to vector<8x8x128xf32>
    %c0_7 = arith.constant 0 : index
    %c0_8 = arith.constant 0 : index
    %c0_9 = arith.constant 0 : index
    %17 = vector.load %arg13[%c0_7, %c0_8, %c0_9] : memref<8x8x128xf32, #tpu.memory_space<vmem>>, vector<8x8x128xf32>
    tpu.vector_store %arg13[%c0_7, %c0_8, %c0_9], %16 {strides = array<i32>} : memref<8x8x128xf32, #tpu.memory_space<vmem>>, vector<8x8x128xf32>,
    %c0_10 = arith.constant 0 : index
    %c0_11 = arith.constant 0 : index
    %c0_12 = arith.constant 0 : index
    %18 = vector.load %arg15[%c0_10, %c0_11, %c0_12] : memref<2x8x32xf32, #tpu.memory_space<vmem>>, vector<1x8x32xf32>
    %19 = vector.shape_cast %18 : vector<1x8x32xf32> to vector<8x32xf32>
    %c0_13 = arith.constant 0 : index
    %c0_14 = arith.constant 0 : index
    %c0_15 = arith.constant 0 : index
    %20 = vector.load %arg16[%c0_13, %c0_14, %c0_15] : memref<2x8x32xf32, #tpu.memory_space<vmem>>, vector<1x8x32xf32>
    %21 = vector.shape_cast %20 : vector<1x8x32xf32> to vector<8x32xf32>
    %c0_i32_16 = arith.constant 0 : i32
    %22 = arith.index_cast %c0_i32_16 : i32 to index
    %c0_17 = arith.constant 0 : index
    %c0_18 = arith.constant 0 : index
    %23 = vector.load %arg13[%22, %c0_17, %c0_18] : memref<8x8x128xf32, #tpu.memory_space<vmem>>, vector<1x8x128xf32>
    %24 = vector.shape_cast %23 : vector<1x8x128xf32> to vector<8x128xf32>
    %c0_19 = arith.constant 0 : index
    %c0_20 = arith.constant 0 : index
    %25 = vector.load %arg5[%c0_19, %c0_20] : memref<32x128xf32, #tpu.memory_space<vmem>>, vector<32x128xf32>
    %cst_21 = arith.constant dense<0.000000e+00> : vector<8x128xf32>
    %26 = tpu.matmul %19, %25, %cst_21 {dimension_numbers = #tpu.dot_dimension_numbers<[1], [0], [0], [1], [0, 0, 1, 1], [], []>} : vector<8x32xf32>, vector<32x128xf32>, vector<8x128xf32> -> vector<8x128xf32>
    %27 = arith.addf %24, %26 : vector<8x128xf32>
    %28 = arith.negf %27 : vector<8x128xf32>
    %29 = math.exp %28 : vector<8x128xf32>
    %cst_22 = arith.constant 1.000000e+00 : f32
    %30 = vector.broadcast %cst_22 : f32 to vector<8x128xf32>
    %31 = arith.addf %30, %29 : vector<8x128xf32>
    %32 = arith.divf %30, %31 : vector<8x128xf32>
    %33 = math.tanh %27 : vector<8x128xf32>
    %34 = arith.select %8, %33, %32 : vector<8x128xi1>, vector<8x128xf32>
    %35 = vector.extract_strided_slice %34 {offsets = [0, 0], sizes = [8, 32], strides = [1, 1]} : vector<8x128xf32> to vector<8x32xf32>
    %36 = vector.extract_strided_slice %34 {offsets = [0, 32], sizes = [8, 32], strides = [1, 1]} : vector<8x128xf32> to vector<8x32xf32>
    %37 = vector.extract_strided_slice %34 {offsets = [0, 64], sizes = [8, 32], strides = [1, 1]} : vector<8x128xf32> to vector<8x32xf32>
    %38 = vector.extract_strided_slice %34 {offsets = [0, 96], sizes = [8, 32], strides = [1, 1]} : vector<8x128xf32> to vector<8x32xf32>
    %39 = arith.mulf %36, %21 : vector<8x32xf32>
    %40 = arith.mulf %35, %37 : vector<8x32xf32>
    %41 = arith.addf %39, %40 : vector<8x32xf32>
    %42 = math.tanh %41 : vector<8x32xf32>
    %43 = arith.mulf %38, %42 : vector<8x32xf32>
    %44 = arith.index_cast %c0_i32_16 : i32 to index
    %c0_23 = arith.constant 0 : index
    %c0_24 = arith.constant 0 : index
    %45 = vector.load %arg14[%44, %c0_23, %c0_24] : memref<8x8x32xf32, #tpu.memory_space<vmem>>, vector<1x8x32xf32>
    %46 = vector.shape_cast %45 : vector<1x8x32xf32> to vector<8x32xf32>
    %47 = vector.shape_cast %43 : vector<8x32xf32> to vector<1x8x32xf32>
    tpu.vector_store %arg14[%44, %c0_23, %c0_24], %47 {strides = array<i32>} : memref<8x8x32xf32, #tpu.memory_space<vmem>>, vector<1x8x32xf32>,
    %c1_i32 = arith.constant 1 : i32
    %48 = arith.index_cast %c1_i32 : i32 to index
    %c0_25 = arith.constant 0 : index
    %c0_26 = arith.constant 0 : index
    %49 = vector.load %arg13[%48, %c0_25, %c0_26] : memref<8x8x128xf32, #tpu.memory_space<vmem>>, vector<1x8x128xf32>
    %50 = vector.shape_cast %49 : vector<1x8x128xf32> to vector<8x128xf32>
    %c0_27 = arith.constant 0 : index
    %c0_28 = arith.constant 0 : index
    %51 = vector.load %arg5[%c0_27, %c0_28] : memref<32x128xf32, #tpu.memory_space<vmem>>, vector<32x128xf32>
    %cst_29 = arith.constant dense<0.000000e+00> : vector<8x128xf32>
    %52 = tpu.matmul %43, %51, %cst_29 {dimension_numbers = #tpu.dot_dimension_numbers<[1], [0], [0], [1], [0, 0, 1, 1], [], []>} : vector<8x32xf32>, vector<32x128xf32>, vector<8x128xf32> -> vector<8x128xf32>
    %53 = arith.addf %50, %52 : vector<8x128xf32>
    %54 = arith.negf %53 : vector<8x128xf32>
    %55 = math.exp %54 : vector<8x128xf32>
    %cst_30 = arith.constant 1.000000e+00 : f32
    %56 = vector.broadcast %cst_30 : f32 to vector<8x128xf32>
    %57 = arith.addf %56, %55 : vector<8x128xf32>
    %58 = arith.divf %56, %57 : vector<8x128xf32>
    %59 = math.tanh %53 : vector<8x128xf32>
    %60 = arith.select %8, %59, %58 : vector<8x128xi1>, vector<8x128xf32>
    %61 = vector.extract_strided_slice %60 {offsets = [0, 0], sizes = [8, 32], strides = [1, 1]} : vector<8x128xf32> to vector<8x32xf32>
    %62 = vector.extract_strided_slice %60 {offsets = [0, 32], sizes = [8, 32], strides = [1, 1]} : vector<8x128xf32> to vector<8x32xf32>
    %63 = vector.extract_strided_slice %60 {offsets = [0, 64], sizes = [8, 32], strides = [1, 1]} : vector<8x128xf32> to vector<8x32xf32>
    %64 = vector.extract_strided_slice %60 {offsets = [0, 96], sizes = [8, 32], strides = [1, 1]} : vector<8x128xf32> to vector<8x32xf32>
    %65 = arith.mulf %62, %41 : vector<8x32xf32>
    %66 = arith.mulf %61, %63 : vector<8x32xf32>
    %67 = arith.addf %65, %66 : vector<8x32xf32>
    %68 = math.tanh %67 : vector<8x32xf32>
    %69 = arith.mulf %64, %68 : vector<8x32xf32>
    %70 = arith.index_cast %c1_i32 : i32 to index
    %c0_31 = arith.constant 0 : index
    %c0_32 = arith.constant 0 : index
    %71 = vector.load %arg14[%70, %c0_31, %c0_32] : memref<8x8x32xf32, #tpu.memory_space<vmem>>, vector<1x8x32xf32>
    %72 = vector.shape_cast %71 : vector<1x8x32xf32> to vector<8x32xf32>
    %73 = vector.shape_cast %69 : vector<8x32xf32> to vector<1x8x32xf32>
    tpu.vector_store %arg14[%70, %c0_31, %c0_32], %73 {strides = array<i32>} : memref<8x8x32xf32, #tpu.memory_space<vmem>>, vector<1x8x32xf32>,
    %c2_i32 = arith.constant 2 : i32
    %74 = arith.index_cast %c2_i32 : i32 to index
    %c0_33 = arith.constant 0 : index
    %c0_34 = arith.constant 0 : index
    %75 = vector.load %arg13[%74, %c0_33, %c0_34] : memref<8x8x128xf32, #tpu.memory_space<vmem>>, vector<1x8x128xf32>
    %76 = vector.shape_cast %75 : vector<1x8x128xf32> to vector<8x128xf32>
    %c0_35 = arith.constant 0 : index
    %c0_36 = arith.constant 0 : index
    %77 = vector.load %arg5[%c0_35, %c0_36] : memref<32x128xf32, #tpu.memory_space<vmem>>, vector<32x128xf32>
    %cst_37 = arith.constant dense<0.000000e+00> : vector<8x128xf32>
    %78 = tpu.matmul %69, %77, %cst_37 {dimension_numbers = #tpu.dot_dimension_numbers<[1], [0], [0], [1], [0, 0, 1, 1], [], []>} : vector<8x32xf32>, vector<32x128xf32>, vector<8x128xf32> -> vector<8x128xf32>
    %79 = arith.addf %76, %78 : vector<8x128xf32>
    %80 = arith.negf %79 : vector<8x128xf32>
    %81 = math.exp %80 : vector<8x128xf32>
    %cst_38 = arith.constant 1.000000e+00 : f32
    %82 = vector.broadcast %cst_38 : f32 to vector<8x128xf32>
    %83 = arith.addf %82, %81 : vector<8x128xf32>
    %84 = arith.divf %82, %83 : vector<8x128xf32>
    %85 = math.tanh %79 : vector<8x128xf32>
    %86 = arith.select %8, %85, %84 : vector<8x128xi1>, vector<8x128xf32>
    %87 = vector.extract_strided_slice %86 {offsets = [0, 0], sizes = [8, 32], strides = [1, 1]} : vector<8x128xf32> to vector<8x32xf32>
    %88 = vector.extract_strided_slice %86 {offsets = [0, 32], sizes = [8, 32], strides = [1, 1]} : vector<8x128xf32> to vector<8x32xf32>
    %89 = vector.extract_strided_slice %86 {offsets = [0, 64], sizes = [8, 32], strides = [1, 1]} : vector<8x128xf32> to vector<8x32xf32>
    %90 = vector.extract_strided_slice %86 {offsets = [0, 96], sizes = [8, 32], strides = [1, 1]} : vector<8x128xf32> to vector<8x32xf32>
    %91 = arith.mulf %88, %67 : vector<8x32xf32>
    %92 = arith.mulf %87, %89 : vector<8x32xf32>
    %93 = arith.addf %91, %92 : vector<8x32xf32>
    %94 = math.tanh %93 : vector<8x32xf32>
    %95 = arith.mulf %90, %94 : vector<8x32xf32>
    %96 = arith.index_cast %c2_i32 : i32 to index
    %c0_39 = arith.constant 0 : index
    %c0_40 = arith.constant 0 : index
    %97 = vector.load %arg14[%96, %c0_39, %c0_40] : memref<8x8x32xf32, #tpu.memory_space<vmem>>, vector<1x8x32xf32>
    %98 = vector.shape_cast %97 : vector<1x8x32xf32> to vector<8x32xf32>
    %99 = vector.shape_cast %95 : vector<8x32xf32> to vector<1x8x32xf32>
    tpu.vector_store %arg14[%96, %c0_39, %c0_40], %99 {strides = array<i32>} : memref<8x8x32xf32, #tpu.memory_space<vmem>>, vector<1x8x32xf32>,
    %c3_i32 = arith.constant 3 : i32
    %100 = arith.index_cast %c3_i32 : i32 to index
    %c0_41 = arith.constant 0 : index
    %c0_42 = arith.constant 0 : index
    %101 = vector.load %arg13[%100, %c0_41, %c0_42] : memref<8x8x128xf32, #tpu.memory_space<vmem>>, vector<1x8x128xf32>
    %102 = vector.shape_cast %101 : vector<1x8x128xf32> to vector<8x128xf32>
    %c0_43 = arith.constant 0 : index
    %c0_44 = arith.constant 0 : index
    %103 = vector.load %arg5[%c0_43, %c0_44] : memref<32x128xf32, #tpu.memory_space<vmem>>, vector<32x128xf32>
    %cst_45 = arith.constant dense<0.000000e+00> : vector<8x128xf32>
    %104 = tpu.matmul %95, %103, %cst_45 {dimension_numbers = #tpu.dot_dimension_numbers<[1], [0], [0], [1], [0, 0, 1, 1], [], []>} : vector<8x32xf32>, vector<32x128xf32>, vector<8x128xf32> -> vector<8x128xf32>
    %105 = arith.addf %102, %104 : vector<8x128xf32>
    %106 = arith.negf %105 : vector<8x128xf32>
    %107 = math.exp %106 : vector<8x128xf32>
    %cst_46 = arith.constant 1.000000e+00 : f32
    %108 = vector.broadcast %cst_46 : f32 to vector<8x128xf32>
    %109 = arith.addf %108, %107 : vector<8x128xf32>
    %110 = arith.divf %108, %109 : vector<8x128xf32>
    %111 = math.tanh %105 : vector<8x128xf32>
    %112 = arith.select %8, %111, %110 : vector<8x128xi1>, vector<8x128xf32>
    %113 = vector.extract_strided_slice %112 {offsets = [0, 0], sizes = [8, 32], strides = [1, 1]} : vector<8x128xf32> to vector<8x32xf32>
    %114 = vector.extract_strided_slice %112 {offsets = [0, 32], sizes = [8, 32], strides = [1, 1]} : vector<8x128xf32> to vector<8x32xf32>
    %115 = vector.extract_strided_slice %112 {offsets = [0, 64], sizes = [8, 32], strides = [1, 1]} : vector<8x128xf32> to vector<8x32xf32>
    %116 = vector.extract_strided_slice %112 {offsets = [0, 96], sizes = [8, 32], strides = [1, 1]} : vector<8x128xf32> to vector<8x32xf32>
    %117 = arith.mulf %114, %93 : vector<8x32xf32>
    %118 = arith.mulf %113, %115 : vector<8x32xf32>
    %119 = arith.addf %117, %118 : vector<8x32xf32>
    %120 = math.tanh %119 : vector<8x32xf32>
    %121 = arith.mulf %116, %120 : vector<8x32xf32>
    %122 = arith.index_cast %c3_i32 : i32 to index
    %c0_47 = arith.constant 0 : index
    %c0_48 = arith.constant 0 : index
    %123 = vector.load %arg14[%122, %c0_47, %c0_48] : memref<8x8x32xf32, #tpu.memory_space<vmem>>, vector<1x8x32xf32>
    %124 = vector.shape_cast %123 : vector<1x8x32xf32> to vector<8x32xf32>
    %125 = vector.shape_cast %121 : vector<8x32xf32> to vector<1x8x32xf32>
    tpu.vector_store %arg14[%122, %c0_47, %c0_48], %125 {strides = array<i32>} : memref<8x8x32xf32, #tpu.memory_space<vmem>>, vector<1x8x32xf32>,
    %c4_i32 = arith.constant 4 : i32
    %126 = arith.index_cast %c4_i32 : i32 to index
    %c0_49 = arith.constant 0 : index
    %c0_50 = arith.constant 0 : index
    %127 = vector.load %arg13[%126, %c0_49, %c0_50] : memref<8x8x128xf32, #tpu.memory_space<vmem>>, vector<1x8x128xf32>
    %128 = vector.shape_cast %127 : vector<1x8x128xf32> to vector<8x128xf32>
    %c0_51 = arith.constant 0 : index
    %c0_52 = arith.constant 0 : index
    %129 = vector.load %arg5[%c0_51, %c0_52] : memref<32x128xf32, #tpu.memory_space<vmem>>, vector<32x128xf32>
    %cst_53 = arith.constant dense<0.000000e+00> : vector<8x128xf32>
    %130 = tpu.matmul %121, %129, %cst_53 {dimension_numbers = #tpu.dot_dimension_numbers<[1], [0], [0], [1], [0, 0, 1, 1], [], []>} : vector<8x32xf32>, vector<32x128xf32>, vector<8x128xf32> -> vector<8x128xf32>
    %131 = arith.addf %128, %130 : vector<8x128xf32>
    %132 = arith.negf %131 : vector<8x128xf32>
    %133 = math.exp %132 : vector<8x128xf32>
    %cst_54 = arith.constant 1.000000e+00 : f32
    %134 = vector.broadcast %cst_54 : f32 to vector<8x128xf32>
    %135 = arith.addf %134, %133 : vector<8x128xf32>
    %136 = arith.divf %134, %135 : vector<8x128xf32>
    %137 = math.tanh %131 : vector<8x128xf32>
    %138 = arith.select %8, %137, %136 : vector<8x128xi1>, vector<8x128xf32>
    %139 = vector.extract_strided_slice %138 {offsets = [0, 0], sizes = [8, 32], strides = [1, 1]} : vector<8x128xf32> to vector<8x32xf32>
    %140 = vector.extract_strided_slice %138 {offsets = [0, 32], sizes = [8, 32], strides = [1, 1]} : vector<8x128xf32> to vector<8x32xf32>
    %141 = vector.extract_strided_slice %138 {offsets = [0, 64], sizes = [8, 32], strides = [1, 1]} : vector<8x128xf32> to vector<8x32xf32>
    %142 = vector.extract_strided_slice %138 {offsets = [0, 96], sizes = [8, 32], strides = [1, 1]} : vector<8x128xf32> to vector<8x32xf32>
    %143 = arith.mulf %140, %119 : vector<8x32xf32>
    %144 = arith.mulf %139, %141 : vector<8x32xf32>
    %145 = arith.addf %143, %144 : vector<8x32xf32>
    %146 = math.tanh %145 : vector<8x32xf32>
    %147 = arith.mulf %142, %146 : vector<8x32xf32>
    %148 = arith.index_cast %c4_i32 : i32 to index
    %c0_55 = arith.constant 0 : index
    %c0_56 = arith.constant 0 : index
    %149 = vector.load %arg14[%148, %c0_55, %c0_56] : memref<8x8x32xf32, #tpu.memory_space<vmem>>, vector<1x8x32xf32>
    %150 = vector.shape_cast %149 : vector<1x8x32xf32> to vector<8x32xf32>
    %151 = vector.shape_cast %147 : vector<8x32xf32> to vector<1x8x32xf32>
    tpu.vector_store %arg14[%148, %c0_55, %c0_56], %151 {strides = array<i32>} : memref<8x8x32xf32, #tpu.memory_space<vmem>>, vector<1x8x32xf32>,
    %c5_i32 = arith.constant 5 : i32
    %152 = arith.index_cast %c5_i32 : i32 to index
    %c0_57 = arith.constant 0 : index
    %c0_58 = arith.constant 0 : index
    %153 = vector.load %arg13[%152, %c0_57, %c0_58] : memref<8x8x128xf32, #tpu.memory_space<vmem>>, vector<1x8x128xf32>
    %154 = vector.shape_cast %153 : vector<1x8x128xf32> to vector<8x128xf32>
    %c0_59 = arith.constant 0 : index
    %c0_60 = arith.constant 0 : index
    %155 = vector.load %arg5[%c0_59, %c0_60] : memref<32x128xf32, #tpu.memory_space<vmem>>, vector<32x128xf32>
    %cst_61 = arith.constant dense<0.000000e+00> : vector<8x128xf32>
    %156 = tpu.matmul %147, %155, %cst_61 {dimension_numbers = #tpu.dot_dimension_numbers<[1], [0], [0], [1], [0, 0, 1, 1], [], []>} : vector<8x32xf32>, vector<32x128xf32>, vector<8x128xf32> -> vector<8x128xf32>
    %157 = arith.addf %154, %156 : vector<8x128xf32>
    %158 = arith.negf %157 : vector<8x128xf32>
    %159 = math.exp %158 : vector<8x128xf32>
    %cst_62 = arith.constant 1.000000e+00 : f32
    %160 = vector.broadcast %cst_62 : f32 to vector<8x128xf32>
    %161 = arith.addf %160, %159 : vector<8x128xf32>
    %162 = arith.divf %160, %161 : vector<8x128xf32>
    %163 = math.tanh %157 : vector<8x128xf32>
    %164 = arith.select %8, %163, %162 : vector<8x128xi1>, vector<8x128xf32>
    %165 = vector.extract_strided_slice %164 {offsets = [0, 0], sizes = [8, 32], strides = [1, 1]} : vector<8x128xf32> to vector<8x32xf32>
    %166 = vector.extract_strided_slice %164 {offsets = [0, 32], sizes = [8, 32], strides = [1, 1]} : vector<8x128xf32> to vector<8x32xf32>
    %167 = vector.extract_strided_slice %164 {offsets = [0, 64], sizes = [8, 32], strides = [1, 1]} : vector<8x128xf32> to vector<8x32xf32>
    %168 = vector.extract_strided_slice %164 {offsets = [0, 96], sizes = [8, 32], strides = [1, 1]} : vector<8x128xf32> to vector<8x32xf32>
    %169 = arith.mulf %166, %145 : vector<8x32xf32>
    %170 = arith.mulf %165, %167 : vector<8x32xf32>
    %171 = arith.addf %169, %170 : vector<8x32xf32>
    %172 = math.tanh %171 : vector<8x32xf32>
    %173 = arith.mulf %168, %172 : vector<8x32xf32>
    %174 = arith.index_cast %c5_i32 : i32 to index
    %c0_63 = arith.constant 0 : index
    %c0_64 = arith.constant 0 : index
    %175 = vector.load %arg14[%174, %c0_63, %c0_64] : memref<8x8x32xf32, #tpu.memory_space<vmem>>, vector<1x8x32xf32>
    %176 = vector.shape_cast %175 : vector<1x8x32xf32> to vector<8x32xf32>
    %177 = vector.shape_cast %173 : vector<8x32xf32> to vector<1x8x32xf32>
    tpu.vector_store %arg14[%174, %c0_63, %c0_64], %177 {strides = array<i32>} : memref<8x8x32xf32, #tpu.memory_space<vmem>>, vector<1x8x32xf32>,
    %c6_i32 = arith.constant 6 : i32
    %178 = arith.index_cast %c6_i32 : i32 to index
    %c0_65 = arith.constant 0 : index
    %c0_66 = arith.constant 0 : index
    %179 = vector.load %arg13[%178, %c0_65, %c0_66] : memref<8x8x128xf32, #tpu.memory_space<vmem>>, vector<1x8x128xf32>
    %180 = vector.shape_cast %179 : vector<1x8x128xf32> to vector<8x128xf32>
    %c0_67 = arith.constant 0 : index
    %c0_68 = arith.constant 0 : index
    %181 = vector.load %arg5[%c0_67, %c0_68] : memref<32x128xf32, #tpu.memory_space<vmem>>, vector<32x128xf32>
    %cst_69 = arith.constant dense<0.000000e+00> : vector<8x128xf32>
    %182 = tpu.matmul %173, %181, %cst_69 {dimension_numbers = #tpu.dot_dimension_numbers<[1], [0], [0], [1], [0, 0, 1, 1], [], []>} : vector<8x32xf32>, vector<32x128xf32>, vector<8x128xf32> -> vector<8x128xf32>
    %183 = arith.addf %180, %182 : vector<8x128xf32>
    %184 = arith.negf %183 : vector<8x128xf32>
    %185 = math.exp %184 : vector<8x128xf32>
    %cst_70 = arith.constant 1.000000e+00 : f32
    %186 = vector.broadcast %cst_70 : f32 to vector<8x128xf32>
    %187 = arith.addf %186, %185 : vector<8x128xf32>
    %188 = arith.divf %186, %187 : vector<8x128xf32>
    %189 = math.tanh %183 : vector<8x128xf32>
    %190 = arith.select %8, %189, %188 : vector<8x128xi1>, vector<8x128xf32>
    %191 = vector.extract_strided_slice %190 {offsets = [0, 0], sizes = [8, 32], strides = [1, 1]} : vector<8x128xf32> to vector<8x32xf32>
    %192 = vector.extract_strided_slice %190 {offsets = [0, 32], sizes = [8, 32], strides = [1, 1]} : vector<8x128xf32> to vector<8x32xf32>
    %193 = vector.extract_strided_slice %190 {offsets = [0, 64], sizes = [8, 32], strides = [1, 1]} : vector<8x128xf32> to vector<8x32xf32>
    %194 = vector.extract_strided_slice %190 {offsets = [0, 96], sizes = [8, 32], strides = [1, 1]} : vector<8x128xf32> to vector<8x32xf32>
    %195 = arith.mulf %192, %171 : vector<8x32xf32>
    %196 = arith.mulf %191, %193 : vector<8x32xf32>
    %197 = arith.addf %195, %196 : vector<8x32xf32>
    %198 = math.tanh %197 : vector<8x32xf32>
    %199 = arith.mulf %194, %198 : vector<8x32xf32>
    %200 = arith.index_cast %c6_i32 : i32 to index
    %c0_71 = arith.constant 0 : index
    %c0_72 = arith.constant 0 : index
    %201 = vector.load %arg14[%200, %c0_71, %c0_72] : memref<8x8x32xf32, #tpu.memory_space<vmem>>, vector<1x8x32xf32>
    %202 = vector.shape_cast %201 : vector<1x8x32xf32> to vector<8x32xf32>
    %203 = vector.shape_cast %199 : vector<8x32xf32> to vector<1x8x32xf32>
    tpu.vector_store %arg14[%200, %c0_71, %c0_72], %203 {strides = array<i32>} : memref<8x8x32xf32, #tpu.memory_space<vmem>>, vector<1x8x32xf32>,
    %c7_i32 = arith.constant 7 : i32
    %204 = arith.index_cast %c7_i32 : i32 to index
    %c0_73 = arith.constant 0 : index
    %c0_74 = arith.constant 0 : index
    %205 = vector.load %arg13[%204, %c0_73, %c0_74] : memref<8x8x128xf32, #tpu.memory_space<vmem>>, vector<1x8x128xf32>
    %206 = vector.shape_cast %205 : vector<1x8x128xf32> to vector<8x128xf32>
    %c0_75 = arith.constant 0 : index
    %c0_76 = arith.constant 0 : index
    %207 = vector.load %arg5[%c0_75, %c0_76] : memref<32x128xf32, #tpu.memory_space<vmem>>, vector<32x128xf32>
    %cst_77 = arith.constant dense<0.000000e+00> : vector<8x128xf32>
    %208 = tpu.matmul %199, %207, %cst_77 {dimension_numbers = #tpu.dot_dimension_numbers<[1], [0], [0], [1], [0, 0, 1, 1], [], []>} : vector<8x32xf32>, vector<32x128xf32>, vector<8x128xf32> -> vector<8x128xf32>
    %209 = arith.addf %206, %208 : vector<8x128xf32>
    %210 = arith.negf %209 : vector<8x128xf32>
    %211 = math.exp %210 : vector<8x128xf32>
    %cst_78 = arith.constant 1.000000e+00 : f32
    %212 = vector.broadcast %cst_78 : f32 to vector<8x128xf32>
    %213 = arith.addf %212, %211 : vector<8x128xf32>
    %214 = arith.divf %212, %213 : vector<8x128xf32>
    %215 = math.tanh %209 : vector<8x128xf32>
    %216 = arith.select %8, %215, %214 : vector<8x128xi1>, vector<8x128xf32>
    %217 = vector.extract_strided_slice %216 {offsets = [0, 0], sizes = [8, 32], strides = [1, 1]} : vector<8x128xf32> to vector<8x32xf32>
    %218 = vector.extract_strided_slice %216 {offsets = [0, 32], sizes = [8, 32], strides = [1, 1]} : vector<8x128xf32> to vector<8x32xf32>
    %219 = vector.extract_strided_slice %216 {offsets = [0, 64], sizes = [8, 32], strides = [1, 1]} : vector<8x128xf32> to vector<8x32xf32>
    %220 = vector.extract_strided_slice %216 {offsets = [0, 96], sizes = [8, 32], strides = [1, 1]} : vector<8x128xf32> to vector<8x32xf32>
    %221 = arith.mulf %218, %197 : vector<8x32xf32>
    %222 = arith.mulf %217, %219 : vector<8x32xf32>
    %223 = arith.addf %221, %222 : vector<8x32xf32>
    %224 = math.tanh %223 : vector<8x32xf32>
    %225 = arith.mulf %220, %224 : vector<8x32xf32>
    %226 = arith.index_cast %c7_i32 : i32 to index
    %c0_79 = arith.constant 0 : index
    %c0_80 = arith.constant 0 : index
    %227 = vector.load %arg14[%226, %c0_79, %c0_80] : memref<8x8x32xf32, #tpu.memory_space<vmem>>, vector<1x8x32xf32>
    %228 = vector.shape_cast %227 : vector<1x8x32xf32> to vector<8x32xf32>
    %229 = vector.shape_cast %225 : vector<8x32xf32> to vector<1x8x32xf32>
    tpu.vector_store %arg14[%226, %c0_79, %c0_80], %229 {strides = array<i32>} : memref<8x8x32xf32, #tpu.memory_space<vmem>>, vector<1x8x32xf32>,
    %c8_i32 = arith.constant 8 : i32
    %c0_81 = arith.constant 0 : index
    %c0_82 = arith.constant 0 : index
    %c0_83 = arith.constant 0 : index
    %230 = vector.load %arg15[%c0_81, %c0_82, %c0_83] : memref<2x8x32xf32, #tpu.memory_space<vmem>>, vector<1x8x32xf32>
    %231 = vector.shape_cast %230 : vector<1x8x32xf32> to vector<8x32xf32>
    %232 = vector.shape_cast %225 : vector<8x32xf32> to vector<1x8x32xf32>
    tpu.vector_store %arg15[%c0_81, %c0_82, %c0_83], %232 {strides = array<i32>} : memref<2x8x32xf32, #tpu.memory_space<vmem>>, vector<1x8x32xf32>,
    %c0_84 = arith.constant 0 : index
    %c0_85 = arith.constant 0 : index
    %c0_86 = arith.constant 0 : index
    %233 = vector.load %arg16[%c0_84, %c0_85, %c0_86] : memref<2x8x32xf32, #tpu.memory_space<vmem>>, vector<1x8x32xf32>
    %234 = vector.shape_cast %233 : vector<1x8x32xf32> to vector<8x32xf32>
    %235 = vector.shape_cast %223 : vector<8x32xf32> to vector<1x8x32xf32>
    tpu.vector_store %arg16[%c0_84, %c0_85, %c0_86], %235 {strides = array<i32>} : memref<2x8x32xf32, #tpu.memory_space<vmem>>, vector<1x8x32xf32>,
    %c0_87 = arith.constant 0 : index
    %c0_88 = arith.constant 0 : index
    %c0_89 = arith.constant 0 : index
    %236 = vector.load %arg14[%c0_87, %c0_88, %c0_89] : memref<8x8x32xf32, #tpu.memory_space<vmem>>, vector<8x8x32xf32>
    %237 = vector.shape_cast %236 : vector<8x8x32xf32> to vector<64x32xf32>
    %c0_90 = arith.constant 0 : index
    %c0_91 = arith.constant 0 : index
    %238 = vector.load %arg4[%c0_90, %c0_91] : memref<32x128xf32, #tpu.memory_space<vmem>>, vector<32x128xf32>
    %cst_92 = arith.constant dense<0.000000e+00> : vector<64x128xf32>
    %239 = tpu.matmul %237, %238, %cst_92 {dimension_numbers = #tpu.dot_dimension_numbers<[1], [0], [0], [1], [0, 0, 1, 1], [], []>} : vector<64x32xf32>, vector<32x128xf32>, vector<64x128xf32> -> vector<64x128xf32>
    %c0_93 = arith.constant 0 : index
    %c0_94 = arith.constant 0 : index
    %240 = vector.load %arg8[%c0_93, %c0_94] : memref<1x128xf32, #tpu.memory_space<vmem>>, vector<1x128xf32>
    %241 = vector.broadcast %240 : vector<1x128xf32> to vector<64x128xf32>
    %242 = arith.addf %239, %241 : vector<64x128xf32>
    %243 = vector.shape_cast %242 : vector<64x128xf32> to vector<8x8x128xf32>
    %c0_95 = arith.constant 0 : index
    %c0_96 = arith.constant 0 : index
    %c0_97 = arith.constant 0 : index
    %244 = vector.load %arg13[%c0_95, %c0_96, %c0_97] : memref<8x8x128xf32, #tpu.memory_space<vmem>>, vector<8x8x128xf32>
    tpu.vector_store %arg13[%c0_95, %c0_96, %c0_97], %243 {strides = array<i32>} : memref<8x8x128xf32, #tpu.memory_space<vmem>>, vector<8x8x128xf32>,
    %c1 = arith.constant 1 : index
    %c0_98 = arith.constant 0 : index
    %c0_99 = arith.constant 0 : index
    %245 = vector.load %arg15[%c1, %c0_98, %c0_99] : memref<2x8x32xf32, #tpu.memory_space<vmem>>, vector<1x8x32xf32>
    %246 = vector.shape_cast %245 : vector<1x8x32xf32> to vector<8x32xf32>
    %c1_100 = arith.constant 1 : index
    %c0_101 = arith.constant 0 : index
    %c0_102 = arith.constant 0 : index
    %247 = vector.load %arg16[%c1_100, %c0_101, %c0_102] : memref<2x8x32xf32, #tpu.memory_space<vmem>>, vector<1x8x32xf32>
    %248 = vector.shape_cast %247 : vector<1x8x32xf32> to vector<8x32xf32>
    %c0_i32_103 = arith.constant 0 : i32
    %249 = arith.index_cast %c0_i32_103 : i32 to index
    %c0_104 = arith.constant 0 : index
    %c0_105 = arith.constant 0 : index
    %250 = vector.load %arg13[%249, %c0_104, %c0_105] : memref<8x8x128xf32, #tpu.memory_space<vmem>>, vector<1x8x128xf32>
    %251 = vector.shape_cast %250 : vector<1x8x128xf32> to vector<8x128xf32>
    %c0_106 = arith.constant 0 : index
    %c0_107 = arith.constant 0 : index
    %252 = vector.load %arg6[%c0_106, %c0_107] : memref<32x128xf32, #tpu.memory_space<vmem>>, vector<32x128xf32>
    %cst_108 = arith.constant dense<0.000000e+00> : vector<8x128xf32>
    %253 = tpu.matmul %246, %252, %cst_108 {dimension_numbers = #tpu.dot_dimension_numbers<[1], [0], [0], [1], [0, 0, 1, 1], [], []>} : vector<8x32xf32>, vector<32x128xf32>, vector<8x128xf32> -> vector<8x128xf32>
    %254 = arith.addf %251, %253 : vector<8x128xf32>
    %255 = arith.negf %254 : vector<8x128xf32>
    %256 = math.exp %255 : vector<8x128xf32>
    %cst_109 = arith.constant 1.000000e+00 : f32
    %257 = vector.broadcast %cst_109 : f32 to vector<8x128xf32>
    %258 = arith.addf %257, %256 : vector<8x128xf32>
    %259 = arith.divf %257, %258 : vector<8x128xf32>
    %260 = math.tanh %254 : vector<8x128xf32>
    %261 = arith.select %8, %260, %259 : vector<8x128xi1>, vector<8x128xf32>
    %262 = vector.extract_strided_slice %261 {offsets = [0, 0], sizes = [8, 32], strides = [1, 1]} : vector<8x128xf32> to vector<8x32xf32>
    %263 = vector.extract_strided_slice %261 {offsets = [0, 32], sizes = [8, 32], strides = [1, 1]} : vector<8x128xf32> to vector<8x32xf32>
    %264 = vector.extract_strided_slice %261 {offsets = [0, 64], sizes = [8, 32], strides = [1, 1]} : vector<8x128xf32> to vector<8x32xf32>
    %265 = vector.extract_strided_slice %261 {offsets = [0, 96], sizes = [8, 32], strides = [1, 1]} : vector<8x128xf32> to vector<8x32xf32>
    %266 = arith.mulf %263, %248 : vector<8x32xf32>
    %267 = arith.mulf %262, %264 : vector<8x32xf32>
    %268 = arith.addf %266, %267 : vector<8x32xf32>
    %269 = math.tanh %268 : vector<8x32xf32>
    %270 = arith.mulf %265, %269 : vector<8x32xf32>
    %271 = arith.index_cast %c0_i32_103 : i32 to index
    %c0_110 = arith.constant 0 : index
    %c0_111 = arith.constant 0 : index
    %272 = vector.load %arg14[%271, %c0_110, %c0_111] : memref<8x8x32xf32, #tpu.memory_space<vmem>>, vector<1x8x32xf32>
    %273 = vector.shape_cast %272 : vector<1x8x32xf32> to vector<8x32xf32>
    %274 = vector.shape_cast %270 : vector<8x32xf32> to vector<1x8x32xf32>
    tpu.vector_store %arg14[%271, %c0_110, %c0_111], %274 {strides = array<i32>} : memref<8x8x32xf32, #tpu.memory_space<vmem>>, vector<1x8x32xf32>,
    %c1_i32_112 = arith.constant 1 : i32
    %275 = arith.index_cast %c1_i32_112 : i32 to index
    %c0_113 = arith.constant 0 : index
    %c0_114 = arith.constant 0 : index
    %276 = vector.load %arg13[%275, %c0_113, %c0_114] : memref<8x8x128xf32, #tpu.memory_space<vmem>>, vector<1x8x128xf32>
    %277 = vector.shape_cast %276 : vector<1x8x128xf32> to vector<8x128xf32>
    %c0_115 = arith.constant 0 : index
    %c0_116 = arith.constant 0 : index
    %278 = vector.load %arg6[%c0_115, %c0_116] : memref<32x128xf32, #tpu.memory_space<vmem>>, vector<32x128xf32>
    %cst_117 = arith.constant dense<0.000000e+00> : vector<8x128xf32>
    %279 = tpu.matmul %270, %278, %cst_117 {dimension_numbers = #tpu.dot_dimension_numbers<[1], [0], [0], [1], [0, 0, 1, 1], [], []>} : vector<8x32xf32>, vector<32x128xf32>, vector<8x128xf32> -> vector<8x128xf32>
    %280 = arith.addf %277, %279 : vector<8x128xf32>
    %281 = arith.negf %280 : vector<8x128xf32>
    %282 = math.exp %281 : vector<8x128xf32>
    %cst_118 = arith.constant 1.000000e+00 : f32
    %283 = vector.broadcast %cst_118 : f32 to vector<8x128xf32>
    %284 = arith.addf %283, %282 : vector<8x128xf32>
    %285 = arith.divf %283, %284 : vector<8x128xf32>
    %286 = math.tanh %280 : vector<8x128xf32>
    %287 = arith.select %8, %286, %285 : vector<8x128xi1>, vector<8x128xf32>
    %288 = vector.extract_strided_slice %287 {offsets = [0, 0], sizes = [8, 32], strides = [1, 1]} : vector<8x128xf32> to vector<8x32xf32>
    %289 = vector.extract_strided_slice %287 {offsets = [0, 32], sizes = [8, 32], strides = [1, 1]} : vector<8x128xf32> to vector<8x32xf32>
    %290 = vector.extract_strided_slice %287 {offsets = [0, 64], sizes = [8, 32], strides = [1, 1]} : vector<8x128xf32> to vector<8x32xf32>
    %291 = vector.extract_strided_slice %287 {offsets = [0, 96], sizes = [8, 32], strides = [1, 1]} : vector<8x128xf32> to vector<8x32xf32>
    %292 = arith.mulf %289, %268 : vector<8x32xf32>
    %293 = arith.mulf %288, %290 : vector<8x32xf32>
    %294 = arith.addf %292, %293 : vector<8x32xf32>
    %295 = math.tanh %294 : vector<8x32xf32>
    %296 = arith.mulf %291, %295 : vector<8x32xf32>
    %297 = arith.index_cast %c1_i32_112 : i32 to index
    %c0_119 = arith.constant 0 : index
    %c0_120 = arith.constant 0 : index
    %298 = vector.load %arg14[%297, %c0_119, %c0_120] : memref<8x8x32xf32, #tpu.memory_space<vmem>>, vector<1x8x32xf32>
    %299 = vector.shape_cast %298 : vector<1x8x32xf32> to vector<8x32xf32>
    %300 = vector.shape_cast %296 : vector<8x32xf32> to vector<1x8x32xf32>
    tpu.vector_store %arg14[%297, %c0_119, %c0_120], %300 {strides = array<i32>} : memref<8x8x32xf32, #tpu.memory_space<vmem>>, vector<1x8x32xf32>,
    %c2_i32_121 = arith.constant 2 : i32
    %301 = arith.index_cast %c2_i32_121 : i32 to index
    %c0_122 = arith.constant 0 : index
    %c0_123 = arith.constant 0 : index
    %302 = vector.load %arg13[%301, %c0_122, %c0_123] : memref<8x8x128xf32, #tpu.memory_space<vmem>>, vector<1x8x128xf32>
    %303 = vector.shape_cast %302 : vector<1x8x128xf32> to vector<8x128xf32>
    %c0_124 = arith.constant 0 : index
    %c0_125 = arith.constant 0 : index
    %304 = vector.load %arg6[%c0_124, %c0_125] : memref<32x128xf32, #tpu.memory_space<vmem>>, vector<32x128xf32>
    %cst_126 = arith.constant dense<0.000000e+00> : vector<8x128xf32>
    %305 = tpu.matmul %296, %304, %cst_126 {dimension_numbers = #tpu.dot_dimension_numbers<[1], [0], [0], [1], [0, 0, 1, 1], [], []>} : vector<8x32xf32>, vector<32x128xf32>, vector<8x128xf32> -> vector<8x128xf32>
    %306 = arith.addf %303, %305 : vector<8x128xf32>
    %307 = arith.negf %306 : vector<8x128xf32>
    %308 = math.exp %307 : vector<8x128xf32>
    %cst_127 = arith.constant 1.000000e+00 : f32
    %309 = vector.broadcast %cst_127 : f32 to vector<8x128xf32>
    %310 = arith.addf %309, %308 : vector<8x128xf32>
    %311 = arith.divf %309, %310 : vector<8x128xf32>
    %312 = math.tanh %306 : vector<8x128xf32>
    %313 = arith.select %8, %312, %311 : vector<8x128xi1>, vector<8x128xf32>
    %314 = vector.extract_strided_slice %313 {offsets = [0, 0], sizes = [8, 32], strides = [1, 1]} : vector<8x128xf32> to vector<8x32xf32>
    %315 = vector.extract_strided_slice %313 {offsets = [0, 32], sizes = [8, 32], strides = [1, 1]} : vector<8x128xf32> to vector<8x32xf32>
    %316 = vector.extract_strided_slice %313 {offsets = [0, 64], sizes = [8, 32], strides = [1, 1]} : vector<8x128xf32> to vector<8x32xf32>
    %317 = vector.extract_strided_slice %313 {offsets = [0, 96], sizes = [8, 32], strides = [1, 1]} : vector<8x128xf32> to vector<8x32xf32>
    %318 = arith.mulf %315, %294 : vector<8x32xf32>
    %319 = arith.mulf %314, %316 : vector<8x32xf32>
    %320 = arith.addf %318, %319 : vector<8x32xf32>
    %321 = math.tanh %320 : vector<8x32xf32>
    %322 = arith.mulf %317, %321 : vector<8x32xf32>
    %323 = arith.index_cast %c2_i32_121 : i32 to index
    %c0_128 = arith.constant 0 : index
    %c0_129 = arith.constant 0 : index
    %324 = vector.load %arg14[%323, %c0_128, %c0_129] : memref<8x8x32xf32, #tpu.memory_space<vmem>>, vector<1x8x32xf32>
    %325 = vector.shape_cast %324 : vector<1x8x32xf32> to vector<8x32xf32>
    %326 = vector.shape_cast %322 : vector<8x32xf32> to vector<1x8x32xf32>
    tpu.vector_store %arg14[%323, %c0_128, %c0_129], %326 {strides = array<i32>} : memref<8x8x32xf32, #tpu.memory_space<vmem>>, vector<1x8x32xf32>,
    %c3_i32_130 = arith.constant 3 : i32
    %327 = arith.index_cast %c3_i32_130 : i32 to index
    %c0_131 = arith.constant 0 : index
    %c0_132 = arith.constant 0 : index
    %328 = vector.load %arg13[%327, %c0_131, %c0_132] : memref<8x8x128xf32, #tpu.memory_space<vmem>>, vector<1x8x128xf32>
    %329 = vector.shape_cast %328 : vector<1x8x128xf32> to vector<8x128xf32>
    %c0_133 = arith.constant 0 : index
    %c0_134 = arith.constant 0 : index
    %330 = vector.load %arg6[%c0_133, %c0_134] : memref<32x128xf32, #tpu.memory_space<vmem>>, vector<32x128xf32>
    %cst_135 = arith.constant dense<0.000000e+00> : vector<8x128xf32>
    %331 = tpu.matmul %322, %330, %cst_135 {dimension_numbers = #tpu.dot_dimension_numbers<[1], [0], [0], [1], [0, 0, 1, 1], [], []>} : vector<8x32xf32>, vector<32x128xf32>, vector<8x128xf32> -> vector<8x128xf32>
    %332 = arith.addf %329, %331 : vector<8x128xf32>
    %333 = arith.negf %332 : vector<8x128xf32>
    %334 = math.exp %333 : vector<8x128xf32>
    %cst_136 = arith.constant 1.000000e+00 : f32
    %335 = vector.broadcast %cst_136 : f32 to vector<8x128xf32>
    %336 = arith.addf %335, %334 : vector<8x128xf32>
    %337 = arith.divf %335, %336 : vector<8x128xf32>
    %338 = math.tanh %332 : vector<8x128xf32>
    %339 = arith.select %8, %338, %337 : vector<8x128xi1>, vector<8x128xf32>
    %340 = vector.extract_strided_slice %339 {offsets = [0, 0], sizes = [8, 32], strides = [1, 1]} : vector<8x128xf32> to vector<8x32xf32>
    %341 = vector.extract_strided_slice %339 {offsets = [0, 32], sizes = [8, 32], strides = [1, 1]} : vector<8x128xf32> to vector<8x32xf32>
    %342 = vector.extract_strided_slice %339 {offsets = [0, 64], sizes = [8, 32], strides = [1, 1]} : vector<8x128xf32> to vector<8x32xf32>
    %343 = vector.extract_strided_slice %339 {offsets = [0, 96], sizes = [8, 32], strides = [1, 1]} : vector<8x128xf32> to vector<8x32xf32>
    %344 = arith.mulf %341, %320 : vector<8x32xf32>
    %345 = arith.mulf %340, %342 : vector<8x32xf32>
    %346 = arith.addf %344, %345 : vector<8x32xf32>
    %347 = math.tanh %346 : vector<8x32xf32>
    %348 = arith.mulf %343, %347 : vector<8x32xf32>
    %349 = arith.index_cast %c3_i32_130 : i32 to index
    %c0_137 = arith.constant 0 : index
    %c0_138 = arith.constant 0 : index
    %350 = vector.load %arg14[%349, %c0_137, %c0_138] : memref<8x8x32xf32, #tpu.memory_space<vmem>>, vector<1x8x32xf32>
    %351 = vector.shape_cast %350 : vector<1x8x32xf32> to vector<8x32xf32>
    %352 = vector.shape_cast %348 : vector<8x32xf32> to vector<1x8x32xf32>
    tpu.vector_store %arg14[%349, %c0_137, %c0_138], %352 {strides = array<i32>} : memref<8x8x32xf32, #tpu.memory_space<vmem>>, vector<1x8x32xf32>,
    %c4_i32_139 = arith.constant 4 : i32
    %353 = arith.index_cast %c4_i32_139 : i32 to index
    %c0_140 = arith.constant 0 : index
    %c0_141 = arith.constant 0 : index
    %354 = vector.load %arg13[%353, %c0_140, %c0_141] : memref<8x8x128xf32, #tpu.memory_space<vmem>>, vector<1x8x128xf32>
    %355 = vector.shape_cast %354 : vector<1x8x128xf32> to vector<8x128xf32>
    %c0_142 = arith.constant 0 : index
    %c0_143 = arith.constant 0 : index
    %356 = vector.load %arg6[%c0_142, %c0_143] : memref<32x128xf32, #tpu.memory_space<vmem>>, vector<32x128xf32>
    %cst_144 = arith.constant dense<0.000000e+00> : vector<8x128xf32>
    %357 = tpu.matmul %348, %356, %cst_144 {dimension_numbers = #tpu.dot_dimension_numbers<[1], [0], [0], [1], [0, 0, 1, 1], [], []>} : vector<8x32xf32>, vector<32x128xf32>, vector<8x128xf32> -> vector<8x128xf32>
    %358 = arith.addf %355, %357 : vector<8x128xf32>
    %359 = arith.negf %358 : vector<8x128xf32>
    %360 = math.exp %359 : vector<8x128xf32>
    %cst_145 = arith.constant 1.000000e+00 : f32
    %361 = vector.broadcast %cst_145 : f32 to vector<8x128xf32>
    %362 = arith.addf %361, %360 : vector<8x128xf32>
    %363 = arith.divf %361, %362 : vector<8x128xf32>
    %364 = math.tanh %358 : vector<8x128xf32>
    %365 = arith.select %8, %364, %363 : vector<8x128xi1>, vector<8x128xf32>
    %366 = vector.extract_strided_slice %365 {offsets = [0, 0], sizes = [8, 32], strides = [1, 1]} : vector<8x128xf32> to vector<8x32xf32>
    %367 = vector.extract_strided_slice %365 {offsets = [0, 32], sizes = [8, 32], strides = [1, 1]} : vector<8x128xf32> to vector<8x32xf32>
    %368 = vector.extract_strided_slice %365 {offsets = [0, 64], sizes = [8, 32], strides = [1, 1]} : vector<8x128xf32> to vector<8x32xf32>
    %369 = vector.extract_strided_slice %365 {offsets = [0, 96], sizes = [8, 32], strides = [1, 1]} : vector<8x128xf32> to vector<8x32xf32>
    %370 = arith.mulf %367, %346 : vector<8x32xf32>
    %371 = arith.mulf %366, %368 : vector<8x32xf32>
    %372 = arith.addf %370, %371 : vector<8x32xf32>
    %373 = math.tanh %372 : vector<8x32xf32>
    %374 = arith.mulf %369, %373 : vector<8x32xf32>
    %375 = arith.index_cast %c4_i32_139 : i32 to index
    %c0_146 = arith.constant 0 : index
    %c0_147 = arith.constant 0 : index
    %376 = vector.load %arg14[%375, %c0_146, %c0_147] : memref<8x8x32xf32, #tpu.memory_space<vmem>>, vector<1x8x32xf32>
    %377 = vector.shape_cast %376 : vector<1x8x32xf32> to vector<8x32xf32>
    %378 = vector.shape_cast %374 : vector<8x32xf32> to vector<1x8x32xf32>
    tpu.vector_store %arg14[%375, %c0_146, %c0_147], %378 {strides = array<i32>} : memref<8x8x32xf32, #tpu.memory_space<vmem>>, vector<1x8x32xf32>,
    %c5_i32_148 = arith.constant 5 : i32
    %379 = arith.index_cast %c5_i32_148 : i32 to index
    %c0_149 = arith.constant 0 : index
    %c0_150 = arith.constant 0 : index
    %380 = vector.load %arg13[%379, %c0_149, %c0_150] : memref<8x8x128xf32, #tpu.memory_space<vmem>>, vector<1x8x128xf32>
    %381 = vector.shape_cast %380 : vector<1x8x128xf32> to vector<8x128xf32>
    %c0_151 = arith.constant 0 : index
    %c0_152 = arith.constant 0 : index
    %382 = vector.load %arg6[%c0_151, %c0_152] : memref<32x128xf32, #tpu.memory_space<vmem>>, vector<32x128xf32>
    %cst_153 = arith.constant dense<0.000000e+00> : vector<8x128xf32>
    %383 = tpu.matmul %374, %382, %cst_153 {dimension_numbers = #tpu.dot_dimension_numbers<[1], [0], [0], [1], [0, 0, 1, 1], [], []>} : vector<8x32xf32>, vector<32x128xf32>, vector<8x128xf32> -> vector<8x128xf32>
    %384 = arith.addf %381, %383 : vector<8x128xf32>
    %385 = arith.negf %384 : vector<8x128xf32>
    %386 = math.exp %385 : vector<8x128xf32>
    %cst_154 = arith.constant 1.000000e+00 : f32
    %387 = vector.broadcast %cst_154 : f32 to vector<8x128xf32>
    %388 = arith.addf %387, %386 : vector<8x128xf32>
    %389 = arith.divf %387, %388 : vector<8x128xf32>
    %390 = math.tanh %384 : vector<8x128xf32>
    %391 = arith.select %8, %390, %389 : vector<8x128xi1>, vector<8x128xf32>
    %392 = vector.extract_strided_slice %391 {offsets = [0, 0], sizes = [8, 32], strides = [1, 1]} : vector<8x128xf32> to vector<8x32xf32>
    %393 = vector.extract_strided_slice %391 {offsets = [0, 32], sizes = [8, 32], strides = [1, 1]} : vector<8x128xf32> to vector<8x32xf32>
    %394 = vector.extract_strided_slice %391 {offsets = [0, 64], sizes = [8, 32], strides = [1, 1]} : vector<8x128xf32> to vector<8x32xf32>
    %395 = vector.extract_strided_slice %391 {offsets = [0, 96], sizes = [8, 32], strides = [1, 1]} : vector<8x128xf32> to vector<8x32xf32>
    %396 = arith.mulf %393, %372 : vector<8x32xf32>
    %397 = arith.mulf %392, %394 : vector<8x32xf32>
    %398 = arith.addf %396, %397 : vector<8x32xf32>
    %399 = math.tanh %398 : vector<8x32xf32>
    %400 = arith.mulf %395, %399 : vector<8x32xf32>
    %401 = arith.index_cast %c5_i32_148 : i32 to index
    %c0_155 = arith.constant 0 : index
    %c0_156 = arith.constant 0 : index
    %402 = vector.load %arg14[%401, %c0_155, %c0_156] : memref<8x8x32xf32, #tpu.memory_space<vmem>>, vector<1x8x32xf32>
    %403 = vector.shape_cast %402 : vector<1x8x32xf32> to vector<8x32xf32>
    %404 = vector.shape_cast %400 : vector<8x32xf32> to vector<1x8x32xf32>
    tpu.vector_store %arg14[%401, %c0_155, %c0_156], %404 {strides = array<i32>} : memref<8x8x32xf32, #tpu.memory_space<vmem>>, vector<1x8x32xf32>,
    %c6_i32_157 = arith.constant 6 : i32
    %405 = arith.index_cast %c6_i32_157 : i32 to index
    %c0_158 = arith.constant 0 : index
    %c0_159 = arith.constant 0 : index
    %406 = vector.load %arg13[%405, %c0_158, %c0_159] : memref<8x8x128xf32, #tpu.memory_space<vmem>>, vector<1x8x128xf32>
    %407 = vector.shape_cast %406 : vector<1x8x128xf32> to vector<8x128xf32>
    %c0_160 = arith.constant 0 : index
    %c0_161 = arith.constant 0 : index
    %408 = vector.load %arg6[%c0_160, %c0_161] : memref<32x128xf32, #tpu.memory_space<vmem>>, vector<32x128xf32>
    %cst_162 = arith.constant dense<0.000000e+00> : vector<8x128xf32>
    %409 = tpu.matmul %400, %408, %cst_162 {dimension_numbers = #tpu.dot_dimension_numbers<[1], [0], [0], [1], [0, 0, 1, 1], [], []>} : vector<8x32xf32>, vector<32x128xf32>, vector<8x128xf32> -> vector<8x128xf32>
    %410 = arith.addf %407, %409 : vector<8x128xf32>
    %411 = arith.negf %410 : vector<8x128xf32>
    %412 = math.exp %411 : vector<8x128xf32>
    %cst_163 = arith.constant 1.000000e+00 : f32
    %413 = vector.broadcast %cst_163 : f32 to vector<8x128xf32>
    %414 = arith.addf %413, %412 : vector<8x128xf32>
    %415 = arith.divf %413, %414 : vector<8x128xf32>
    %416 = math.tanh %410 : vector<8x128xf32>
    %417 = arith.select %8, %416, %415 : vector<8x128xi1>, vector<8x128xf32>
    %418 = vector.extract_strided_slice %417 {offsets = [0, 0], sizes = [8, 32], strides = [1, 1]} : vector<8x128xf32> to vector<8x32xf32>
    %419 = vector.extract_strided_slice %417 {offsets = [0, 32], sizes = [8, 32], strides = [1, 1]} : vector<8x128xf32> to vector<8x32xf32>
    %420 = vector.extract_strided_slice %417 {offsets = [0, 64], sizes = [8, 32], strides = [1, 1]} : vector<8x128xf32> to vector<8x32xf32>
    %421 = vector.extract_strided_slice %417 {offsets = [0, 96], sizes = [8, 32], strides = [1, 1]} : vector<8x128xf32> to vector<8x32xf32>
    %422 = arith.mulf %419, %398 : vector<8x32xf32>
    %423 = arith.mulf %418, %420 : vector<8x32xf32>
    %424 = arith.addf %422, %423 : vector<8x32xf32>
    %425 = math.tanh %424 : vector<8x32xf32>
    %426 = arith.mulf %421, %425 : vector<8x32xf32>
    %427 = arith.index_cast %c6_i32_157 : i32 to index
    %c0_164 = arith.constant 0 : index
    %c0_165 = arith.constant 0 : index
    %428 = vector.load %arg14[%427, %c0_164, %c0_165] : memref<8x8x32xf32, #tpu.memory_space<vmem>>, vector<1x8x32xf32>
    %429 = vector.shape_cast %428 : vector<1x8x32xf32> to vector<8x32xf32>
    %430 = vector.shape_cast %426 : vector<8x32xf32> to vector<1x8x32xf32>
    tpu.vector_store %arg14[%427, %c0_164, %c0_165], %430 {strides = array<i32>} : memref<8x8x32xf32, #tpu.memory_space<vmem>>, vector<1x8x32xf32>,
    %c7_i32_166 = arith.constant 7 : i32
    %431 = arith.index_cast %c7_i32_166 : i32 to index
    %c0_167 = arith.constant 0 : index
    %c0_168 = arith.constant 0 : index
    %432 = vector.load %arg13[%431, %c0_167, %c0_168] : memref<8x8x128xf32, #tpu.memory_space<vmem>>, vector<1x8x128xf32>
    %433 = vector.shape_cast %432 : vector<1x8x128xf32> to vector<8x128xf32>
    %c0_169 = arith.constant 0 : index
    %c0_170 = arith.constant 0 : index
    %434 = vector.load %arg6[%c0_169, %c0_170] : memref<32x128xf32, #tpu.memory_space<vmem>>, vector<32x128xf32>
    %cst_171 = arith.constant dense<0.000000e+00> : vector<8x128xf32>
    %435 = tpu.matmul %426, %434, %cst_171 {dimension_numbers = #tpu.dot_dimension_numbers<[1], [0], [0], [1], [0, 0, 1, 1], [], []>} : vector<8x32xf32>, vector<32x128xf32>, vector<8x128xf32> -> vector<8x128xf32>
    %436 = arith.addf %433, %435 : vector<8x128xf32>
    %437 = arith.negf %436 : vector<8x128xf32>
    %438 = math.exp %437 : vector<8x128xf32>
    %cst_172 = arith.constant 1.000000e+00 : f32
    %439 = vector.broadcast %cst_172 : f32 to vector<8x128xf32>
    %440 = arith.addf %439, %438 : vector<8x128xf32>
    %441 = arith.divf %439, %440 : vector<8x128xf32>
    %442 = math.tanh %436 : vector<8x128xf32>
    %443 = arith.select %8, %442, %441 : vector<8x128xi1>, vector<8x128xf32>
    %444 = vector.extract_strided_slice %443 {offsets = [0, 0], sizes = [8, 32], strides = [1, 1]} : vector<8x128xf32> to vector<8x32xf32>
    %445 = vector.extract_strided_slice %443 {offsets = [0, 32], sizes = [8, 32], strides = [1, 1]} : vector<8x128xf32> to vector<8x32xf32>
    %446 = vector.extract_strided_slice %443 {offsets = [0, 64], sizes = [8, 32], strides = [1, 1]} : vector<8x128xf32> to vector<8x32xf32>
    %447 = vector.extract_strided_slice %443 {offsets = [0, 96], sizes = [8, 32], strides = [1, 1]} : vector<8x128xf32> to vector<8x32xf32>
    %448 = arith.mulf %445, %424 : vector<8x32xf32>
    %449 = arith.mulf %444, %446 : vector<8x32xf32>
    %450 = arith.addf %448, %449 : vector<8x32xf32>
    %451 = math.tanh %450 : vector<8x32xf32>
    %452 = arith.mulf %447, %451 : vector<8x32xf32>
    %453 = arith.index_cast %c7_i32_166 : i32 to index
    %c0_173 = arith.constant 0 : index
    %c0_174 = arith.constant 0 : index
    %454 = vector.load %arg14[%453, %c0_173, %c0_174] : memref<8x8x32xf32, #tpu.memory_space<vmem>>, vector<1x8x32xf32>
    %455 = vector.shape_cast %454 : vector<1x8x32xf32> to vector<8x32xf32>
    %456 = vector.shape_cast %452 : vector<8x32xf32> to vector<1x8x32xf32>
    tpu.vector_store %arg14[%453, %c0_173, %c0_174], %456 {strides = array<i32>} : memref<8x8x32xf32, #tpu.memory_space<vmem>>, vector<1x8x32xf32>,
    %c8_i32_175 = arith.constant 8 : i32
    %c1_176 = arith.constant 1 : index
    %c0_177 = arith.constant 0 : index
    %c0_178 = arith.constant 0 : index
    %457 = vector.load %arg15[%c1_176, %c0_177, %c0_178] : memref<2x8x32xf32, #tpu.memory_space<vmem>>, vector<1x8x32xf32>
    %458 = vector.shape_cast %457 : vector<1x8x32xf32> to vector<8x32xf32>
    %459 = vector.shape_cast %452 : vector<8x32xf32> to vector<1x8x32xf32>
    tpu.vector_store %arg15[%c1_176, %c0_177, %c0_178], %459 {strides = array<i32>} : memref<2x8x32xf32, #tpu.memory_space<vmem>>, vector<1x8x32xf32>,
    %c1_179 = arith.constant 1 : index
    %c0_180 = arith.constant 0 : index
    %c0_181 = arith.constant 0 : index
    %460 = vector.load %arg16[%c1_179, %c0_180, %c0_181] : memref<2x8x32xf32, #tpu.memory_space<vmem>>, vector<1x8x32xf32>
    %461 = vector.shape_cast %460 : vector<1x8x32xf32> to vector<8x32xf32>
    %462 = vector.shape_cast %450 : vector<8x32xf32> to vector<1x8x32xf32>
    tpu.vector_store %arg16[%c1_179, %c0_180, %c0_181], %462 {strides = array<i32>} : memref<2x8x32xf32, #tpu.memory_space<vmem>>, vector<1x8x32xf32>,
    %c0_182 = arith.constant 0 : index
    %c0_183 = arith.constant 0 : index
    %c0_184 = arith.constant 0 : index
    %463 = vector.load %arg14[%c0_182, %c0_183, %c0_184] : memref<8x8x32xf32, #tpu.memory_space<vmem>>, vector<8x8x32xf32>
    %464 = vector.shape_cast %463 : vector<8x8x32xf32> to vector<64x32xf32>
    %c0_185 = arith.constant 0 : index
    %c0_186 = arith.constant 0 : index
    %465 = vector.load %arg9[%c0_185, %c0_186] : memref<32x128xf32, #tpu.memory_space<vmem>>, vector<32x128xf32>
    %cst_187 = arith.constant dense<0.000000e+00> : vector<64x128xf32>
    %466 = tpu.matmul %464, %465, %cst_187 {dimension_numbers = #tpu.dot_dimension_numbers<[1], [0], [0], [1], [0, 0, 1, 1], [], []>} : vector<64x32xf32>, vector<32x128xf32>, vector<64x128xf32> -> vector<64x128xf32>
    %c0_188 = arith.constant 0 : index
    %c0_189 = arith.constant 0 : index
    %467 = vector.load %arg10[%c0_188, %c0_189] : memref<1x128xf32, #tpu.memory_space<vmem>>, vector<1x128xf32>
    %468 = vector.broadcast %467 : vector<1x128xf32> to vector<64x128xf32>
    %469 = arith.addf %466, %468 : vector<64x128xf32>
    %cst_190 = arith.constant 0.000000e+00 : f32
    %470 = vector.broadcast %cst_190 : f32 to vector<64x128xf32>
    %471 = arith.maximumf %469, %470 : vector<64x128xf32>
    %472 = math.absf %469 : vector<64x128xf32>
    %cst_191 = arith.constant 0.000000e+00 : f32
    %473 = vector.broadcast %cst_191 : f32 to vector<64x128xf32>
    %474 = arith.subf %473, %472 : vector<64x128xf32>
    %475 = math.exp %474 : vector<64x128xf32>
    %cst_192 = arith.constant 1.000000e+00 : f32
    %476 = vector.broadcast %cst_192 : f32 to vector<64x128xf32>
    %477 = arith.addf %476, %475 : vector<64x128xf32>
    %478 = math.log %477 : vector<64x128xf32>
    %479 = arith.addf %471, %478 : vector<64x128xf32>
    %c0_193 = arith.constant 0 : index
    %c0_194 = arith.constant 0 : index
    %480 = vector.load %arg11[%c0_193, %c0_194] : memref<1x128xf32, #tpu.memory_space<vmem>>, vector<1x128xf32>
    %481 = vector.broadcast %480 : vector<1x128xf32> to vector<64x128xf32>
    %482 = arith.mulf %469, %481 : vector<64x128xf32>
    %cst_195 = arith.constant 1.000000e+00 : f32
    %483 = vector.broadcast %cst_195 : f32 to vector<1x128xf32>
    %484 = arith.subf %483, %480 : vector<1x128xf32>
    %485 = vector.broadcast %484 : vector<1x128xf32> to vector<64x128xf32>
    %486 = arith.mulf %479, %485 : vector<64x128xf32>
    %487 = arith.addf %482, %486 : vector<64x128xf32>
    %488 = vector.shape_cast %487 : vector<64x128xf32> to vector<8x8x128xf32>
    %c0_196 = arith.constant 0 : index
    %c0_197 = arith.constant 0 : index
    %c0_198 = arith.constant 0 : index
    %489 = vector.load %arg12[%c0_196, %c0_197, %c0_198] : memref<8x8x128xf32, #tpu.memory_space<vmem>>, vector<8x8x128xf32>
    tpu.vector_store %arg12[%c0_196, %c0_197, %c0_198], %488 {strides = array<i32>} : memref<8x8x128xf32, #tpu.memory_space<vmem>>, vector<8x8x128xf32>,
    return
  }
  func.func @transform_0(%arg0: i32, %arg1: i32) -> (i32, i32, i32) {
    %c0_i32 = arith.constant 0 : i32
    %c0_i32_0 = arith.constant 0 : i32
    return %arg1, %arg0, %c0_i32 : i32, i32, i32
  }
  func.func @transform_1(%arg0: i32, %arg1: i32) -> (i32, i32) {
    %c0_i32 = arith.constant 0 : i32
    %c0_i32_0 = arith.constant 0 : i32
    %c0_i32_1 = arith.constant 0 : i32
    return %c0_i32, %c0_i32_0 : i32, i32
  }
  func.func @transform_2(%arg0: i32, %arg1: i32) -> (i32, i32) {
    %c0_i32 = arith.constant 0 : i32
    %c0_i32_0 = arith.constant 0 : i32
    %c0_i32_1 = arith.constant 0 : i32
    return %c0_i32, %c0_i32_0 : i32, i32
  }
  func.func @transform_3(%arg0: i32, %arg1: i32) -> (i32, i32) {
    %c0_i32 = arith.constant 0 : i32
    %c0_i32_0 = arith.constant 0 : i32
    %c0_i32_1 = arith.constant 0 : i32
    return %c0_i32, %c0_i32_0 : i32, i32
  }
  func.func @transform_4(%arg0: i32, %arg1: i32) -> (i32, i32) {
    %c0_i32 = arith.constant 0 : i32
    %c0_i32_0 = arith.constant 0 : i32
    %c0_i32_1 = arith.constant 0 : i32
    return %c0_i32, %c0_i32_0 : i32, i32
  }
  func.func @transform_5(%arg0: i32, %arg1: i32) -> (i32, i32) {
    %c0_i32 = arith.constant 0 : i32
    %c0_i32_0 = arith.constant 0 : i32
    %c0_i32_1 = arith.constant 0 : i32
    return %c0_i32, %c0_i32_0 : i32, i32
  }
  func.func @transform_6(%arg0: i32, %arg1: i32) -> (i32, i32) {
    %c0_i32 = arith.constant 0 : i32
    %c0_i32_0 = arith.constant 0 : i32
    %c0_i32_1 = arith.constant 0 : i32
    return %c0_i32, %c0_i32_0 : i32, i32
  }
  func.func @transform_7(%arg0: i32, %arg1: i32) -> (i32, i32) {
    %c0_i32 = arith.constant 0 : i32
    %c0_i32_0 = arith.constant 0 : i32
    %c0_i32_1 = arith.constant 0 : i32
    return %c0_i32, %c0_i32_0 : i32, i32
  }
  func.func @transform_8(%arg0: i32, %arg1: i32) -> (i32, i32) {
    %c0_i32 = arith.constant 0 : i32
    %c0_i32_0 = arith.constant 0 : i32
    %c0_i32_1 = arith.constant 0 : i32
    return %c0_i32, %c0_i32_0 : i32, i32
  }
  func.func @transform_9(%arg0: i32, %arg1: i32) -> (i32, i32) {
    %c0_i32 = arith.constant 0 : i32
    %c0_i32_0 = arith.constant 0 : i32
    %c0_i32_1 = arith.constant 0 : i32
    return %c0_i32, %c0_i32_0 : i32, i32
  }
  func.func @transform_10(%arg0: i32, %arg1: i32) -> (i32, i32, i32) {
    %c0_i32 = arith.constant 0 : i32
    %c0_i32_0 = arith.constant 0 : i32
    return %arg1, %arg0, %c0_i32 : i32, i32, i32
  }
}

</mosaic_0001>

<bundles_post_ra>
// kernel: tpu_custom_call.1
= control target key start
LH: loop header
LB: loop body
LE: loop exit
PB: predicated region body
PF: predicated region fallthrough
CT: control target
= control target key end

     0   :  { %15 = vsyncpa [#allocation7], 0  ;;  %s4014_s0 = inlined_call_operand.hbm [shape: f32[8,8,128], index: 0, kind: input, shape index: {}]   ;;  %s4015_s1 = inlined_call_operand.hbm [shape: f32[128,128], index: 1, kind: input, shape index: {}]   ;;  %s4016_s2 = inlined_call_operand.hbm [shape: f32[32,128], index: 2, kind: input, shape index: {}]   ;;  %s4017_s3 = inlined_call_operand.hbm [shape: f32[32,128], index: 3, kind: input, shape index: {}]   ;;  %s4018_s4 = inlined_call_operand.hbm [shape: f32[32,128], index: 4, kind: input, shape index: {}]   ;;  %s4019_s5 = inlined_call_operand.vmem [shape: f32[1,128], index: 5, kind: input, shape index: {}]   ;;  %s4020_s6 = inlined_call_operand.vmem [shape: f32[1,128], index: 6, kind: input, shape index: {}]   ;;  %s4021_s7 = inlined_call_operand.hbm [shape: f32[32,128], index: 7, kind: input, shape index: {}]   ;;  %s4022_s8 = inlined_call_operand.vmem [shape: f32[1,128], index: 8, kind: input, shape index: {}]   ;;  %s4023_s9 = inlined_call_operand.vmem [shape: f32[1,128], index: 9, kind: input, shape index: {}]   ;;  %s4024_s10 = inlined_call_operand.hbm [shape: f32[8,8,128], index: 10, kind: output, shape index: {}]  }
   0x1   :  { %16 = vsyncpa [#allocation10], 0 }
   0x2   :  { %17 = vsyncpa [#allocation13], 0 }
   0x3   :  { %18 = vsyncpa [#allocation16], 0 }
   0x4   :  { %19 = vsyncpa [#allocation8], 0  ;;  %s3411_s13 = smov [#allocation9]   ;;  %s3412_s15 = smov [#allocation12]  }
   0x5   :  { %s37_s14 = sshll.u32 %s3411_s13, 4  ;;  %s61_s16 = sshll.u32 %s3412_s15, 4  ;;  %s38_s14 = int_to_ptr.vmem [resolvable:$true] %s37_s14  ;;  %s3481_s16 = int_to_ptr.vmem [resolvable:$true] %s61_s16 }
   0x6   :  { %s3247_s19 = scalar_lea.hbm %s4015_s1, 2048 }
   0x7   :  { %p3248_p0 = scmp.ne.s32.totalorder %s4015_s1, %s3247_s19  ;;  %p3251_p1 = scmp.lt.u32.totalorder %s3247_s19, %s4015_s1 }
   0x9   :  { %p3253_p2 = pnand %p3251_p1, %p3248_p0 }
   0xb   :  { %3256 = shalt.err (!%p3253_p2)
}
   0xc   :  { %s3257_s24 = scalar_lea.vmem %s38_s14, 2048  ;;  %p3262_p4 = scmp.lt.s32.totalorder %s38_s14, %s38_s14 }
   0xd   :  { %p3258_p3 = scmp.ne.s32.totalorder %s38_s14, %s3257_s24  ;;  %p3263_p5 = scmp.lt.s32.totalorder %s3257_s24, %s3257_s24 }
   0xf   :  { %p3264_p6 = por %p3263_p5, %p3262_p4 }
  0x11   :  { %p3265_p7 = pnand %p3264_p6, %p3258_p3 }
  0x13   :  { %3268 = shalt.err (!%p3265_p7)
}
  0x14   :  { %s3413_s25 = smov 128   ;;  %s3414_s26 = smov 8  }
  0x15   :  { %43 = dma.hbm_to_vmem [thread:$0]  %s4015_s1, 2048, %s38_s14, [#allocation10], %s3413_s25, %s3413_s25, %s3414_s26  }
  0x16   :  { %s3269_s11 = scalar_lea.hbm %s4017_s3, 512 }
  0x17   :  { %p3270_p8 = scmp.ne.s32.totalorder %s4017_s3, %s3269_s11  ;;  %p3273_p9 = scmp.lt.u32.totalorder %s3269_s11, %s4017_s3 }
  0x19   :  { %p3275_p10 = pnand %p3273_p9, %p3270_p8 }
  0x1b   :  { %3278 = shalt.err (!%p3275_p10)
}
  0x1c   :  { %s3279_s18 = scalar_lea.vmem %s3481_s16, 512  ;;  %p3284_p12 = scmp.lt.s32.totalorder %s3481_s16, %s3481_s16 }
  0x1d   :  { %p3280_p11 = scmp.ne.s32.totalorder %s3481_s16, %s3279_s18  ;;  %p3285_p13 = scmp.lt.s32.totalorder %s3279_s18, %s3279_s18 }
  0x1f   :  { %p3286_p0 = por %p3285_p13, %p3284_p12 }
  0x21   :  { %p3287_p1 = pnand %p3286_p0, %p3280_p11 }
  0x23   :  { %3290 = shalt.err (!%p3287_p1)
}
  0x24   :  { %67 = dma.hbm_to_vmem [thread:$0]  %s4017_s3, 512, %s3481_s16, [#allocation13], %s3413_s25, %s3413_s25, %s3414_s26  }
  0x25   :  { %s3415_s19 = smov [#allocation6]   ;;  %s3416_s21 = smov [#allocation11]  }
  0x26   :  { %s25_s20 = sshll.u32 %s3415_s19, 4  ;;  %s49_s22 = sshll.u32 %s3416_s21, 4  ;;  %s26_s20 = int_to_ptr.vmem [resolvable:$true] %s25_s20  ;;  %s3518_s22 = int_to_ptr.vmem [resolvable:$true] %s49_s22 }
  0x27   :  { %s3291_s27 = scalar_lea.hbm %s4014_s0, 1024 }
  0x28   :  { %p3292_p2 = scmp.ne.s32.totalorder %s4014_s0, %s3291_s27  ;;  %p3295_p3 = scmp.lt.u32.totalorder %s3291_s27, %s4014_s0 }
  0x2a   :  { %p3297_p4 = pnand %p3295_p3, %p3292_p2 }
  0x2c   :  { %3300 = shalt.err (!%p3297_p4)
}
  0x2d   :  { %s3301_s3 = scalar_lea.vmem %s26_s20, 1024  ;;  %p3306_p6 = scmp.lt.s32.totalorder %s26_s20, %s26_s20 }
  0x2e   :  { %p3302_p5 = scmp.ne.s32.totalorder %s26_s20, %s3301_s3  ;;  %p3307_p7 = scmp.lt.s32.totalorder %s3301_s3, %s3301_s3 }
  0x30   :  { %p3308_p8 = por %p3307_p7, %p3306_p6 }
  0x32   :  { %p3309_p9 = pnand %p3308_p8, %p3302_p5 }
  0x34   :  { %3312 = shalt.err (!%p3309_p9)
}
  0x35   :  { %31 = dma.hbm_to_vmem [thread:$0]  %s4014_s0, 1024, %s26_s20, [#allocation7], %s3413_s25, %s3413_s25, %s3414_s26  }
  0x36   :  { %s3313_s17 = scalar_lea.hbm %s4016_s2, 512 }
  0x37   :  { %p3314_p10 = scmp.ne.s32.totalorder %s4016_s2, %s3313_s17  ;;  %p3317_p11 = scmp.lt.u32.totalorder %s3313_s17, %s4016_s2 }
  0x39   :  { %p3319_p12 = pnand %p3317_p11, %p3314_p10 }
  0x3b   :  { %3322 = shalt.err (!%p3319_p12)
}
  0x3c   :  { %s3323_s21 = scalar_lea.vmem %s3518_s22, 512  ;;  %p3328_p0 = scmp.lt.s32.totalorder %s3518_s22, %s3518_s22 }
  0x3d   :  { %p3324_p13 = scmp.ne.s32.totalorder %s3518_s22, %s3323_s21  ;;  %p3329_p1 = scmp.lt.s32.totalorder %s3323_s21, %s3323_s21 }
  0x3f   :  { %p3330_p2 = por %p3329_p1, %p3328_p0 }
  0x41   :  { %p3331_p3 = pnand %p3330_p2, %p3324_p13 }
  0x43   :  { %3334 = shalt.err (!%p3331_p3)
}
  0x44   :  { %55 = dma.hbm_to_vmem [thread:$0]  %s4016_s2, 512, %s3518_s22, [#allocation10], %s3413_s25, %s3413_s25, %s3414_s26  }
  0x45   :  { %s3417_s23 = smov [#allocation14]   ;;  %s3418_s27 = smov [#allocation15]  }
  0x46   :  { %s73_s24 = sshll.u32 %s3417_s23, 4  ;;  %s89_s28 = sshll.u32 %s3418_s27, 4  ;;  %s74_s24 = int_to_ptr.vmem [resolvable:$true] %s73_s24  ;;  %s3555_s28 = int_to_ptr.vmem [resolvable:$true] %s89_s28 }
  0x47   :  { %s3335_s11 = scalar_lea.hbm %s4018_s4, 512 }
  0x48   :  { %p3336_p4 = scmp.ne.s32.totalorder %s4018_s4, %s3335_s11  ;;  %p3339_p5 = scmp.lt.u32.totalorder %s3335_s11, %s4018_s4 }
  0x4a   :  { %p3341_p6 = pnand %p3339_p5, %p3336_p4 }
  0x4c   :  { %3344 = shalt.err (!%p3341_p6)
}
  0x4d   :  { %s3345_s2 = scalar_lea.vmem %s74_s24, 512  ;;  %p3350_p8 = scmp.lt.s32.totalorder %s74_s24, %s74_s24 }
  0x4e   :  { %p3346_p7 = scmp.ne.s32.totalorder %s74_s24, %s3345_s2  ;;  %p3351_p9 = scmp.lt.s32.totalorder %s3345_s2, %s3345_s2 }
  0x50   :  { %p3352_p10 = por %p3351_p9, %p3350_p8 }
  0x52   :  { %p3353_p11 = pnand %p3352_p10, %p3346_p7 }
  0x54   :  { %3356 = shalt.err (!%p3353_p11)
}
  0x55   :  { %79 = dma.hbm_to_vmem [thread:$0]  %s4018_s4, 512, %s74_s24, [#allocation13], %s3413_s25, %s3413_s25, %s3414_s26  }
  0x56   :  { %s3357_s1 = scalar_lea.hbm %s4021_s7, 512 }
  0x57   :  { %p3358_p12 = scmp.ne.s32.totalorder %s4021_s7, %s3357_s1  ;;  %p3361_p13 = scmp.lt.u32.totalorder %s3357_s1, %s4021_s7 }
  0x59   :  { %p3363_p0 = pnand %p3361_p13, %p3358_p12 }
  0x5b   :  { %3366 = shalt.err (!%p3363_p0)
}
  0x5c   :  { %s3367_s20 = scalar_lea.vmem %s3555_s28, 512  ;;  %p3372_p2 = scmp.lt.s32.totalorder %s3555_s28, %s3555_s28 }
  0x5d   :  { %p3368_p1 = scmp.ne.s32.totalorder %s3555_s28, %s3367_s20  ;;  %p3373_p3 = scmp.lt.s32.totalorder %s3367_s20, %s3367_s20 }
  0x5f   :  { %p3374_p4 = por %p3373_p3, %p3372_p2 }
  0x61   :  { %p3375_p5 = pnand %p3374_p4, %p3368_p1 }
  0x63   :  { %3378 = shalt.err (!%p3375_p5)
}
  0x64   :  { %95 = dma.hbm_to_vmem [thread:$0]  %s4021_s7, 512, %s3555_s28, [#allocation16], %s3413_s25, %s3413_s25, %s3414_s26  }
  0x65   :  { %3401 = dma.done.wait [#allocation7], 1024  }
  0x66   :  { %3402 = vsyncadd [#allocation7], 4294966272 }
  0x67   :  { %3403 = dma.done.wait [#allocation10], 2560  }
  0x68   :  { %3404 = vsyncadd [#allocation10], 4294964736 }
  0x69   :  { %3405 = dma.done.wait [#allocation13], 1024  }
  0x6a   :  { %3406 = vsyncadd [#allocation13], 4294966272 }
  0x6b   :  { %3407 = dma.done.wait [#allocation16], 512  }
  0x6c   :  { %3408 = vsyncadd [#allocation16], 4294966784  ;;  %vm122_vm0 = vcmask 261120   ;;  %v3419_v0 = vmov 0.0   ;;  %v3420_v1 = vmov 0.0|0.0   ;;  %vm3421_vm1 = vmmov 0  }
  0x6d   :  { %123 = vst.msk [vmem:[#allocation4] sm:$0xff] %vm122_vm0, %v3419_v0  ;;  %124 = vst.msk [vmem:[#allocation4 + $0x8] sm:$0xff] %vm122_vm0, %v3419_v0  ;;  %2966 = vmatprep.subr.bf16.mxu1 %v3420_v1  ;;  %2731 = vmatprep.mubr.msk.f32.mxu1 %vm3421_vm1, %v3419_v0  ;;  %v140_v2 = vld [vmem:[#allocation9] sm:$0xff]  ;;  %v141_v3 = vld [vmem:[#allocation9 + $0x8] sm:$0xff]  ;;  %v127_v63 = vlaneseq  ;;  %s3423_s27 = smov 32   ;;  %s3425_s3 = smov [#allocation17]  }
  0x6e   :  { %125 = vst.msk [vmem:[#allocation5] sm:$0xff] %vm122_vm0, %v3419_v0  ;;  %126 = vst.msk [vmem:[#allocation5 + $0x8] sm:$0xff] %vm122_vm0, %v3419_v0  ;;  %v142_v4 = vld [vmem:[#allocation9 + $0x10] sm:$0xff]  ;;  %v2928_v5 = vpack.c.bf16 %v141_v3, %v140_v2  ;;  %v143_v6 = vld [vmem:[#allocation9 + $0x18] sm:$0xff]  ;;  %s2474_s16 = sshll.u32 %s3425_s3, 4  ;;  %s2475_s16 = int_to_ptr.vmem [resolvable:$true] %s2474_s16 }
  0x6f   :  { %v2932_v7 = vpack.c.bf16 %v143_v6, %v142_v4  ;;  %v144_v8 = vld [vmem:[#allocation9 + $0x20] sm:$0xff]  ;;  %v145_v9 = vld [vmem:[#allocation9 + $0x28] sm:$0xff]  ;;  %v146_v11 = vld [vmem:[#allocation9 + $0x30] sm:$0xff]  ;;  %v128_v3 = vand.u32 127, %v127_v63  ;;  %s3379_s12 = scalar_lea.vmem %s2475_s16, 1024  ;;  %p3384_p7 = scmp.lt.s32.totalorder %s2475_s16, %s2475_s16 }
  0x70   :  { %2929 = vmatprep.subr.bf16.mxu0 %v2928_v5  ;;  %v2936_v10 = vpack.c.bf16 %v145_v9, %v144_v8  ;;  %v132_v12 = vld [vmem:[#allocation6] sm:$0xff]  ;;  %v147_v13 = vld [vmem:[#allocation9 + $0x38] sm:$0xff]  ;;  %v280_v15 = vld [vmem:[#allocation12 + $0x8] sm:$0xff]  ;;  %p3380_p6 = scmp.ne.s32.totalorder %s2475_s16, %s3379_s12  ;;  %p3385_p8 = scmp.lt.s32.totalorder %s3379_s12, %s3379_s12 }
  0x71   :  { %2931 = vmatpush3.bf16.msra.mxu0 %v2928_v5  ;;  %2700 = vmatprep.mubr.f32.mxu0 %v132_v12  ;;  %v279_v14 = vld [vmem:[#allocation12] sm:$0xff]  ;;  %v281_v17 = vld [vmem:[#allocation12 + $0x10] sm:$0xff]  ;;  %v282_v18 = vld [vmem:[#allocation12 + $0x18] sm:$0xff]  ;;  %v2940_v19 = vpack.c.bf16 %v147_v13, %v146_v11  ;;  %vm129_vm2 = vcmp.ge.s32.totalorder %v128_v3, 64  ;;  %vm130_vm3 = vcmp.lt.s32.totalorder %v128_v3, 96 }
  0x72   :  { %2933 = vmatprep.subr.bf16.mxu0 %v2932_v7  ;;  %v3603_v16 = vpack.c.bf16 %v280_v15, %v279_v14  ;;  %v148_v20 = vld [vmem:[#allocation9 + $0x40] sm:$0xff]  ;;  %v149_v21 = vld [vmem:[#allocation9 + $0x48] sm:$0xff]  ;;  %v3607_v22 = vpack.c.bf16 %v282_v18, %v281_v17  ;;  %v150_v24 = vld [vmem:[#allocation9 + $0x50] sm:$0xff]  ;;  %p3386_p9 = por %p3385_p8, %p3384_p7 }
  0x73   :  { %v2944_v23 = vpack.c.bf16 %v149_v21, %v148_v20  ;;  %v151_v25 = vld [vmem:[#allocation9 + $0x58] sm:$0xff]  ;;  %v152_v27 = vld [vmem:[#allocation9 + $0x60] sm:$0xff]  ;;  %v153_v28 = vld [vmem:[#allocation9 + $0x68] sm:$0xff] }
  0x74   :  { %2968 = vmatpush3.bf16.msra.mxu1 %v3603_v16  ;;  %v2948_v26 = vpack.c.bf16 %v151_v25, %v150_v24  ;;  %v2952_v29 = vpack.c.bf16 %v153_v28, %v152_v27  ;;  %v154_v30 = vld [vmem:[#allocation9 + $0x70] sm:$0xff]  ;;  %v155_v31 = vld [vmem:[#allocation9 + $0x78] sm:$0xff]  ;;  %v133_v33 = vld [vmem:[#allocation6 + $0x8] sm:$0xff]  ;;  %p3387_p10 = pnand %p3386_p9, %p3380_p6 }
  0x75   :  { %2935 = vmatpush3.bf16.msra.mxu0 %v2932_v7  ;;  %2969 = vmatprep.subr.bf16.mxu1 %v3420_v1  ;;  %v2956_v32 = vpack.c.bf16 %v155_v31, %v154_v30  ;;  %v134_v34 = vld [vmem:[#allocation6 + $0x10] sm:$0xff]  ;;  %v135_v35 = vld [vmem:[#allocation6 + $0x18] sm:$0xff]  ;;  %v136_v36 = vld [vmem:[#allocation6 + $0x20] sm:$0xff] }
  0x76   :  { %2937 = vmatprep.subr.bf16.mxu0 %v2936_v10  ;;  %v137_v37 = vld [vmem:[#allocation6 + $0x28] sm:$0xff]  ;;  %v138_v38 = vld [vmem:[#allocation6 + $0x30] sm:$0xff]  ;;  %v139_v39 = vld [vmem:[#allocation6 + $0x38] sm:$0xff] }
  0x77   :  { %v276_v40 = vld [vmem:[#allocation4] sm:$0xff]  ;;  %vm3641_vm4 = vmand %vm129_vm2, %vm130_vm3  ;;  %v277_v8 = vld [vmem:[#allocation5] sm:$0xff] }
  0x78   :  { %2971 = vmatpush3.bf16.msra.mxu1 %v3607_v22  ;;  %v2489_v41 = vld [vmem:[%s4019_s5] ss:$0 sm:$0xff]  ;;  %s3422_s5 = smov 64  }
  0x79   :  { %2939 = vmatpush3.bf16.msra.mxu0 %v2936_v10  ;;  %2972 = vmatprep.subr.bf16.mxu1 %v3420_v1 }
  0x7a   :  { %2941 = vmatprep.subr.bf16.mxu0 %v2940_v19 }
  0x7d   :  { %2943 = vmatpush3.bf16.msra.mxu0 %v2940_v19 }
  0x7e   :  { %2945 = vmatprep.subr.bf16.mxu0 %v2944_v23 }
  0x81   :  { %2947 = vmatpush3.bf16.msra.mxu0 %v2944_v23 }
  0x82   :  { %2949 = vmatprep.subr.bf16.mxu0 %v2948_v26 }
  0x85   :  { %2951 = vmatpush3.bf16.msra.mxu0 %v2948_v26 }
  0x86   :  { %2953 = vmatprep.subr.bf16.mxu0 %v2952_v29 }
  0x89   :  { %2955 = vmatpush3.bf16.msra.mxu0 %v2952_v29 }
  0x8a   :  { %2957 = vmatprep.subr.bf16.mxu0 %v2956_v32 }
  0x8d   :  { %2959 = vmatpush3.bf16.msra.mxu0 %v2956_v32 }
  0x8e   :  { %2960 = vmatprep.subr.bf16.mxu0 %v3420_v1 }
  0x90   :  { %2701 = vmatmul.mubr.f32.vlgmr.msra.gmra.mrb[0].mxu0 %v133_v33 }
  0x91   :  { %2962 = vmatpush3.bf16.msra.mxu0 %v3603_v16  ;;  %2703 = vmatprep.mubr.f32.mxu0 %v134_v34 }
  0x92   :  { %2963 = vmatprep.subr.bf16.mxu0 %v3420_v1 }
  0x94   :  { %2704 = vmatmul.mubr.f32.gmra.mrb[2].mxu0 %v135_v35 }
  0x95   :  { %2706 = vmatprep.mubr.f32.mxu0 %v136_v36  ;;  %2965 = vmatpush3.bf16.msra.mxu0 %v3607_v22 }
  0x96   :  { %2990 = vmatprep.subr.bf16.mxu0 %v3420_v1 }
  0x98   :  { %2707 = vmatmul.mubr.f32.gmra.mrb[4].mxu0 %v137_v37 }
  0x99   :  { %2709 = vmatprep.mubr.f32.mxu0 %v138_v38 }
  0x9c   :  { %2710 = vmatmul.mubr.f32.gmra.mrb[6].mxu0 %v139_v39 }
  0x9d   :  { %2720 = vmatprep.mubr.msk.f32.mxu0 %vm3421_vm1, %v3419_v0 }
  0xa0   :  { %2721 = vmatmul.mubr.msk.f32.vlgmr.msra.gmra.mrb[8].mxu0 %vm122_vm0, %v276_v40 }
  0xa1   :  { %2992 = vmatpush3.bf16.msra.mxu0 %v3603_v16  ;;  %2775 = vmatprep.mubr.msk.f32.mxu0 %vm3421_vm1, %v3419_v0 }
  0xa2   :  { %2993 = vmatprep.subr.bf16.mxu0 %v3420_v1 }
  0xa5   :  { %2995 = vmatpush3.bf16.msra.mxu0 %v3607_v22 }
  0xa6   :  { %3002 = vmatprep.subr.bf16.mxu0 %v3420_v1 }
 0x163   :  { %v2702_v42 = vpop.f32.mrb[0].mxu0 }
 0x164   :  { %v235_v43 = vadd.f32 %v2702_v42, %v2489_v41  ;;  %v229_v44 = vpop.f32.mrb[1].mxu0 }
 0x165   :  { %v230_v57 = vadd.f32 %v2489_v41, %v229_v44 }
 0x167   :  { %v2705_v45 = vpop.f32.mrb[2].mxu0 }
 0x168   :  { %v3628_v46 = vadd.f32 %v2705_v45, %v2489_v41  ;;  %v239_v47 = vpop.f32.mrb[3].mxu0 }
 0x169   :  { %v3630_v48 = vadd.f32 %v2489_v41, %v239_v47 }
 0x16b   :  { %v2708_v49 = vpop.f32.mrb[4].mxu0 }
 0x16c   :  { %v3632_v50 = vadd.f32 %v2708_v49, %v2489_v41  ;;  %v249_v51 = vpop.f32.mrb[5].mxu0 }
 0x16d   :  { %v3634_v52 = vadd.f32 %v2489_v41, %v249_v51 }
 0x16f   :  { %v2711_v53 = vpop.f32.mrb[6].mxu0 }
 0x170   :  { %v3636_v54 = vadd.f32 %v2711_v53, %v2489_v41  ;;  %v259_v55 = vpop.f32.mrb[7].mxu0 }
 0x171   :  { %v3638_v56 = vadd.f32 %v2489_v41, %v259_v55 }
 0x173   :  { %v353_v58 = vpop.f32.mrb[8].mxu0 }
 0x174   :  { %v357_v59 = vadd.f32 %v353_v58, %v230_v57  ;;  %v2722_v60 = vpop.f32.mrb[9].mxu0 }
 0x176   :  { %v2491_v61 = vmul.f32 -1.442695, %v357_v59 }
 0x178   :  { %3087 = vpow2.f32 %v2491_v61 }
 0x179   :  { %3089 = vtanh.f32 %v357_v59 }
 0x182   :  { %v3088_v62 = vpop.eup %3087 }
 0x183   :  { %v361_v2 = vadd.f32 1.0, %v3088_v62  ;;  %v3090_v5 = vpop.eup %3089 }
 0x185   :  { %3091 = vrcp.f32 %v361_v2 }
 0x18f   :  { %v3092_v6 = vpop.eup %3091 }
 0x190   :  { %v365_v7 = vsel %vm3641_vm4, %v3090_v5, %v3092_v6 }
 0x191   :  { %372 = vrot.lane.b32.xlu0 %v365_v7, %s3422_s5 }
 0x195   :  { %367 = vrot.lane.b32.xlu0 %v277_v8, %s3423_s27 }
 0x203   :  { %v373_v9 = vpop.permute.xlu0 %372 }
 0x204   :  { %v375_v10 = vmul.f32 %v373_v9, %v365_v7 }
 0x206   :  { %377 = vrot.lane.b32.xlu1 %v375_v10, %s3423_s27 }
 0x207   :  { %v368_v11 = vpop.permute.xlu0 %367 }
 0x208   :  { %v370_v12 = vmul.f32 %v368_v11, %v365_v7 }
 0x278   :  { %v378_v13 = vpop.permute.xlu1 %377 }
 0x279   :  { %v380_v14 = vadd.f32 %v378_v13, %v370_v12 }
 0x27b   :  { %3093 = vtanh.f32 %v380_v14 }
 0x285   :  { %v3094_v15 = vpop.eup %3093 }
 0x286   :  { %383 = vrot.lane.b32.xlu1 %v3094_v15, %s3422_s5 }
 0x2f8   :  { %v384_v17 = vpop.permute.xlu1 %383 }
 0x2f9   :  { %v386_v18 = vmul.f32 %v384_v17, %v365_v7 }
 0x2fb   :  { %388 = vrot.lane.b32.xlu0 %v386_v18, %s3423_s27 }
 0x36d   :  { %v389_v19 = vpop.permute.xlu0 %388 }
 0x36e   :  { %391 = vst.msk [vmem:[#allocation3] sm:$0xff] %vm122_vm0, %v389_v19  ;;  %2732 = vmatmul.mubr.msk.f32.vlgmr.msra.gmra.mrb[0].mxu1 %vm122_vm0, %v389_v19 }
 0x36f   :  { %2974 = vmatpush3.bf16.msra.mxu1 %v3603_v16  ;;  %2742 = vmatprep.mubr.msk.f32.mxu1 %vm3421_vm1, %v3419_v0 }
 0x370   :  { %2975 = vmatprep.subr.bf16.mxu1 %v3420_v1 }
 0x373   :  { %2977 = vmatpush3.bf16.msra.mxu1 %v3607_v22 }
 0x374   :  { %2978 = vmatprep.subr.bf16.mxu1 %v3420_v1 }
 0x441   :  { %v466_v20 = vpop.f32.mrb[0].mxu1 }
 0x442   :  { %v470_v21 = vadd.f32 %v466_v20, %v235_v43  ;;  %v2733_v23 = vpop.f32.mrb[1].mxu1 }
 0x444   :  { %v2493_v24 = vmul.f32 -1.442695, %v470_v21 }
 0x446   :  { %3095 = vpow2.f32 %v2493_v24 }
 0x447   :  { %3097 = vtanh.f32 %v470_v21 }
 0x450   :  { %v3096_v25 = vpop.eup %3095 }
 0x451   :  { %v474_v26 = vadd.f32 1.0, %v3096_v25  ;;  %v3098_v27 = vpop.eup %3097 }
 0x453   :  { %3099 = vrcp.f32 %v474_v26 }
 0x45d   :  { %v3100_v28 = vpop.eup %3099 }
 0x45e   :  { %v478_v29 = vsel %vm3641_vm4, %v3098_v27, %v3100_v28 }
 0x45f   :  { %481 = vrot.lane.b32.xlu1 %v478_v29, %s3422_s5  ;;  %v479_v32 = vmul.f32 %v478_v29, %v380_v14 }
 0x4d1   :  { %v482_v30 = vpop.permute.xlu1 %481 }
 0x4d2   :  { %v484_v31 = vmul.f32 %v482_v30, %v478_v29 }
 0x4d4   :  { %486 = vrot.lane.b32.xlu0 %v484_v31, %s3423_s27 }
 0x546   :  { %v487_v33 = vpop.permute.xlu0 %486 }
 0x547   :  { %v489_v34 = vadd.f32 %v487_v33, %v479_v32 }
 0x549   :  { %3101 = vtanh.f32 %v489_v34 }
 0x553   :  { %v3102_v35 = vpop.eup %3101 }
 0x554   :  { %492 = vrot.lane.b32.xlu1 %v3102_v35, %s3422_s5 }
 0x5c6   :  { %v493_v36 = vpop.permute.xlu1 %492 }
 0x5c7   :  { %v495_v37 = vmul.f32 %v493_v36, %v478_v29 }
 0x5c9   :  { %497 = vrot.lane.b32.xlu0 %v495_v37, %s3423_s27 }
 0x63b   :  { %v498_v38 = vpop.permute.xlu0 %497 }
 0x63c   :  { %501 = vst.msk [vmem:[#allocation3 + $0x8] sm:$0xff] %vm122_vm0, %v498_v38  ;;  %2743 = vmatmul.mubr.msk.f32.vlgmr.msra.gmra.mrb[2].mxu1 %vm122_vm0, %v498_v38 }
 0x63d   :  { %2980 = vmatpush3.bf16.msra.mxu1 %v3603_v16  ;;  %2753 = vmatprep.mubr.msk.f32.mxu1 %vm3421_vm1, %v3419_v0 }
 0x63e   :  { %2981 = vmatprep.subr.bf16.mxu1 %v3420_v1 }
 0x641   :  { %2983 = vmatpush3.bf16.msra.mxu1 %v3607_v22 }
 0x642   :  { %2984 = vmatprep.subr.bf16.mxu1 %v3420_v1 }
 0x70f   :  { %v576_v39 = vpop.f32.mrb[2].mxu1 }
 0x710   :  { %v580_v40 = vadd.f32 %v576_v39, %v3630_v48  ;;  %v2744_v41 = vpop.f32.mrb[3].mxu1 }
 0x712   :  { %v2495_v42 = vmul.f32 -1.442695, %v580_v40 }
 0x714   :  { %3103 = vpow2.f32 %v2495_v42 }
 0x715   :  { %3105 = vtanh.f32 %v580_v40 }
 0x71e   :  { %v3104_v43 = vpop.eup %3103 }
 0x71f   :  { %v584_v44 = vadd.f32 1.0, %v3104_v43  ;;  %v3106_v45 = vpop.eup %3105 }
 0x721   :  { %3107 = vrcp.f32 %v584_v44 }
 0x72b   :  { %v3108_v47 = vpop.eup %3107 }
 0x72c   :  { %v588_v49 = vsel %vm3641_vm4, %v3106_v45, %v3108_v47 }
 0x72d   :  { %591 = vrot.lane.b32.xlu1 %v588_v49, %s3422_s5  ;;  %v589_v55 = vmul.f32 %v588_v49, %v489_v34 }
 0x79f   :  { %v592_v51 = vpop.permute.xlu1 %591 }
 0x7a0   :  { %v594_v53 = vmul.f32 %v592_v51, %v588_v49 }
 0x7a2   :  { %596 = vrot.lane.b32.xlu0 %v594_v53, %s3423_s27  ;;  %v1176_v53 = vld [vmem:[#allocation11] sm:$0xff] }
 0x814   :  { %v597_v48 = vpop.permute.xlu0 %596 }
 0x815   :  { %v599_v57 = vadd.f32 %v597_v48, %v589_v55  ;;  %v1177_v55 = vld [vmem:[#allocation11 + $0x8] sm:$0xff] }
 0x816   :  { %v3008_v48 = vpack.c.bf16 %v1177_v55, %v1176_v53 }
 0x817   :  { %3109 = vtanh.f32 %v599_v57 }
 0x821   :  { %v3110_v58 = vpop.eup %3109 }
 0x822   :  { %602 = vrot.lane.b32.xlu1 %v3110_v58, %s3422_s5 }
 0x894   :  { %v603_v59 = vpop.permute.xlu1 %602 }
 0x895   :  { %v605_v60 = vmul.f32 %v603_v59, %v588_v49 }
 0x897   :  { %607 = vrot.lane.b32.xlu0 %v605_v60, %s3423_s27  ;;  %v1178_v60 = vld [vmem:[#allocation11 + $0x10] sm:$0xff] }
 0x909   :  { %v608_v61 = vpop.permute.xlu0 %607 }
 0x90a   :  { %611 = vst.msk [vmem:[#allocation3 + $0x10] sm:$0xff] %vm122_vm0, %v608_v61  ;;  %2754 = vmatmul.mubr.msk.f32.vlgmr.msra.gmra.mrb[4].mxu1 %vm122_vm0, %v608_v61  ;;  %v1179_v61 = vld [vmem:[#allocation11 + $0x18] sm:$0xff] }
 0x90b   :  { %2986 = vmatpush3.bf16.msra.mxu1 %v3603_v16  ;;  %2764 = vmatprep.mubr.msk.f32.mxu1 %vm3421_vm1, %v3419_v0 }
 0x90c   :  { %2987 = vmatprep.subr.bf16.mxu1 %v3420_v1 }
 0x90f   :  { %2989 = vmatpush3.bf16.msra.mxu1 %v3607_v22 }
 0x910   :  { %2996 = vmatprep.subr.bf16.mxu1 %v3420_v1 }
 0x9dd   :  { %v686_v62 = vpop.f32.mrb[4].mxu1 }
 0x9de   :  { %v690_v2 = vadd.f32 %v686_v62, %v3628_v46  ;;  %v2755_v3 = vpop.f32.mrb[5].mxu1  ;;  %v3012_v62 = vpack.c.bf16 %v1179_v61, %v1178_v60 }
 0x9df   :  { %v1168_v3 = vld [vmem:[#allocation3] sm:$0xff] }
 0x9e0   :  { %v2497_v5 = vmul.f32 -1.442695, %v690_v2 }
 0x9e2   :  { %3111 = vpow2.f32 %v2497_v5  ;;  %v1169_v5 = vld [vmem:[#allocation3 + $0x8] sm:$0xff] }
 0x9e3   :  { %3113 = vtanh.f32 %v690_v2 }
 0x9ec   :  { %v3112_v6 = vpop.eup %3111 }
 0x9ed   :  { %v694_v7 = vadd.f32 1.0, %v3112_v6  ;;  %v3114_v8 = vpop.eup %3113  ;;  %v1170_v6 = vld [vmem:[#allocation3 + $0x10] sm:$0xff] }
 0x9ef   :  { %3115 = vrcp.f32 %v694_v7 }
 0x9f9   :  { %v3116_v9 = vpop.eup %3115 }
 0x9fa   :  { %v698_v10 = vsel %vm3641_vm4, %v3114_v8, %v3116_v9 }
 0x9fb   :  { %701 = vrot.lane.b32.xlu1 %v698_v10, %s3422_s5  ;;  %v699_v13 = vmul.f32 %v698_v10, %v599_v57 }
 0xa6d   :  { %v702_v11 = vpop.permute.xlu1 %701 }
 0xa6e   :  { %v704_v12 = vmul.f32 %v702_v11, %v698_v10 }
 0xa70   :  { %706 = vrot.lane.b32.xlu0 %v704_v12, %s3423_s27 }
 0xae2   :  { %v707_v46 = vpop.permute.xlu0 %706 }
 0xae3   :  { %v709_v14 = vadd.f32 %v707_v46, %v699_v13 }
 0xae5   :  { %3117 = vtanh.f32 %v709_v14 }
 0xaef   :  { %v3118_v15 = vpop.eup %3117 }
 0xaf0   :  { %712 = vrot.lane.b32.xlu1 %v3118_v15, %s3422_s5 }
 0xb62   :  { %v713_v17 = vpop.permute.xlu1 %712 }
 0xb63   :  { %v715_v18 = vmul.f32 %v713_v17, %v698_v10 }
 0xb65   :  { %717 = vrot.lane.b32.xlu0 %v715_v18, %s3423_s27 }
 0xbd7   :  { %v718_v19 = vpop.permute.xlu0 %717 }
 0xbd8   :  { %721 = vst.msk [vmem:[#allocation3 + $0x18] sm:$0xff] %vm122_vm0, %v718_v19  ;;  %2765 = vmatmul.mubr.msk.f32.vlgmr.msra.gmra.mrb[6].mxu1 %vm122_vm0, %v718_v19 }
 0xbd9   :  { %2998 = vmatpush3.bf16.msra.mxu1 %v3603_v16  ;;  %2786 = vmatprep.mubr.msk.f32.mxu1 %vm3421_vm1, %v3419_v0 }
 0xbda   :  { %2999 = vmatprep.subr.bf16.mxu1 %v3420_v1 }
 0xbdd   :  { %3001 = vmatpush3.bf16.msra.mxu1 %v3607_v22 }
 0xbde   :  { %3009 = vmatprep.subr.bf16.mxu1 %v3008_v48 }
 0xbdf   :  { %v1171_v7 = vld [vmem:[#allocation3 + $0x18] sm:$0xff] }
 0xcab   :  { %v796_v20 = vpop.f32.mrb[6].mxu1 }
 0xcac   :  { %v800_v21 = vadd.f32 %v796_v20, %v3634_v52  ;;  %v2766_v23 = vpop.f32.mrb[7].mxu1 }
 0xcae   :  { %v2499_v24 = vmul.f32 -1.442695, %v800_v21 }
 0xcb0   :  { %3119 = vpow2.f32 %v2499_v24 }
 0xcb1   :  { %3121 = vtanh.f32 %v800_v21 }
 0xcba   :  { %v3120_v25 = vpop.eup %3119 }
 0xcbb   :  { %v804_v26 = vadd.f32 1.0, %v3120_v25  ;;  %v3122_v27 = vpop.eup %3121 }
 0xcbd   :  { %3123 = vrcp.f32 %v804_v26 }
 0xcc7   :  { %v3124_v28 = vpop.eup %3123 }
 0xcc8   :  { %v808_v29 = vsel %vm3641_vm4, %v3122_v27, %v3124_v28 }
 0xcc9   :  { %811 = vrot.lane.b32.xlu1 %v808_v29, %s3422_s5  ;;  %v809_v32 = vmul.f32 %v808_v29, %v709_v14 }
 0xd3b   :  { %v812_v30 = vpop.permute.xlu1 %811 }
 0xd3c   :  { %v814_v31 = vmul.f32 %v812_v30, %v808_v29 }
 0xd3e   :  { %816 = vrot.lane.b32.xlu0 %v814_v31, %s3423_s27  ;;  %v1329_v31 = vld [vmem:[#allocation14] sm:$0xff] }
 0xdb0   :  { %v817_v52 = vpop.permute.xlu0 %816 }
 0xdb1   :  { %v819_v33 = vadd.f32 %v817_v52, %v809_v32  ;;  %v1330_v32 = vld [vmem:[#allocation14 + $0x8] sm:$0xff] }
 0xdb2   :  { %v3753_v52 = vpack.c.bf16 %v1330_v32, %v1329_v31 }
 0xdb3   :  { %3125 = vtanh.f32 %v819_v33 }
 0xdbd   :  { %v3126_v34 = vpop.eup %3125 }
 0xdbe   :  { %822 = vrot.lane.b32.xlu1 %v3126_v34, %s3422_s5  ;;  %v1332_v34 = vld [vmem:[#allocation14 + $0x18] sm:$0xff] }
 0xe30   :  { %v823_v35 = vpop.permute.xlu1 %822 }
 0xe31   :  { %v825_v36 = vmul.f32 %v823_v35, %v808_v29 }
 0xe33   :  { %827 = vrot.lane.b32.xlu0 %v825_v36, %s3423_s27 }
 0xea5   :  { %v828_v37 = vpop.permute.xlu0 %827 }
 0xea6   :  { %831 = vst.msk [vmem:[#allocation3 + $0x20] sm:$0xff] %vm122_vm0, %v828_v37  ;;  %2776 = vmatmul.mubr.msk.f32.vlgmr.msra.gmra.mrb[10].mxu0 %vm122_vm0, %v828_v37 }
 0xea7   :  { %3004 = vmatpush3.bf16.msra.mxu0 %v3603_v16  ;;  %2797 = vmatprep.mubr.msk.f32.mxu0 %vm3421_vm1, %v3419_v0 }
 0xea8   :  { %3005 = vmatprep.subr.bf16.mxu0 %v3420_v1 }
 0xeab   :  { %3007 = vmatpush3.bf16.msra.mxu0 %v3607_v22 }
 0xeac   :  { %3016 = vmatprep.subr.bf16.mxu0 %v3420_v1 }
 0xead   :  { %v1172_v8 = vld [vmem:[#allocation3 + $0x20] sm:$0xff] }
 0xf79   :  { %v906_v38 = vpop.f32.mrb[10].mxu0 }
 0xf7a   :  { %v910_v39 = vadd.f32 %v906_v38, %v3632_v50  ;;  %v2777_v40 = vpop.f32.mrb[11].mxu0  ;;  %v1327_v38 = vld [vmem:[#allocation5 + $0x8] sm:$0xff] }
 0xf7b   :  { %v1325_v40 = vld [vmem:[#allocation4 + $0x8] sm:$0xff] }
 0xf7c   :  { %v2501_v41 = vmul.f32 -1.442695, %v910_v39 }
 0xf7e   :  { %3127 = vpow2.f32 %v2501_v41 }
 0xf7f   :  { %3129 = vtanh.f32 %v910_v39 }
 0xf88   :  { %v3128_v42 = vpop.eup %3127 }
 0xf89   :  { %v914_v43 = vadd.f32 1.0, %v3128_v42  ;;  %v3130_v16 = vpop.eup %3129 }
 0xf8b   :  { %3131 = vrcp.f32 %v914_v43 }
 0xf95   :  { %v3132_v44 = vpop.eup %3131 }
 0xf96   :  { %v918_v45 = vsel %vm3641_vm4, %v3130_v16, %v3132_v44  ;;  %v3783_v44 = vld [vmem:[%s4020_s6] ss:$0 sm:$0xff] }
 0xf97   :  { %921 = vrot.lane.b32.xlu1 %v918_v45, %s3422_s5  ;;  %v919_v49 = vmul.f32 %v918_v45, %v819_v33  ;;  %v1331_v33 = vld [vmem:[#allocation14 + $0x10] sm:$0xff] }
 0xf98   :  { %v3757_v35 = vpack.c.bf16 %v1332_v34, %v1331_v33 }
0x1009   :  { %v922_v22 = vpop.permute.xlu1 %921 }
0x100a   :  { %v924_v47 = vmul.f32 %v922_v22, %v918_v45 }
0x100c   :  { %926 = vrot.lane.b32.xlu0 %v924_v47, %s3423_s27 }
0x107e   :  { %v927_v50 = vpop.permute.xlu0 %926 }
0x107f   :  { %v929_v51 = vadd.f32 %v927_v50, %v919_v49 }
0x1081   :  { %3133 = vtanh.f32 %v929_v51 }
0x108b   :  { %v3134_v57 = vpop.eup %3133 }
0x108c   :  { %932 = vrot.lane.b32.xlu1 %v3134_v57, %s3422_s5 }
0x10fe   :  { %v933_v58 = vpop.permute.xlu1 %932 }
0x10ff   :  { %v935_v59 = vmul.f32 %v933_v58, %v918_v45 }
0x1101   :  { %937 = vrot.lane.b32.xlu0 %v935_v59, %s3423_s27 }
0x1173   :  { %v938_v2 = vpop.permute.xlu0 %937 }
0x1174   :  { %941 = vst.msk [vmem:[#allocation3 + $0x28] sm:$0xff] %vm122_vm0, %v938_v2  ;;  %2787 = vmatmul.mubr.msk.f32.vlgmr.msra.gmra.mrb[8].mxu1 %vm122_vm0, %v938_v2 }
0x1175   :  { %3011 = vmatpush3.bf16.msra.mxu1 %v3008_v48  ;;  %2808 = vmatprep.mubr.msk.f32.mxu1 %vm122_vm0, %v1168_v3 }
0x1176   :  { %3013 = vmatprep.subr.bf16.mxu1 %v3012_v62 }
0x1179   :  { %3015 = vmatpush3.bf16.msra.mxu1 %v3012_v62 }
0x117a   :  { %3028 = vmatprep.subr.bf16.mxu1 %v3420_v1 }
0x117b   :  { %v1173_v9 = vld [vmem:[#allocation3 + $0x28] sm:$0xff] }
0x117c   :  { %2809 = vmatmul.mubr.msk.f32.vlgmr.msra.gmra.mrb[10].mxu1 %vm122_vm0, %v1169_v5 }
0x117d   :  { %2811 = vmatprep.mubr.msk.f32.mxu1 %vm122_vm0, %v1170_v6  ;;  %3030 = vmatpush3.bf16.msra.mxu1 %v3753_v52 }
0x117e   :  { %3031 = vmatprep.subr.bf16.mxu1 %v3420_v1 }
0x1180   :  { %2812 = vmatmul.mubr.msk.f32.gmra.mrb[12].mxu1 %vm122_vm0, %v1171_v7 }
0x1181   :  { %2814 = vmatprep.mubr.msk.f32.mxu1 %vm122_vm0, %v1172_v8  ;;  %3033 = vmatpush3.bf16.msra.mxu1 %v3757_v35 }
0x1182   :  { %3040 = vmatprep.subr.bf16.mxu1 %v3420_v1 }
0x1184   :  { %2815 = vmatmul.mubr.msk.f32.gmra.mrb[14].mxu1 %vm122_vm0, %v1173_v9 }
0x1247   :  { %v1016_v10 = vpop.f32.mrb[8].mxu1 }
0x1248   :  { %v1020_v11 = vadd.f32 %v1016_v10, %v3638_v56  ;;  %v2788_v12 = vpop.f32.mrb[9].mxu1 }
0x124a   :  { %v2503_v13 = vmul.f32 -1.442695, %v1020_v11 }
0x124c   :  { %3135 = vpow2.f32 %v2503_v13 }
0x124d   :  { %3137 = vtanh.f32 %v1020_v11 }
0x124f   :  { %v3735_v46 = vpop.f32.mrb[10].mxu1 }
0x1250   :  { %v1277_v14 = vpop.f32.mrb[11].mxu1 }
0x1251   :  { %v1278_v45 = vadd.f32 %v3783_v44, %v1277_v14 }
0x1253   :  { %v3737_v15 = vpop.f32.mrb[12].mxu1 }
0x1254   :  { %v3739_v17 = vpop.f32.mrb[13].mxu1 }
0x1256   :  { %v3136_v18 = vpop.eup %3135 }
0x1257   :  { %v1024_v19 = vadd.f32 1.0, %v3136_v18  ;;  %v3741_v20 = vpop.f32.mrb[14].mxu1  ;;  %v3138_v23 = vpop.eup %3137 }
0x1258   :  { %v3743_v21 = vpop.f32.mrb[15].mxu1 }
0x1259   :  { %3139 = vrcp.f32 %v1024_v19 }
0x1263   :  { %v3140_v56 = vpop.eup %3139 }
0x1264   :  { %v1028_v24 = vsel %vm3641_vm4, %v3138_v23, %v3140_v56 }
0x1265   :  { %1031 = vrot.lane.b32.xlu1 %v1028_v24, %s3422_s5  ;;  %v1029_v27 = vmul.f32 %v1028_v24, %v929_v51 }
0x12d7   :  { %v1032_v25 = vpop.permute.xlu1 %1031 }
0x12d8   :  { %v1034_v26 = vmul.f32 %v1032_v25, %v1028_v24 }
0x12da   :  { %1036 = vrot.lane.b32.xlu0 %v1034_v26, %s3423_s27  ;;  %v1283_v26 = vadd.f32 %v3735_v46, %v3783_v44 }
0x134c   :  { %v1037_v28 = vpop.permute.xlu0 %1036 }
0x134d   :  { %v3749_v29 = vadd.f32 %v1037_v28, %v1029_v27 }
0x134f   :  { %3141 = vtanh.f32 %v3749_v29 }
0x1359   :  { %v3142_v30 = vpop.eup %3141 }
0x135a   :  { %1042 = vrot.lane.b32.xlu1 %v3142_v30, %s3422_s5 }
0x13cc   :  { %v1043_v36 = vpop.permute.xlu1 %1042 }
0x13cd   :  { %v1045_v37 = vmul.f32 %v1043_v36, %v1028_v24 }
0x13cf   :  { %1047 = vrot.lane.b32.xlu0 %v1045_v37, %s3423_s27 }
0x13d3   :  { %1416 = vrot.lane.b32.xlu0 %v1327_v38, %s3423_s27 }
0x1441   :  { %v1048_v39 = vpop.permute.xlu0 %1047 }
0x1442   :  { %1051 = vst.msk [vmem:[#allocation3 + $0x30] sm:$0xff] %vm122_vm0, %v1048_v39  ;;  %2798 = vmatmul.mubr.msk.f32.vlgmr.msra.gmra.mrb[12].mxu0 %vm122_vm0, %v1048_v39 }
0x1443   :  { %3018 = vmatpush3.bf16.msra.mxu0 %v3753_v52  ;;  %2828 = vmatprep.mubr.msk.f32.mxu0 %vm3421_vm1, %v3419_v0 }
0x1444   :  { %3019 = vmatprep.subr.bf16.mxu0 %v3420_v1 }
0x1445   :  { %v1417_v60 = vpop.permute.xlu0 %1416 }
0x1447   :  { %3021 = vmatpush3.bf16.msra.mxu0 %v3757_v35 }
0x1448   :  { %3022 = vmatprep.subr.bf16.mxu0 %v3420_v1 }
0x1449   :  { %v1174_v41 = vld [vmem:[#allocation3 + $0x30] sm:$0xff] }
0x144a   :  { %2829 = vmatmul.mubr.msk.f32.vlgmr.msra.gmra.mrb[14].mxu0 %vm122_vm0, %v1325_v40  ;;  %2817 = vmatprep.mubr.msk.f32.mxu1 %vm122_vm0, %v1174_v41 }
0x144b   :  { %3024 = vmatpush3.bf16.msra.mxu0 %v3753_v52  ;;  %2839 = vmatprep.mubr.msk.f32.mxu0 %vm3421_vm1, %v3419_v0 }
0x144c   :  { %3025 = vmatprep.subr.bf16.mxu0 %v3420_v1 }
0x144f   :  { %3027 = vmatpush3.bf16.msra.mxu0 %v3757_v35 }
0x1450   :  { %3034 = vmatprep.subr.bf16.mxu0 %v3420_v1 }
0x1515   :  { %v1126_v42 = vpop.f32.mrb[12].mxu0 }
0x1516   :  { %v1130_v43 = vadd.f32 %v1126_v42, %v3636_v54  ;;  %v2799_v16 = vpop.f32.mrb[13].mxu0 }
0x1518   :  { %v2505_v59 = vmul.f32 -1.442695, %v1130_v43 }
0x151d   :  { %v1402_v22 = vpop.f32.mrb[14].mxu0 }
0x151e   :  { %v1406_v47 = vadd.f32 %v1402_v22, %v1278_v45  ;;  %v2830_v49 = vpop.f32.mrb[15].mxu0 }
0x1520   :  { %v2516_v50 = vmul.f32 -1.442695, %v1406_v47 }
0x1522   :  { %3143 = vpow2.f32 %v2516_v50  ;;  %v1288_v50 = vadd.f32 %v3783_v44, %v3739_v17 }
0x1523   :  { %3145 = vtanh.f32 %v1406_v47 }
0x152c   :  { %v3144_v51 = vpop.eup %3143 }
0x152d   :  { %v1410_v53 = vadd.f32 1.0, %v3144_v51  ;;  %v3146_v55 = vpop.eup %3145 }
0x152f   :  { %3147 = vrcp.f32 %v1410_v53 }
0x1530   :  { %3149 = vpow2.f32 %v2505_v59 }
0x1539   :  { %v3148_v48 = vpop.eup %3147 }
0x153a   :  { %v1414_v54 = vsel %vm3641_vm4, %v3146_v55, %v3148_v48  ;;  %v3150_v61 = vpop.eup %3149 }
0x153b   :  { %1421 = vrot.lane.b32.xlu1 %v1414_v54, %s3422_s5  ;;  %v1419_v62 = vmul.f32 %v1417_v60, %v1414_v54  ;;  %v1134_v2 = vadd.f32 1.0, %v3150_v61 }
0x15ad   :  { %v1422_v57 = vpop.permute.xlu1 %1421 }
0x15ae   :  { %v1424_v58 = vmul.f32 %v1422_v57, %v1414_v54 }
0x15b0   :  { %1426 = vrot.lane.b32.xlu1 %v1424_v58, %s3423_s27 }
0x1622   :  { %v1427_v3 = vpop.permute.xlu1 %1426 }
0x1623   :  { %v1429_v5 = vadd.f32 %v1427_v3, %v1419_v62 }
0x1625   :  { %3151 = vtanh.f32 %v1429_v5 }
0x1626   :  { %3153 = vrcp.f32 %v1134_v2 }
0x1627   :  { %3155 = vtanh.f32 %v1130_v43 }
0x162f   :  { %v3152_v6 = vpop.eup %3151 }
0x1630   :  { %v3154_v7 = vpop.eup %3153  ;;  %1432 = vrot.lane.b32.xlu0 %v3152_v6, %s3422_s5 }
0x1631   :  { %v3156_v8 = vpop.eup %3155 }
0x1632   :  { %v1138_v9 = vsel %vm3641_vm4, %v3156_v8, %v3154_v7 }
0x1633   :  { %v1139_v18 = vmul.f32 %v1138_v9, %v3749_v29 }
0x1634   :  { %1141 = vrot.lane.b32.xlu0 %v1138_v9, %s3422_s5 }
0x16a2   :  { %v1433_v10 = vpop.permute.xlu0 %1432 }
0x16a3   :  { %v1435_v11 = vmul.f32 %v1433_v10, %v1414_v54 }
0x16a5   :  { %1437 = vrot.lane.b32.xlu1 %v1435_v11, %s3423_s27 }
0x16a6   :  { %v1142_v12 = vpop.permute.xlu0 %1141 }
0x16a7   :  { %v1144_v13 = vmul.f32 %v1142_v12, %v1138_v9 }
0x16a9   :  { %1146 = vrot.lane.b32.xlu0 %v1144_v13, %s3423_s27 }
0x1717   :  { %v1438_v14 = vpop.permute.xlu1 %1437 }
0x1718   :  { %1440 = vst.msk [vmem:[#allocation3] sm:$0xff] %vm122_vm0, %v1438_v14  ;;  %2840 = vmatmul.mubr.msk.f32.vlgmr.msra.gmra.mrb[16].mxu0 %vm122_vm0, %v1438_v14 }
0x1719   :  { %3036 = vmatpush3.bf16.msra.mxu0 %v3753_v52  ;;  %2861 = vmatprep.mubr.msk.f32.mxu0 %vm3421_vm1, %v3419_v0 }
0x171a   :  { %3037 = vmatprep.subr.bf16.mxu0 %v3420_v1 }
0x171b   :  { %v1147_v19 = vpop.permute.xlu0 %1146 }
0x171c   :  { %v3803_v23 = vadd.f32 %v1147_v19, %v1139_v18 }
0x171d   :  { %3039 = vmatpush3.bf16.msra.mxu0 %v3757_v35 }
0x171e   :  { %3157 = vtanh.f32 %v3803_v23  ;;  %3046 = vmatprep.subr.bf16.mxu0 %v3420_v1 }
0x1728   :  { %v3158_v56 = vpop.eup %3157 }
0x1729   :  { %1152 = vrot.lane.b32.xlu0 %v3158_v56, %s3422_s5 }
0x179b   :  { %v1153_v24 = vpop.permute.xlu0 %1152 }
0x179c   :  { %v1155_v25 = vmul.f32 %v1153_v24, %v1138_v9  ;;  %v1293_v9 = vadd.f32 %v3737_v15, %v3783_v44 }
0x179e   :  { %1157 = vrot.lane.b32.xlu0 %v1155_v25, %s3423_s27 }
0x17eb   :  { %v1514_v27 = vpop.f32.mrb[16].mxu0 }
0x17ec   :  { %v1518_v28 = vadd.f32 %v1514_v27, %v1283_v26  ;;  %v2841_v29 = vpop.f32.mrb[17].mxu0 }
0x17ee   :  { %v2518_v30 = vmul.f32 -1.442695, %v1518_v28 }
0x17f0   :  { %3159 = vpow2.f32 %v2518_v30 }
0x17f1   :  { %3161 = vtanh.f32 %v1518_v28 }
0x17fa   :  { %v3160_v31 = vpop.eup %3159 }
0x17fb   :  { %v1522_v32 = vadd.f32 1.0, %v3160_v31  ;;  %v3162_v33 = vpop.eup %3161 }
0x17fd   :  { %3163 = vrcp.f32 %v1522_v32 }
0x1807   :  { %v3164_v34 = vpop.eup %3163 }
0x1808   :  { %v1526_v36 = vsel %vm3641_vm4, %v3162_v33, %v3164_v34  ;;  %v1298_v33 = vadd.f32 %v3783_v44, %v3743_v21 }
0x1809   :  { %1529 = vrot.lane.b32.xlu1 %v1526_v36, %s3422_s5  ;;  %v1527_v42 = vmul.f32 %v1526_v36, %v1429_v5 }
0x1810   :  { %v1158_v37 = vpop.permute.xlu0 %1157 }
0x1811   :  { %1161 = vst.msk [vmem:[#allocation3 + $0x38] sm:$0xff] %vm122_vm0, %v1158_v37  ;;  %1162 = vst.msk [vmem:[#allocation4] sm:$0xff] %vm122_vm0, %v1158_v37 }
0x1818   :  { %v1175_v46 = vld [vmem:[#allocation3 + $0x38] sm:$0xff] }
0x1819   :  { %2818 = vmatmul.mubr.msk.f32.gmra.mrb[16].mxu1 %vm122_vm0, %v1175_v46 }
0x181a   :  { %2850 = vmatprep.mubr.msk.f32.mxu1 %vm3421_vm1, %v3419_v0 }
0x187b   :  { %v1530_v38 = vpop.permute.xlu1 %1529 }
0x187c   :  { %v1532_v39 = vmul.f32 %v1530_v38, %v1526_v36 }
0x187e   :  { %1534 = vrot.lane.b32.xlu1 %v1532_v39, %s3423_s27 }
0x18ec   :  { %v3821_v40 = vpop.f32.mrb[16].mxu1 }
0x18ed   :  { %v3823_v41 = vpop.f32.mrb[17].mxu1 }
0x18f0   :  { %v1535_v43 = vpop.permute.xlu1 %1534 }
0x18f1   :  { %v1537_v16 = vadd.f32 %v1535_v43, %v1527_v42 }
0x18f3   :  { %3165 = vtanh.f32 %v1537_v16 }
0x18fd   :  { %v3166_v45 = vpop.eup %3165 }
0x18fe   :  { %1540 = vrot.lane.b32.xlu1 %v3166_v45, %s3422_s5 }
0x1970   :  { %v1541_v22 = vpop.permute.xlu1 %1540 }
0x1971   :  { %v1543_v47 = vmul.f32 %v1541_v22, %v1526_v36 }
0x1973   :  { %1545 = vrot.lane.b32.xlu1 %v1543_v47, %s3423_s27 }
0x19e5   :  { %v1546_v49 = vpop.permute.xlu1 %1545 }
0x19e6   :  { %1548 = vst.msk [vmem:[#allocation3 + $0x8] sm:$0xff] %vm122_vm0, %v1546_v49  ;;  %2851 = vmatmul.mubr.msk.f32.vlgmr.msra.gmra.mrb[18].mxu1 %vm122_vm0, %v1546_v49 }
0x19e7   :  { %3042 = vmatpush3.bf16.msra.mxu1 %v3753_v52  ;;  %2872 = vmatprep.mubr.msk.f32.mxu1 %vm3421_vm1, %v3419_v0 }
0x19e8   :  { %3043 = vmatprep.subr.bf16.mxu1 %v3420_v1 }
0x19eb   :  { %3045 = vmatpush3.bf16.msra.mxu1 %v3757_v35 }
0x19ec   :  { %3052 = vmatprep.subr.bf16.mxu1 %v3420_v1 }
0x1ab9   :  { %v1622_v51 = vpop.f32.mrb[18].mxu1 }
0x1aba   :  { %v1626_v53 = vadd.f32 %v1622_v51, %v1288_v50  ;;  %v2852_v55 = vpop.f32.mrb[19].mxu1 }
0x1abc   :  { %v2520_v48 = vmul.f32 -1.442695, %v1626_v53 }
0x1abe   :  { %3167 = vpow2.f32 %v2520_v48  ;;  %v1303_v48 = vadd.f32 %v3741_v20, %v3783_v44 }
0x1abf   :  { %3169 = vtanh.f32 %v1626_v53 }
0x1ac8   :  { %v3168_v54 = vpop.eup %3167 }
0x1ac9   :  { %v1630_v57 = vadd.f32 1.0, %v3168_v54  ;;  %v3170_v58 = vpop.eup %3169 }
0x1acb   :  { %3171 = vrcp.f32 %v1630_v57 }
0x1ad5   :  { %v3172_v59 = vpop.eup %3171 }
0x1ad6   :  { %v1634_v60 = vsel %vm3641_vm4, %v3170_v58, %v3172_v59 }
0x1ad7   :  { %1637 = vrot.lane.b32.xlu0 %v1634_v60, %s3422_s5  ;;  %v1635_v17 = vmul.f32 %v1634_v60, %v1537_v16 }
0x1b49   :  { %v1638_v61 = vpop.permute.xlu0 %1637 }
0x1b4a   :  { %v1640_v62 = vmul.f32 %v1638_v61, %v1634_v60 }
0x1b4c   :  { %1642 = vrot.lane.b32.xlu1 %v1640_v62, %s3423_s27 }
0x1bbe   :  { %v1643_v2 = vpop.permute.xlu1 %1642 }
0x1bbf   :  { %v1645_v3 = vadd.f32 %v1643_v2, %v1635_v17 }
0x1bc1   :  { %3173 = vtanh.f32 %v1645_v3 }
0x1bcb   :  { %v3174_v5 = vpop.eup %3173 }
0x1bcc   :  { %1648 = vrot.lane.b32.xlu0 %v3174_v5, %s3422_s5  ;;  %v2212_v5 = vld [vmem:[#allocation15 + $0x8] sm:$0xff] }
0x1c3e   :  { %v1649_v6 = vpop.permute.xlu0 %1648 }
0x1c3f   :  { %v1651_v7 = vmul.f32 %v1649_v6, %v1634_v60 }
0x1c41   :  { %1653 = vrot.lane.b32.xlu1 %v1651_v7, %s3423_s27 }
0x1cb3   :  { %v1654_v8 = vpop.permute.xlu1 %1653 }
0x1cb4   :  { %1656 = vst.msk [vmem:[#allocation3 + $0x10] sm:$0xff] %vm122_vm0, %v1654_v8  ;;  %2862 = vmatmul.mubr.msk.f32.vlgmr.msra.gmra.mrb[18].mxu0 %vm122_vm0, %v1654_v8 }
0x1cb5   :  { %3048 = vmatpush3.bf16.msra.mxu0 %v3753_v52  ;;  %2883 = vmatprep.mubr.msk.f32.mxu0 %vm3421_vm1, %v3419_v0 }
0x1cb6   :  { %3049 = vmatprep.subr.bf16.mxu0 %v3420_v1 }
0x1cb9   :  { %3051 = vmatpush3.bf16.msra.mxu0 %v3757_v35 }
0x1cba   :  { %3058 = vmatprep.subr.bf16.mxu0 %v3420_v1 }
0x1d87   :  { %v1730_v10 = vpop.f32.mrb[18].mxu0 }
0x1d88   :  { %v1734_v11 = vadd.f32 %v1730_v10, %v1293_v9  ;;  %v2863_v12 = vpop.f32.mrb[19].mxu0  ;;  %v2213_v10 = vld [vmem:[#allocation15 + $0x10] sm:$0xff] }
0x1d8a   :  { %v2522_v13 = vmul.f32 -1.442695, %v1734_v11 }
0x1d8c   :  { %3175 = vpow2.f32 %v2522_v13 }
0x1d8d   :  { %3177 = vtanh.f32 %v1734_v11  ;;  %v2214_v11 = vld [vmem:[#allocation15 + $0x18] sm:$0xff] }
0x1d8e   :  { %v3068_v12 = vpack.c.bf16 %v2214_v11, %v2213_v10 }
0x1d96   :  { %v3176_v14 = vpop.eup %3175 }
0x1d97   :  { %v1738_v18 = vadd.f32 1.0, %v3176_v14  ;;  %v3178_v19 = vpop.eup %3177  ;;  %v2203_v14 = vld [vmem:[#allocation3] sm:$0xff] }
0x1d99   :  { %3179 = vrcp.f32 %v1738_v18  ;;  %v2204_v18 = vld [vmem:[#allocation3 + $0x8] sm:$0xff] }
0x1da3   :  { %v3180_v56 = vpop.eup %3179 }
0x1da4   :  { %v1742_v24 = vsel %vm3641_vm4, %v3178_v19, %v3180_v56  ;;  %v2205_v19 = vld [vmem:[#allocation3 + $0x10] sm:$0xff] }
0x1da5   :  { %1745 = vrot.lane.b32.xlu0 %v1742_v24, %s3422_s5  ;;  %v1743_v15 = vmul.f32 %v1742_v24, %v1645_v3  ;;  %v2211_v3 = vld [vmem:[#allocation15] sm:$0xff] }
0x1da6   :  { %v3064_v6 = vpack.c.bf16 %v2212_v5, %v2211_v3 }
0x1e17   :  { %v1746_v25 = vpop.permute.xlu0 %1745 }
0x1e18   :  { %v1748_v26 = vmul.f32 %v1746_v25, %v1742_v24 }
0x1e1a   :  { %1750 = vrot.lane.b32.xlu1 %v1748_v26, %s3423_s27  ;;  %v1308_v26 = vadd.f32 %v3783_v44, %v3823_v41 }
0x1e8c   :  { %v1751_v27 = vpop.permute.xlu1 %1750 }
0x1e8d   :  { %v1753_v28 = vadd.f32 %v1751_v27, %v1743_v15 }
0x1e8f   :  { %3181 = vtanh.f32 %v1753_v28 }
0x1e99   :  { %v3182_v29 = vpop.eup %3181 }
0x1e9a   :  { %1756 = vrot.lane.b32.xlu0 %v3182_v29, %s3422_s5 }
0x1f0c   :  { %v1757_v30 = vpop.permute.xlu0 %1756 }
0x1f0d   :  { %v1759_v31 = vmul.f32 %v1757_v30, %v1742_v24  ;;  %v3905_v30 = vld [vmem:[%s4022_s8] ss:$0 sm:$0xff] }
0x1f0f   :  { %1761 = vrot.lane.b32.xlu1 %v1759_v31, %s3423_s27 }
0x1f81   :  { %v1762_v32 = vpop.permute.xlu1 %1761 }
0x1f82   :  { %1764 = vst.msk [vmem:[#allocation3 + $0x18] sm:$0xff] %vm122_vm0, %v1762_v32  ;;  %2873 = vmatmul.mubr.msk.f32.vlgmr.msra.gmra.mrb[20].mxu1 %vm122_vm0, %v1762_v32 }
0x1f83   :  { %3054 = vmatpush3.bf16.msra.mxu1 %v3753_v52  ;;  %2894 = vmatprep.mubr.msk.f32.mxu1 %vm3421_vm1, %v3419_v0 }
0x1f84   :  { %3055 = vmatprep.subr.bf16.mxu1 %v3420_v1 }
0x1f87   :  { %3057 = vmatpush3.bf16.msra.mxu1 %v3757_v35 }
0x1f88   :  { %3065 = vmatprep.subr.bf16.mxu1 %v3064_v6 }
0x1f89   :  { %v2206_v56 = vld [vmem:[#allocation3 + $0x18] sm:$0xff] }
0x2055   :  { %v1838_v34 = vpop.f32.mrb[20].mxu1 }
0x2056   :  { %v1842_v36 = vadd.f32 %v1838_v34, %v1298_v33  ;;  %v2874_v37 = vpop.f32.mrb[21].mxu1 }
0x2058   :  { %v2524_v46 = vmul.f32 -1.442695, %v1842_v36 }
0x205a   :  { %3183 = vpow2.f32 %v2524_v46 }
0x205b   :  { %3185 = vtanh.f32 %v1842_v36 }
0x2064   :  { %v3184_v38 = vpop.eup %3183 }
0x2065   :  { %v1846_v39 = vadd.f32 1.0, %v3184_v38  ;;  %v3186_v42 = vpop.eup %3185 }
0x2067   :  { %3187 = vrcp.f32 %v1846_v39 }
0x2071   :  { %v3188_v43 = vpop.eup %3187 }
0x2072   :  { %v1850_v16 = vsel %vm3641_vm4, %v3186_v42, %v3188_v43 }
0x2073   :  { %1853 = vrot.lane.b32.xlu0 %v1850_v16, %s3422_s5  ;;  %v1851_v21 = vmul.f32 %v1850_v16, %v1753_v28 }
0x20e5   :  { %v1854_v45 = vpop.permute.xlu0 %1853 }
0x20e6   :  { %v1856_v22 = vmul.f32 %v1854_v45, %v1850_v16 }
0x20e8   :  { %1858 = vrot.lane.b32.xlu1 %v1856_v22, %s3423_s27 }
0x215a   :  { %v1859_v47 = vpop.permute.xlu1 %1858 }
0x215b   :  { %v1861_v49 = vadd.f32 %v1859_v47, %v1851_v21 }
0x215d   :  { %3189 = vtanh.f32 %v1861_v49 }
0x2167   :  { %v3190_v50 = vpop.eup %3189 }
0x2168   :  { %1864 = vrot.lane.b32.xlu0 %v3190_v50, %s3422_s5 }
0x21da   :  { %v1865_v51 = vpop.permute.xlu0 %1864 }
0x21db   :  { %v1867_v53 = vmul.f32 %v1865_v51, %v1850_v16 }
0x21dd   :  { %1869 = vrot.lane.b32.xlu1 %v1867_v53, %s3423_s27 }
0x224f   :  { %v1870_v55 = vpop.permute.xlu1 %1869 }
0x2250   :  { %1872 = vst.msk [vmem:[#allocation3 + $0x20] sm:$0xff] %vm122_vm0, %v1870_v55  ;;  %2884 = vmatmul.mubr.msk.f32.vlgmr.msra.gmra.mrb[20].mxu0 %vm122_vm0, %v1870_v55 }
0x2251   :  { %3060 = vmatpush3.bf16.msra.mxu0 %v3753_v52  ;;  %2905 = vmatprep.mubr.msk.f32.mxu0 %vm3421_vm1, %v3419_v0 }
0x2252   :  { %3061 = vmatprep.subr.bf16.mxu0 %v3420_v1 }
0x2255   :  { %3063 = vmatpush3.bf16.msra.mxu0 %v3757_v35 }
0x2257   :  { %v2207_v24 = vld [vmem:[#allocation3 + $0x20] sm:$0xff] }
0x2323   :  { %v1946_v54 = vpop.f32.mrb[20].mxu0 }
0x2324   :  { %v1950_v57 = vadd.f32 %v1946_v54, %v1303_v48  ;;  %v2885_v58 = vpop.f32.mrb[21].mxu0 }
0x2326   :  { %v2526_v59 = vmul.f32 -1.442695, %v1950_v57 }
0x2328   :  { %3191 = vpow2.f32 %v2526_v59 }
0x2329   :  { %3193 = vtanh.f32 %v1950_v57 }
0x2332   :  { %v3192_v60 = vpop.eup %3191 }
0x2333   :  { %v1954_v61 = vadd.f32 1.0, %v3192_v60  ;;  %v3194_v52 = vpop.eup %3193 }
0x2335   :  { %3195 = vrcp.f32 %v1954_v61 }
0x233f   :  { %v3196_v62 = vpop.eup %3195 }
0x2340   :  { %v1958_v0 = vsel %vm3641_vm4, %v3194_v52, %v3196_v62 }
0x2341   :  { %1961 = vrot.lane.b32.xlu0 %v1958_v0, %s3422_s5  ;;  %v1959_v20 = vmul.f32 %v1958_v0, %v1861_v49 }
0x23b3   :  { %v1962_v1 = vpop.permute.xlu0 %1961 }
0x23b4   :  { %v1964_v35 = vmul.f32 %v1962_v1, %v1958_v0 }
0x23b6   :  { %1966 = vrot.lane.b32.xlu1 %v1964_v35, %s3423_s27 }
0x2428   :  { %v1967_v17 = vpop.permute.xlu1 %1966 }
0x2429   :  { %v3887_v2 = vadd.f32 %v1967_v17, %v1959_v20 }
0x242b   :  { %3197 = vtanh.f32 %v3887_v2 }
0x2435   :  { %v3198_v7 = vpop.eup %3197 }
0x2436   :  { %1972 = vrot.lane.b32.xlu0 %v3198_v7, %s3422_s5 }
0x24a8   :  { %v1973_v8 = vpop.permute.xlu0 %1972 }
0x24a9   :  { %v1975_v9 = vmul.f32 %v1973_v8, %v1958_v0 }
0x24ab   :  { %1977 = vrot.lane.b32.xlu1 %v1975_v9, %s3423_s27  ;;  %v2426_v9 = vshrl.u32 %v127_v63, 7 }
0x251d   :  { %v1978_v13 = vpop.permute.xlu1 %1977 }
0x251e   :  { %1980 = vst.msk [vmem:[#allocation3 + $0x28] sm:$0xff] %vm122_vm0, %v1978_v13  ;;  %2895 = vmatmul.mubr.msk.f32.vlgmr.msra.gmra.mrb[22].mxu1 %vm122_vm0, %v1978_v13  ;;  %v2423_v13 = vld [vmem:[%s4023_s9] sm:$0x1]  ;;  %s3424_s9 = smov 96  }
0x251f   :  { %3067 = vmatpush3.bf16.msra.mxu1 %v3064_v6  ;;  %2916 = vmatprep.mubr.msk.f32.mxu1 %vm122_vm0, %v2203_v14  ;;  %v2427_v14 = vsub.s32 0, %v2426_v9 }
0x2520   :  { %3069 = vmatprep.subr.bf16.mxu1 %v3068_v12 }
0x2523   :  { %3071 = vmatpush3.bf16.msra.mxu1 %v3068_v12 }
0x2525   :  { %v2208_v25 = vld [vmem:[#allocation3 + $0x28] sm:$0xff] }
0x2526   :  { %2917 = vmatmul.mubr.msk.f32.vlgmr.msra.gmra.mrb[24].mxu1 %vm122_vm0, %v2204_v18 }
0x2527   :  { %2919 = vmatprep.mubr.msk.f32.mxu1 %vm122_vm0, %v2205_v19  ;;  %v2438_v19 = vsub.f32 1.0, %v2423_v13 }
0x252a   :  { %2920 = vmatmul.mubr.msk.f32.gmra.mrb[26].mxu1 %vm122_vm0, %v2206_v56 }
0x252b   :  { %2922 = vmatprep.mubr.msk.f32.mxu1 %vm122_vm0, %v2207_v24 }
0x252e   :  { %2923 = vmatmul.mubr.msk.f32.gmra.mrb[28].mxu1 %vm122_vm0, %v2208_v25 }
0x25f1   :  { %v2054_v15 = vpop.f32.mrb[22].mxu1 }
0x25f2   :  { %v2058_v27 = vadd.f32 %v2054_v15, %v1308_v26  ;;  %v2896_v28 = vpop.f32.mrb[23].mxu1  ;;  %v3941_v26 = vrot.slane %v2423_v13, %v2427_v14 }
0x25f4   :  { %v2528_v29 = vmul.f32 -1.442695, %v2058_v27 }
0x25f6   :  { %3199 = vpow2.f32 %v2528_v29 }
0x25f7   :  { %3201 = vtanh.f32 %v2058_v27  ;;  %v3944_v27 = vrot.slane %v2438_v19, %v2427_v14 }
0x25f9   :  { %v2918_v31 = vpop.f32.mrb[24].mxu1 }
0x25fa   :  { %v3908_v32 = vadd.f32 %v2918_v31, %v3905_v30  ;;  %v2312_v33 = vpop.f32.mrb[25].mxu1 }
0x25fb   :  { %v3911_v34 = vadd.f32 %v3905_v30, %v2312_v33 }
0x25fc   :  { %v2360_v41 = vand.u32 2147483647, %v3908_v32  ;;  %v2352_v63 = vmax.f32 %v3908_v32, 0.0 }
0x25fd   :  { %v2359_v36 = vand.u32 2147483647, %v3911_v34  ;;  %v2921_v37 = vpop.f32.mrb[26].mxu1  ;;  %v2351_v31 = vmax.f32 %v3911_v34, 0.0 }
0x25fe   :  { %v2368_v46 = vsub.f32 0.0, %v2360_v41  ;;  %v3916_v38 = vadd.f32 %v2921_v37, %v3905_v30  ;;  %v2322_v39 = vpop.f32.mrb[27].mxu1 }
0x25ff   :  { %v2367_v42 = vsub.f32 0.0, %v2359_v36  ;;  %v3919_v43 = vadd.f32 %v3905_v30, %v2322_v39  ;;  %v2431_v36 = vmul.f32 %v3941_v26, %v3908_v32 }
0x2600   :  { %v3200_v16 = vpop.eup %3199  ;;  %v2377_v45 = vmul.f32 1.442695, %v2368_v46  ;;  %v2362_v22 = vand.u32 2147483647, %v3916_v38 }
0x2601   :  { %v2062_v21 = vadd.f32 1.0, %v3200_v16  ;;  %v2375_v47 = vmul.f32 1.442695, %v2367_v42  ;;  %v2361_v49 = vand.u32 2147483647, %v3919_v43  ;;  %v2924_v51 = vpop.f32.mrb[28].mxu1  ;;  %v3202_v1 = vpop.eup %3201 }
0x2602   :  { %3203 = vpow2.f32 %v2377_v45  ;;  %v2370_v50 = vsub.f32 0.0, %v2362_v22  ;;  %v3924_v55 = vadd.f32 %v2924_v51, %v3905_v30  ;;  %v2332_v48 = vpop.f32.mrb[29].mxu1  ;;  %v2354_v42 = vmax.f32 %v3916_v38, 0.0 }
0x2603   :  { %3205 = vrcp.f32 %v2062_v21  ;;  %v2369_v53 = vsub.f32 0.0, %v2361_v49  ;;  %v3927_v57 = vadd.f32 %v3905_v30, %v2332_v48  ;;  %v2353_v45 = vmax.f32 %v3919_v43, 0.0 }
0x2604   :  { %3207 = vpow2.f32 %v2375_v47  ;;  %v2381_v54 = vmul.f32 1.442695, %v2370_v50  ;;  %v2364_v59 = vand.u32 2147483647, %v3924_v55  ;;  %v2430_v47 = vmul.f32 %v3941_v26, %v3911_v34 }
0x2605   :  { %v2379_v58 = vmul.f32 1.442695, %v2369_v53  ;;  %v2363_v60 = vand.u32 2147483647, %v3927_v57  ;;  %v2433_v48 = vmul.f32 %v3941_v26, %v3916_v38  ;;  %v2356_v34 = vmax.f32 %v3924_v55, 0.0 }
0x2606   :  { %3209 = vpow2.f32 %v2381_v54  ;;  %v2372_v61 = vsub.f32 0.0, %v2364_v59  ;;  %v2432_v59 = vmul.f32 %v3941_v26, %v3919_v43 }
0x2607   :  { %3211 = vpow2.f32 %v2379_v58  ;;  %v2371_v52 = vsub.f32 0.0, %v2363_v60 }
0x2608   :  { %v2385_v62 = vmul.f32 1.442695, %v2372_v61 }
0x2609   :  { %v2383_v0 = vmul.f32 1.442695, %v2371_v52 }
0x260a   :  { %3213 = vpow2.f32 %v2385_v62  ;;  %v2355_v62 = vmax.f32 %v3927_v57, 0.0 }
0x260b   :  { %3215 = vpow2.f32 %v2383_v0 }
0x260c   :  { %v3204_v35 = vpop.eup %3203 }
0x260d   :  { %v3206_v20 = vpop.eup %3205  ;;  %v2392_v17 = vadd.f32 1.0, %v3204_v35 }
0x260e   :  { %v3208_v3 = vpop.eup %3207  ;;  %v3933_v5 = vsel %vm3641_vm4, %v3202_v1, %v3206_v20  ;;  %v2435_v20 = vmul.f32 %v3941_v26, %v3924_v55 }
0x260f   :  { %3217 = vlog2.f32 %v2392_v17  ;;  %v2391_v6 = vadd.f32 1.0, %v3208_v3  ;;  %2069 = vrot.lane.b32.xlu0 %v3933_v5, %s3422_s5  ;;  %v2434_v17 = vmul.f32 %v3941_v26, %v3927_v57 }
0x2610   :  { %v3210_v7 = vpop.eup %3209 }
0x2611   :  { %v3212_v8 = vpop.eup %3211  ;;  %3219 = vlog2.f32 %v2391_v6  ;;  %v2394_v10 = vadd.f32 1.0, %v3210_v7 }
0x2612   :  { %v2393_v11 = vadd.f32 1.0, %v3212_v8 }
0x2613   :  { %3221 = vlog2.f32 %v2394_v10  ;;  %v2067_v10 = vmul.f32 %v3933_v5, %v3887_v2  ;;  %v1313_v2 = vadd.f32 %v3821_v40, %v3783_v44 }
0x2614   :  { %3223 = vlog2.f32 %v2393_v11  ;;  %v3214_v12 = vpop.eup %3213 }
0x2615   :  { %v3216_v18 = vpop.eup %3215  ;;  %v2396_v56 = vadd.f32 1.0, %v3214_v12 }
0x2616   :  { %v2395_v24 = vadd.f32 1.0, %v3216_v18 }
0x2617   :  { %3225 = vlog2.f32 %v2396_v56 }
0x2618   :  { %3227 = vlog2.f32 %v2395_v24 }
0x2619   :  { %v3218_v25 = vpop.eup %3217 }
0x261a   :  { %v2402_v15 = vmul.f32 0.6931472, %v3218_v25 }
0x261b   :  { %v3220_v28 = vpop.eup %3219 }
0x261c   :  { %v2416_v29 = vadd.f32 %v2402_v15, %v2352_v63  ;;  %v2400_v33 = vmul.f32 0.6931472, %v3220_v28 }
0x261d   :  { %v3222_v41 = vpop.eup %3221 }
0x261e   :  { %v3224_v37 = vpop.eup %3223  ;;  %v2446_v46 = vmul.f32 %v3944_v27, %v2416_v29  ;;  %v2415_v39 = vadd.f32 %v2400_v33, %v2351_v31  ;;  %v2406_v16 = vmul.f32 0.6931472, %v3222_v41 }
0x261f   :  { %v2404_v22 = vmul.f32 0.6931472, %v3224_v37 }
0x2620   :  { %v2454_v21 = vadd.f32 %v2446_v46, %v2431_v36  ;;  %v2445_v49 = vmul.f32 %v3944_v27, %v2415_v39  ;;  %v2418_v50 = vadd.f32 %v2406_v16, %v2354_v42 }
0x2621   :  { %v2417_v51 = vadd.f32 %v2404_v22, %v2353_v45  ;;  %v3226_v53 = vpop.eup %3225 }
0x2622   :  { %2462 = vst [vmem:[#allocation17 + $0x8] sm:$0xff] %v2454_v21  ;;  %v2453_v32 = vadd.f32 %v2445_v49, %v2430_v47  ;;  %v2448_v54 = vmul.f32 %v3944_v27, %v2418_v50  ;;  %v3228_v58 = vpop.eup %3227  ;;  %v2410_v61 = vmul.f32 0.6931472, %v3226_v53 }
0x2623   :  { %v2447_v60 = vmul.f32 %v3944_v27, %v2417_v51  ;;  %v2408_v0 = vmul.f32 0.6931472, %v3228_v58 }
0x2624   :  { %2461 = vst [vmem:[#allocation17] sm:$0xff] %v2453_v32  ;;  %v2456_v52 = vadd.f32 %v2448_v54, %v2433_v48  ;;  %v2420_v35 = vadd.f32 %v2410_v61, %v2356_v34 }
0x2625   :  { %v2455_v1 = vadd.f32 %v2447_v60, %v2432_v59  ;;  %v2419_v38 = vadd.f32 %v2408_v0, %v2355_v62 }
0x2626   :  { %2464 = vst [vmem:[#allocation17 + $0x18] sm:$0xff] %v2456_v52  ;;  %v2450_v43 = vmul.f32 %v3944_v27, %v2420_v35 }
0x2627   :  { %2463 = vst [vmem:[#allocation17 + $0x10] sm:$0xff] %v2455_v1  ;;  %v2449_v3 = vmul.f32 %v3944_v27, %v2419_v38 }
0x2628   :  { %v2458_v6 = vadd.f32 %v2450_v43, %v2435_v20 }
0x2629   :  { %v2457_v7 = vadd.f32 %v2449_v3, %v2434_v17 }
0x262a   :  { %2466 = vst [vmem:[#allocation17 + $0x28] sm:$0xff] %v2458_v6 }
0x262b   :  { %2465 = vst [vmem:[#allocation17 + $0x20] sm:$0xff] %v2457_v7 }
0x2681   :  { %v2070_v8 = vpop.permute.xlu0 %2069 }
0x2682   :  { %v2072_v9 = vmul.f32 %v2070_v8, %v3933_v5 }
0x2684   :  { %2074 = vrot.lane.b32.xlu1 %v2072_v9, %s3423_s27 }
0x26f6   :  { %v2075_v55 = vpop.permute.xlu1 %2074 }
0x26f7   :  { %v2077_v11 = vadd.f32 %v2075_v55, %v2067_v10 }
0x26f9   :  { %3229 = vtanh.f32 %v2077_v11 }
0x2703   :  { %v3230_v12 = vpop.eup %3229 }
0x2704   :  { %2080 = vrot.lane.b32.xlu0 %v3230_v12, %s3422_s5 }
0x2776   :  { %v2081_v57 = vpop.permute.xlu0 %2080 }
0x2777   :  { %v2083_v13 = vmul.f32 %v2081_v57, %v3933_v5 }
0x2779   :  { %2085 = vrot.lane.b32.xlu1 %v2083_v13, %s3423_s27 }
0x27eb   :  { %v2086_v14 = vpop.permute.xlu1 %2085 }
0x27ec   :  { %2088 = vst.msk [vmem:[#allocation3 + $0x30] sm:$0xff] %vm122_vm0, %v2086_v14  ;;  %2906 = vmatmul.mubr.msk.f32.vlgmr.msra.gmra.mrb[22].mxu0 %vm122_vm0, %v2086_v14 }
0x27f3   :  { %v2209_v18 = vld [vmem:[#allocation3 + $0x30] sm:$0xff] }
0x27f4   :  { %2925 = vmatprep.mubr.msk.f32.mxu1 %vm122_vm0, %v2209_v18 }
0x28bf   :  { %v2162_v19 = vpop.f32.mrb[22].mxu0 }
0x28c0   :  { %v2166_v56 = vadd.f32 %v2162_v19, %v1313_v2  ;;  %v2907_v24 = vpop.f32.mrb[23].mxu0 }
0x28c2   :  { %v2530_v25 = vmul.f32 -1.442695, %v2166_v56 }
0x28c4   :  { %3231 = vpow2.f32 %v2530_v25 }
0x28c5   :  { %3233 = vtanh.f32 %v2166_v56 }
0x28ce   :  { %v3232_v63 = vpop.eup %3231 }
0x28cf   :  { %v2170_v5 = vadd.f32 1.0, %v3232_v63  ;;  %v3234_v15 = vpop.eup %3233 }
0x28d1   :  { %3235 = vrcp.f32 %v2170_v5 }
0x28db   :  { %v3236_v28 = vpop.eup %3235 }
0x28dc   :  { %v2174_v29 = vsel %vm3641_vm4, %v3234_v15, %v3236_v28 }
0x28dd   :  { %2177 = vrot.lane.b32.xlu0 %v2174_v29, %s3422_s5  ;;  %v2175_v44 = vmul.f32 %v2174_v29, %v2077_v11 }
0x294f   :  { %v2178_v31 = vpop.permute.xlu0 %2177 }
0x2950   :  { %v2180_v33 = vmul.f32 %v2178_v31, %v2174_v29 }
0x2952   :  { %2182 = vrot.lane.b32.xlu1 %v2180_v33, %s3423_s27 }
0x29c4   :  { %v2183_v40 = vpop.permute.xlu1 %2182 }
0x29c5   :  { %v2185_v41 = vadd.f32 %v2183_v40, %v2175_v44 }
0x29c7   :  { %3237 = vtanh.f32 %v2185_v41 }
0x29d1   :  { %v3238_v36 = vpop.eup %3237 }
0x29d2   :  { %2188 = vrot.lane.b32.xlu0 %v3238_v36, %s3422_s5 }
0x29d6   :  { %1164 = vrot.lane.b32.xlu0 %v3803_v23, %s3424_s9 }
0x2a44   :  { %v2189_v37 = vpop.permute.xlu0 %2188 }
0x2a45   :  { %v2191_v46 = vmul.f32 %v2189_v37, %v2174_v29 }
0x2a47   :  { %2193 = vrot.lane.b32.xlu1 %v2191_v46, %s3423_s27 }
0x2a48   :  { %v1165_v4 = vpop.permute.xlu0 %1164 }
0x2a49   :  { %1167 = vst.msk [vmem:[#allocation5] sm:$0xff] %vm122_vm0, %v1165_v4 }
0x2a4b   :  { %2199 = vrot.lane.b32.xlu1 %v2185_v41, %s3424_s9 }
0x2ab9   :  { %v2194_v39 = vpop.permute.xlu1 %2193 }
0x2aba   :  { %2196 = vst.msk [vmem:[#allocation3 + $0x38] sm:$0xff] %vm122_vm0, %v2194_v39  ;;  %2197 = vst.msk [vmem:[#allocation4 + $0x8] sm:$0xff] %vm122_vm0, %v2194_v39 }
0x2abd   :  { %v2200_v42 = vpop.permute.xlu1 %2199 }
0x2abe   :  { %2202 = vst.msk [vmem:[#allocation5 + $0x8] sm:$0xff] %vm122_vm0, %v2200_v42 }
0x2ac1   :  { %v2210_v16 = vld [vmem:[#allocation3 + $0x38] sm:$0xff] }
0x2ac2   :  { %2926 = vmatmul.mubr.msk.f32.gmra.mrb[30].mxu1 %vm122_vm0, %v2210_v16 }
0x2b95   :  { %v2927_v23 = vpop.f32.mrb[30].mxu1 }
0x2b96   :  { %v2348_v45 = vadd.f32 %v2927_v23, %v3905_v30  ;;  %v2342_v22 = vpop.f32.mrb[31].mxu1 }
0x2b97   :  { %v2343_v21 = vadd.f32 %v3905_v30, %v2342_v22 }
0x2b98   :  { %v2366_v47 = vand.u32 2147483647, %v2348_v45  ;;  %v2358_v61 = vmax.f32 %v2348_v45, 0.0  ;;  %v2437_v35 = vmul.f32 %v3941_v26, %v2348_v45 }
0x2b99   :  { %v2365_v49 = vand.u32 2147483647, %v2343_v21  ;;  %v2357_v62 = vmax.f32 %v2343_v21, 0.0  ;;  %v2436_v20 = vmul.f32 %v3941_v26, %v2343_v21 }
0x2b9a   :  { %v2374_v50 = vsub.f32 0.0, %v2366_v47 }
0x2b9b   :  { %v2373_v51 = vsub.f32 0.0, %v2365_v49 }
0x2b9c   :  { %v2389_v53 = vmul.f32 1.442695, %v2374_v50 }
0x2b9d   :  { %v2387_v32 = vmul.f32 1.442695, %v2373_v51 }
0x2b9e   :  { %3239 = vpow2.f32 %v2389_v53 }
0x2b9f   :  { %3241 = vpow2.f32 %v2387_v32 }
0x2ba8   :  { %v3240_v48 = vpop.eup %3239 }
0x2ba9   :  { %v3242_v54 = vpop.eup %3241  ;;  %v2398_v58 = vadd.f32 1.0, %v3240_v48 }
0x2baa   :  { %v2397_v59 = vadd.f32 1.0, %v3242_v54 }
0x2bab   :  { %3243 = vlog2.f32 %v2398_v58 }
0x2bac   :  { %3245 = vlog2.f32 %v2397_v59 }
0x2bb5   :  { %v3244_v60 = vpop.eup %3243 }
0x2bb6   :  { %v3246_v34 = vpop.eup %3245  ;;  %v2414_v52 = vmul.f32 0.6931472, %v3244_v60 }
0x2bb7   :  { %v2412_v30 = vmul.f32 0.6931472, %v3246_v34 }
0x2bb8   :  { %v2422_v0 = vadd.f32 %v2414_v52, %v2358_v61 }
0x2bb9   :  { %v2421_v1 = vadd.f32 %v2412_v30, %v2357_v62 }
0x2bba   :  { %v2452_v38 = vmul.f32 %v3944_v27, %v2422_v0 }
0x2bbb   :  { %v2451_v43 = vmul.f32 %v3944_v27, %v2421_v1 }
0x2bbc   :  { %v2460_v17 = vadd.f32 %v2452_v38, %v2437_v35 }
0x2bbd   :  { %v2459_v3 = vadd.f32 %v2451_v43, %v2436_v20 }
0x2bbe   :  { %2468 = vst [vmem:[#allocation17 + $0x38] sm:$0xff] %v2460_v17 }
0x2bbf   :  { %2467 = vst [vmem:[#allocation17 + $0x30] sm:$0xff] %v2459_v3 }
0x2bc0   :  { %3390 = shalt.err (!%p3387_p10)
}
0x2bc1   :  { %s3391_s22 = scalar_lea.hbm %s4024_s10, 1024 }
0x2bc2   :  { %p3392_p11 = scmp.ne.s32.totalorder %s4024_s10, %s3391_s22  ;;  %p3395_p12 = scmp.lt.u32.totalorder %s3391_s22, %s4024_s10 }
0x2bc4   :  { %p3397_p13 = pnand %p3395_p12, %p3392_p11 }
0x2bc6   :  { %3400 = shalt.err (!%p3397_p13)
}
0x2bc7   :  { %2480 = dma.vmem_to_hbm [thread:$0]  %s2475_s16, 1024, %s4024_s10, [#allocation8], %s3413_s25, %s3413_s25, %s3414_s26  }
0x2bc8   :  { %3409 = dma.done.wait [#allocation8], 1024  }
0x2bc9   :  { %3410 = vsyncadd [#allocation8], 4294966272 }
0x2bca   :  { %2484 = vsyncpa [#allocation7], 1 }
0x2bcb   :  { %2485 = vsyncpa [#allocation10], 1 }
0x2bcc   :  { %2486 = vsyncpa [#allocation13], 1 }
0x2bcd   :  { %2487 = vsyncpa [#allocation16], 1 }
0x2bce   :  { %2488 = vsyncpa [#allocation8], 1 }

// kernel: tpu_custom_call.1
= control target key start
LH: loop header
LB: loop body
LE: loop exit
PB: predicated region body
PF: predicated region fallthrough
CT: control target
= control target key end

     0   :  { %15 = vsyncpa [#allocation7], 0  ;;  %s4014_s0 = inlined_call_operand.hbm [shape: f32[8,8,128], index: 0, kind: input, shape index: {}]   ;;  %s4015_s1 = inlined_call_operand.hbm [shape: f32[128,128], index: 1, kind: input, shape index: {}]   ;;  %s4016_s2 = inlined_call_operand.hbm [shape: f32[32,128], index: 2, kind: input, shape index: {}]   ;;  %s4017_s3 = inlined_call_operand.hbm [shape: f32[32,128], index: 3, kind: input, shape index: {}]   ;;  %s4018_s4 = inlined_call_operand.hbm [shape: f32[32,128], index: 4, kind: input, shape index: {}]   ;;  %s4019_s5 = inlined_call_operand.vmem [shape: f32[1,128], index: 5, kind: input, shape index: {}]   ;;  %s4020_s6 = inlined_call_operand.vmem [shape: f32[1,128], index: 6, kind: input, shape index: {}]   ;;  %s4021_s7 = inlined_call_operand.hbm [shape: f32[32,128], index: 7, kind: input, shape index: {}]   ;;  %s4022_s8 = inlined_call_operand.vmem [shape: f32[1,128], index: 8, kind: input, shape index: {}]   ;;  %s4023_s9 = inlined_call_operand.vmem [shape: f32[1,128], index: 9, kind: input, shape index: {}]   ;;  %s4024_s10 = inlined_call_operand.hbm [shape: f32[8,8,128], index: 10, kind: output, shape index: {}]  }
   0x1   :  { %16 = vsyncpa [#allocation10], 0 }
   0x2   :  { %17 = vsyncpa [#allocation13], 0 }
   0x3   :  { %18 = vsyncpa [#allocation16], 0 }
   0x4   :  { %19 = vsyncpa [#allocation8], 0  ;;  %s3411_s13 = smov [#allocation9]   ;;  %s3412_s15 = smov [#allocation12]  }
   0x5   :  { %s37_s14 = sshll.u32 %s3411_s13, 4  ;;  %s61_s16 = sshll.u32 %s3412_s15, 4  ;;  %s38_s14 = int_to_ptr.vmem [resolvable:$true] %s37_s14  ;;  %s3481_s16 = int_to_ptr.vmem [resolvable:$true] %s61_s16 }
   0x6   :  { %s3247_s19 = scalar_lea.hbm %s4015_s1, 2048 }
   0x7   :  { %p3248_p0 = scmp.ne.s32.totalorder %s4015_s1, %s3247_s19  ;;  %p3251_p1 = scmp.lt.u32.totalorder %s3247_s19, %s4015_s1 }
   0x9   :  { %p3253_p2 = pnand %p3251_p1, %p3248_p0 }
   0xb   :  { %3256 = shalt.err (!%p3253_p2)
}
   0xc   :  { %s3257_s24 = scalar_lea.vmem %s38_s14, 2048  ;;  %p3262_p4 = scmp.lt.s32.totalorder %s38_s14, %s38_s14 }
   0xd   :  { %p3258_p3 = scmp.ne.s32.totalorder %s38_s14, %s3257_s24  ;;  %p3263_p5 = scmp.lt.s32.totalorder %s3257_s24, %s3257_s24 }
   0xf   :  { %p3264_p6 = por %p3263_p5, %p3262_p4 }
  0x11   :  { %p3265_p7 = pnand %p3264_p6, %p3258_p3 }
  0x13   :  { %3268 = shalt.err (!%p3265_p7)
}
  0x14   :  { %s3413_s25 = smov 128   ;;  %s3414_s26 = smov 8  }
  0x15   :  { %43 = dma.hbm_to_vmem [thread:$0]  %s4015_s1, 2048, %s38_s14, [#allocation10], %s3413_s25, %s3413_s25, %s3414_s26  }
  0x16   :  { %s3269_s11 = scalar_lea.hbm %s4017_s3, 512 }
  0x17   :  { %p3270_p8 = scmp.ne.s32.totalorder %s4017_s3, %s3269_s11  ;;  %p3273_p9 = scmp.lt.u32.totalorder %s3269_s11, %s4017_s3 }
  0x19   :  { %p3275_p10 = pnand %p3273_p9, %p3270_p8 }
  0x1b   :  { %3278 = shalt.err (!%p3275_p10)
}
  0x1c   :  { %s3279_s18 = scalar_lea.vmem %s3481_s16, 512  ;;  %p3284_p12 = scmp.lt.s32.totalorder %s3481_s16, %s3481_s16 }
  0x1d   :  { %p3280_p11 = scmp.ne.s32.totalorder %s3481_s16, %s3279_s18  ;;  %p3285_p13 = scmp.lt.s32.totalorder %s3279_s18, %s3279_s18 }
  0x1f   :  { %p3286_p0 = por %p3285_p13, %p3284_p12 }
  0x21   :  { %p3287_p1 = pnand %p3286_p0, %p3280_p11 }
  0x23   :  { %3290 = shalt.err (!%p3287_p1)
}
  0x24   :  { %67 = dma.hbm_to_vmem [thread:$0]  %s4017_s3, 512, %s3481_s16, [#allocation13], %s3413_s25, %s3413_s25, %s3414_s26  }
  0x25   :  { %s3415_s19 = smov [#allocation6]   ;;  %s3416_s21 = smov [#allocation11]  }
  0x26   :  { %s25_s20 = sshll.u32 %s3415_s19, 4  ;;  %s49_s22 = sshll.u32 %s3416_s21, 4  ;;  %s26_s20 = int_to_ptr.vmem [resolvable:$true] %s25_s20  ;;  %s3518_s22 = int_to_ptr.vmem [resolvable:$true] %s49_s22 }
  0x27   :  { %s3291_s27 = scalar_lea.hbm %s4014_s0, 1024 }
  0x28   :  { %p3292_p2 = scmp.ne.s32.totalorder %s4014_s0, %s3291_s27  ;;  %p3295_p3 = scmp.lt.u32.totalorder %s3291_s27, %s4014_s0 }
  0x2a   :  { %p3297_p4 = pnand %p3295_p3, %p3292_p2 }
  0x2c   :  { %3300 = shalt.err (!%p3297_p4)
}
  0x2d   :  { %s3301_s3 = scalar_lea.vmem %s26_s20, 1024  ;;  %p3306_p6 = scmp.lt.s32.totalorder %s26_s20, %s26_s20 }
  0x2e   :  { %p3302_p5 = scmp.ne.s32.totalorder %s26_s20, %s3301_s3  ;;  %p3307_p7 = scmp.lt.s32.totalorder %s3301_s3, %s3301_s3 }
  0x30   :  { %p3308_p8 = por %p3307_p7, %p3306_p6 }
  0x32   :  { %p3309_p9 = pnand %p3308_p8, %p3302_p5 }
  0x34   :  { %3312 = shalt.err (!%p3309_p9)
}
  0x35   :  { %31 = dma.hbm_to_vmem [thread:$0]  %s4014_s0, 1024, %s26_s20, [#allocation7], %s3413_s25, %s3413_s25, %s3414_s26  }
  0x36   :  { %s3313_s17 = scalar_lea.hbm %s4016_s2, 512 }
  0x37   :  { %p3314_p10 = scmp.ne.s32.totalorder %s4016_s2, %s3313_s17  ;;  %p3317_p11 = scmp.lt.u32.totalorder %s3313_s17, %s4016_s2 }
  0x39   :  { %p3319_p12 = pnand %p3317_p11, %p3314_p10 }
  0x3b   :  { %3322 = shalt.err (!%p3319_p12)
}
  0x3c   :  { %s3323_s21 = scalar_lea.vmem %s3518_s22, 512  ;;  %p3328_p0 = scmp.lt.s32.totalorder %s3518_s22, %s3518_s22 }
  0x3d   :  { %p3324_p13 = scmp.ne.s32.totalorder %s3518_s22, %s3323_s21  ;;  %p3329_p1 = scmp.lt.s32.totalorder %s3323_s21, %s3323_s21 }
  0x3f   :  { %p3330_p2 = por %p3329_p1, %p3328_p0 }
  0x41   :  { %p3331_p3 = pnand %p3330_p2, %p3324_p13 }
  0x43   :  { %3334 = shalt.err (!%p3331_p3)
}
  0x44   :  { %55 = dma.hbm_to_vmem [thread:$0]  %s4016_s2, 512, %s3518_s22, [#allocation10], %s3413_s25, %s3413_s25, %s3414_s26  }
  0x45   :  { %s3417_s23 = smov [#allocation14]   ;;  %s3418_s27 = smov [#allocation15]  }
  0x46   :  { %s73_s24 = sshll.u32 %s3417_s23, 4  ;;  %s89_s28 = sshll.u32 %s3418_s27, 4  ;;  %s74_s24 = int_to_ptr.vmem [resolvable:$true] %s73_s24  ;;  %s3555_s28 = int_to_ptr.vmem [resolvable:$true] %s89_s28 }
  0x47   :  { %s3335_s11 = scalar_lea.hbm %s4018_s4, 512 }
  0x48   :  { %p3336_p4 = scmp.ne.s32.totalorder %s4018_s4, %s3335_s11  ;;  %p3339_p5 = scmp.lt.u32.totalorder %s3335_s11, %s4018_s4 }
  0x4a   :  { %p3341_p6 = pnand %p3339_p5, %p3336_p4 }
  0x4c   :  { %3344 = shalt.err (!%p3341_p6)
}
  0x4d   :  { %s3345_s2 = scalar_lea.vmem %s74_s24, 512  ;;  %p3350_p8 = scmp.lt.s32.totalorder %s74_s24, %s74_s24 }
  0x4e   :  { %p3346_p7 = scmp.ne.s32.totalorder %s74_s24, %s3345_s2  ;;  %p3351_p9 = scmp.lt.s32.totalorder %s3345_s2, %s3345_s2 }
  0x50   :  { %p3352_p10 = por %p3351_p9, %p3350_p8 }
  0x52   :  { %p3353_p11 = pnand %p3352_p10, %p3346_p7 }
  0x54   :  { %3356 = shalt.err (!%p3353_p11)
}
  0x55   :  { %79 = dma.hbm_to_vmem [thread:$0]  %s4018_s4, 512, %s74_s24, [#allocation13], %s3413_s25, %s3413_s25, %s3414_s26  }
  0x56   :  { %s3357_s1 = scalar_lea.hbm %s4021_s7, 512 }
  0x57   :  { %p3358_p12 = scmp.ne.s32.totalorder %s4021_s7, %s3357_s1  ;;  %p3361_p13 = scmp.lt.u32.totalorder %s3357_s1, %s4021_s7 }
  0x59   :  { %p3363_p0 = pnand %p3361_p13, %p3358_p12 }
  0x5b   :  { %3366 = shalt.err (!%p3363_p0)
}
  0x5c   :  { %s3367_s20 = scalar_lea.vmem %s3555_s28, 512  ;;  %p3372_p2 = scmp.lt.s32.totalorder %s3555_s28, %s3555_s28 }
  0x5d   :  { %p3368_p1 = scmp.ne.s32.totalorder %s3555_s28, %s3367_s20  ;;  %p3373_p3 = scmp.lt.s32.totalorder %s3367_s20, %s3367_s20 }
  0x5f   :  { %p3374_p4 = por %p3373_p3, %p3372_p2 }
  0x61   :  { %p3375_p5 = pnand %p3374_p4, %p3368_p1 }
  0x63   :  { %3378 = shalt.err (!%p3375_p5)
}
  0x64   :  { %95 = dma.hbm_to_vmem [thread:$0]  %s4021_s7, 512, %s3555_s28, [#allocation16], %s3413_s25, %s3413_s25, %s3414_s26  }
  0x65   :  { %3401 = dma.done.wait [#allocation7], 1024  }
  0x66   :  { %3402 = vsyncadd [#allocation7], 4294966272 }
  0x67   :  { %3403 = dma.done.wait [#allocation10], 2560  }
  0x68   :  { %3404 = vsyncadd [#allocation10], 4294964736 }
  0x69   :  { %3405 = dma.done.wait [#allocation13], 1024  }
  0x6a   :  { %3406 = vsyncadd [#allocation13], 4294966272 }
  0x6b   :  { %3407 = dma.done.wait [#allocation16], 512  }
  0x6c   :  { %3408 = vsyncadd [#allocation16], 4294966784  ;;  %vm122_vm0 = vcmask 261120   ;;  %v3419_v0 = vmov 0.0   ;;  %v3420_v1 = vmov 0.0|0.0   ;;  %vm3421_vm1 = vmmov 0  }
  0x6d   :  { %123 = vst.msk [vmem:[#allocation4] sm:$0xff] %vm122_vm0, %v3419_v0  ;;  %124 = vst.msk [vmem:[#allocation4 + $0x8] sm:$0xff] %vm122_vm0, %v3419_v0  ;;  %2966 = vmatprep.subr.bf16.mxu1 %v3420_v1  ;;  %2731 = vmatprep.mubr.msk.f32.mxu1 %vm3421_vm1, %v3419_v0  ;;  %v140_v2 = vld [vmem:[#allocation9] sm:$0xff]  ;;  %v141_v3 = vld [vmem:[#allocation9 + $0x8] sm:$0xff]  ;;  %v127_v63 = vlaneseq  ;;  %s3423_s27 = smov 32   ;;  %s3425_s3 = smov [#allocation17]  }
  0x6e   :  { %125 = vst.msk [vmem:[#allocation5] sm:$0xff] %vm122_vm0, %v3419_v0  ;;  %126 = vst.msk [vmem:[#allocation5 + $0x8] sm:$0xff] %vm122_vm0, %v3419_v0  ;;  %v142_v4 = vld [vmem:[#allocation9 + $0x10] sm:$0xff]  ;;  %v2928_v5 = vpack.c.bf16 %v141_v3, %v140_v2  ;;  %v143_v6 = vld [vmem:[#allocation9 + $0x18] sm:$0xff]  ;;  %s2474_s16 = sshll.u32 %s3425_s3, 4  ;;  %s2475_s16 = int_to_ptr.vmem [resolvable:$true] %s2474_s16 }
  0x6f   :  { %v2932_v7 = vpack.c.bf16 %v143_v6, %v142_v4  ;;  %v144_v8 = vld [vmem:[#allocation9 + $0x20] sm:$0xff]  ;;  %v145_v9 = vld [vmem:[#allocation9 + $0x28] sm:$0xff]  ;;  %v146_v11 = vld [vmem:[#allocation9 + $0x30] sm:$0xff]  ;;  %v128_v3 = vand.u32 127, %v127_v63  ;;  %s3379_s12 = scalar_lea.vmem %s2475_s16, 1024  ;;  %p3384_p7 = scmp.lt.s32.totalorder %s2475_s16, %s2475_s16 }
  0x70   :  { %2929 = vmatprep.subr.bf16.mxu0 %v2928_v5  ;;  %v2936_v10 = vpack.c.bf16 %v145_v9, %v144_v8  ;;  %v132_v12 = vld [vmem:[#allocation6] sm:$0xff]  ;;  %v147_v13 = vld [vmem:[#allocation9 + $0x38] sm:$0xff]  ;;  %v280_v15 = vld [vmem:[#allocation12 + $0x8] sm:$0xff]  ;;  %p3380_p6 = scmp.ne.s32.totalorder %s2475_s16, %s3379_s12  ;;  %p3385_p8 = scmp.lt.s32.totalorder %s3379_s12, %s3379_s12 }
  0x71   :  { %2931 = vmatpush3.bf16.msra.mxu0 %v2928_v5  ;;  %2700 = vmatprep.mubr.f32.mxu0 %v132_v12  ;;  %v279_v14 = vld [vmem:[#allocation12] sm:$0xff]  ;;  %v281_v17 = vld [vmem:[#allocation12 + $0x10] sm:$0xff]  ;;  %v282_v18 = vld [vmem:[#allocation12 + $0x18] sm:$0xff]  ;;  %v2940_v19 = vpack.c.bf16 %v147_v13, %v146_v11  ;;  %vm129_vm2 = vcmp.ge.s32.totalorder %v128_v3, 64  ;;  %vm130_vm3 = vcmp.lt.s32.totalorder %v128_v3, 96 }
  0x72   :  { %2933 = vmatprep.subr.bf16.mxu0 %v2932_v7  ;;  %v3603_v16 = vpack.c.bf16 %v280_v15, %v279_v14  ;;  %v148_v20 = vld [vmem:[#allocation9 + $0x40] sm:$0xff]  ;;  %v149_v21 = vld [vmem:[#allocation9 + $0x48] sm:$0xff]  ;;  %v3607_v22 = vpack.c.bf16 %v282_v18, %v281_v17  ;;  %v150_v24 = vld [vmem:[#allocation9 + $0x50] sm:$0xff]  ;;  %p3386_p9 = por %p3385_p8, %p3384_p7 }
  0x73   :  { %v2944_v23 = vpack.c.bf16 %v149_v21, %v148_v20  ;;  %v151_v25 = vld [vmem:[#allocation9 + $0x58] sm:$0xff]  ;;  %v152_v27 = vld [vmem:[#allocation9 + $0x60] sm:$0xff]  ;;  %v153_v28 = vld [vmem:[#allocation9 + $0x68] sm:$0xff] }
  0x74   :  { %2968 = vmatpush3.bf16.msra.mxu1 %v3603_v16  ;;  %v2948_v26 = vpack.c.bf16 %v151_v25, %v150_v24  ;;  %v2952_v29 = vpack.c.bf16 %v153_v28, %v152_v27  ;;  %v154_v30 = vld [vmem:[#allocation9 + $0x70] sm:$0xff]  ;;  %v155_v31 = vld [vmem:[#allocation9 + $0x78] sm:$0xff]  ;;  %v133_v33 = vld [vmem:[#allocation6 + $0x8] sm:$0xff]  ;;  %p3387_p10 = pnand %p3386_p9, %p3380_p6 }
  0x75   :  { %2935 = vmatpush3.bf16.msra.mxu0 %v2932_v7  ;;  %2969 = vmatprep.subr.bf16.mxu1 %v3420_v1  ;;  %v2956_v32 = vpack.c.bf16 %v155_v31, %v154_v30  ;;  %v134_v34 = vld [vmem:[#allocation6 + $0x10] sm:$0xff]  ;;  %v135_v35 = vld [vmem:[#allocation6 + $0x18] sm:$0xff]  ;;  %v136_v36 = vld [vmem:[#allocation6 + $0x20] sm:$0xff] }
  0x76   :  { %2937 = vmatprep.subr.bf16.mxu0 %v2936_v10  ;;  %v137_v37 = vld [vmem:[#allocation6 + $0x28] sm:$0xff]  ;;  %v138_v38 = vld [vmem:[#allocation6 + $0x30] sm:$0xff]  ;;  %v139_v39 = vld [vmem:[#allocation6 + $0x38] sm:$0xff] }
  0x77   :  { %v276_v40 = vld [vmem:[#allocation4] sm:$0xff]  ;;  %vm3641_vm4 = vmand %vm129_vm2, %vm130_vm3  ;;  %v277_v8 = vld [vmem:[#allocation5] sm:$0xff] }
  0x78   :  { %2971 = vmatpush3.bf16.msra.mxu1 %v3607_v22  ;;  %v2489_v41 = vld [vmem:[%s4019_s5] ss:$0 sm:$0xff]  ;;  %s3422_s5 = smov 64  }
  0x79   :  { %2939 = vmatpush3.bf16.msra.mxu0 %v2936_v10  ;;  %2972 = vmatprep.subr.bf16.mxu1 %v3420_v1 }
  0x7a   :  { %2941 = vmatprep.subr.bf16.mxu0 %v2940_v19 }
  0x7d   :  { %2943 = vmatpush3.bf16.msra.mxu0 %v2940_v19 }
  0x7e   :  { %2945 = vmatprep.subr.bf16.mxu0 %v2944_v23 }
  0x81   :  { %2947 = vmatpush3.bf16.msra.mxu0 %v2944_v23 }
  0x82   :  { %2949 = vmatprep.subr.bf16.mxu0 %v2948_v26 }
  0x85   :  { %2951 = vmatpush3.bf16.msra.mxu0 %v2948_v26 }
  0x86   :  { %2953 = vmatprep.subr.bf16.mxu0 %v2952_v29 }
  0x89   :  { %2955 = vmatpush3.bf16.msra.mxu0 %v2952_v29 }
  0x8a   :  { %2957 = vmatprep.subr.bf16.mxu0 %v2956_v32 }
  0x8d   :  { %2959 = vmatpush3.bf16.msra.mxu0 %v2956_v32 }
  0x8e   :  { %2960 = vmatprep.subr.bf16.mxu0 %v3420_v1 }
  0x90   :  { %2701 = vmatmul.mubr.f32.vlgmr.msra.gmra.mrb[0].mxu0 %v133_v33 }
  0x91   :  { %2962 = vmatpush3.bf16.msra.mxu0 %v3603_v16  ;;  %2703 = vmatprep.mubr.f32.mxu0 %v134_v34 }
  0x92   :  { %2963 = vmatprep.subr.bf16.mxu0 %v3420_v1 }
  0x94   :  { %2704 = vmatmul.mubr.f32.gmra.mrb[2].mxu0 %v135_v35 }
  0x95   :  { %2706 = vmatprep.mubr.f32.mxu0 %v136_v36  ;;  %2965 = vmatpush3.bf16.msra.mxu0 %v3607_v22 }
  0x96   :  { %2990 = vmatprep.subr.bf16.mxu0 %v3420_v1 }
  0x98   :  { %2707 = vmatmul.mubr.f32.gmra.mrb[4].mxu0 %v137_v37 }
  0x99   :  { %2709 = vmatprep.mubr.f32.mxu0 %v138_v38 }
  0x9c   :  { %2710 = vmatmul.mubr.f32.gmra.mrb[6].mxu0 %v139_v39 }
  0x9d   :  { %2720 = vmatprep.mubr.msk.f32.mxu0 %vm3421_vm1, %v3419_v0 }
  0xa0   :  { %2721 = vmatmul.mubr.msk.f32.vlgmr.msra.gmra.mrb[8].mxu0 %vm122_vm0, %v276_v40 }
  0xa1   :  { %2992 = vmatpush3.bf16.msra.mxu0 %v3603_v16  ;;  %2775 = vmatprep.mubr.msk.f32.mxu0 %vm3421_vm1, %v3419_v0 }
  0xa2   :  { %2993 = vmatprep.subr.bf16.mxu0 %v3420_v1 }
  0xa5   :  { %2995 = vmatpush3.bf16.msra.mxu0 %v3607_v22 }
  0xa6   :  { %3002 = vmatprep.subr.bf16.mxu0 %v3420_v1 }
 0x163   :  { %v2702_v42 = vpop.f32.mrb[0].mxu0 }
 0x164   :  { %v235_v43 = vadd.f32 %v2702_v42, %v2489_v41  ;;  %v229_v44 = vpop.f32.mrb[1].mxu0 }
 0x165   :  { %v230_v57 = vadd.f32 %v2489_v41, %v229_v44 }
 0x167   :  { %v2705_v45 = vpop.f32.mrb[2].mxu0 }
 0x168   :  { %v3628_v46 = vadd.f32 %v2705_v45, %v2489_v41  ;;  %v239_v47 = vpop.f32.mrb[3].mxu0 }
 0x169   :  { %v3630_v48 = vadd.f32 %v2489_v41, %v239_v47 }
 0x16b   :  { %v2708_v49 = vpop.f32.mrb[4].mxu0 }
 0x16c   :  { %v3632_v50 = vadd.f32 %v2708_v49, %v2489_v41  ;;  %v249_v51 = vpop.f32.mrb[5].mxu0 }
 0x16d   :  { %v3634_v52 = vadd.f32 %v2489_v41, %v249_v51 }
 0x16f   :  { %v2711_v53 = vpop.f32.mrb[6].mxu0 }
 0x170   :  { %v3636_v54 = vadd.f32 %v2711_v53, %v2489_v41  ;;  %v259_v55 = vpop.f32.mrb[7].mxu0 }
 0x171   :  { %v3638_v56 = vadd.f32 %v2489_v41, %v259_v55 }
 0x173   :  { %v353_v58 = vpop.f32.mrb[8].mxu0 }
 0x174   :  { %v357_v59 = vadd.f32 %v353_v58, %v230_v57  ;;  %v2722_v60 = vpop.f32.mrb[9].mxu0 }
 0x176   :  { %v2491_v61 = vmul.f32 -1.442695, %v357_v59 }
 0x178   :  { %3087 = vpow2.f32 %v2491_v61 }
 0x179   :  { %3089 = vtanh.f32 %v357_v59 }
 0x182   :  { %v3088_v62 = vpop.eup %3087 }
 0x183   :  { %v361_v2 = vadd.f32 1.0, %v3088_v62  ;;  %v3090_v5 = vpop.eup %3089 }
 0x185   :  { %3091 = vrcp.f32 %v361_v2 }
 0x18f   :  { %v3092_v6 = vpop.eup %3091 }
 0x190   :  { %v365_v7 = vsel %vm3641_vm4, %v3090_v5, %v3092_v6 }
 0x191   :  { %372 = vrot.lane.b32.xlu0 %v365_v7, %s3422_s5 }
 0x195   :  { %367 = vrot.lane.b32.xlu0 %v277_v8, %s3423_s27 }
 0x203   :  { %v373_v9 = vpop.permute.xlu0 %372 }
 0x204   :  { %v375_v10 = vmul.f32 %v373_v9, %v365_v7 }
 0x206   :  { %377 = vrot.lane.b32.xlu1 %v375_v10, %s3423_s27 }
 0x207   :  { %v368_v11 = vpop.permute.xlu0 %367 }
 0x208   :  { %v370_v12 = vmul.f32 %v368_v11, %v365_v7 }
 0x278   :  { %v378_v13 = vpop.permute.xlu1 %377 }
 0x279   :  { %v380_v14 = vadd.f32 %v378_v13, %v370_v12 }
 0x27b   :  { %3093 = vtanh.f32 %v380_v14 }
 0x285   :  { %v3094_v15 = vpop.eup %3093 }
 0x286   :  { %383 = vrot.lane.b32.xlu1 %v3094_v15, %s3422_s5 }
 0x2f8   :  { %v384_v17 = vpop.permute.xlu1 %383 }
 0x2f9   :  { %v386_v18 = vmul.f32 %v384_v17, %v365_v7 }
 0x2fb   :  { %388 = vrot.lane.b32.xlu0 %v386_v18, %s3423_s27 }
 0x36d   :  { %v389_v19 = vpop.permute.xlu0 %388 }
 0x36e   :  { %391 = vst.msk [vmem:[#allocation3] sm:$0xff] %vm122_vm0, %v389_v19  ;;  %2732 = vmatmul.mubr.msk.f32.vlgmr.msra.gmra.mrb[0].mxu1 %vm122_vm0, %v389_v19 }
 0x36f   :  { %2974 = vmatpush3.bf16.msra.mxu1 %v3603_v16  ;;  %2742 = vmatprep.mubr.msk.f32.mxu1 %vm3421_vm1, %v3419_v0 }
 0x370   :  { %2975 = vmatprep.subr.bf16.mxu1 %v3420_v1 }
 0x373   :  { %2977 = vmatpush3.bf16.msra.mxu1 %v3607_v22 }
 0x374   :  { %2978 = vmatprep.subr.bf16.mxu1 %v3420_v1 }
 0x441   :  { %v466_v20 = vpop.f32.mrb[0].mxu1 }
 0x442   :  { %v470_v21 = vadd.f32 %v466_v20, %v235_v43  ;;  %v2733_v23 = vpop.f32.mrb[1].mxu1 }
 0x444   :  { %v2493_v24 = vmul.f32 -1.442695, %v470_v21 }
 0x446   :  { %3095 = vpow2.f32 %v2493_v24 }
 0x447   :  { %3097 = vtanh.f32 %v470_v21 }
 0x450   :  { %v3096_v25 = vpop.eup %3095 }
 0x451   :  { %v474_v26 = vadd.f32 1.0, %v3096_v25  ;;  %v3098_v27 = vpop.eup %3097 }
 0x453   :  { %3099 = vrcp.f32 %v474_v26 }
 0x45d   :  { %v3100_v28 = vpop.eup %3099 }
 0x45e   :  { %v478_v29 = vsel %vm3641_vm4, %v3098_v27, %v3100_v28 }
 0x45f   :  { %481 = vrot.lane.b32.xlu1 %v478_v29, %s3422_s5  ;;  %v479_v32 = vmul.f32 %v478_v29, %v380_v14 }
 0x4d1   :  { %v482_v30 = vpop.permute.xlu1 %481 }
 0x4d2   :  { %v484_v31 = vmul.f32 %v482_v30, %v478_v29 }
 0x4d4   :  { %486 = vrot.lane.b32.xlu0 %v484_v31, %s3423_s27 }
 0x546   :  { %v487_v33 = vpop.permute.xlu0 %486 }
 0x547   :  { %v489_v34 = vadd.f32 %v487_v33, %v479_v32 }
 0x549   :  { %3101 = vtanh.f32 %v489_v34 }
 0x553   :  { %v3102_v35 = vpop.eup %3101 }
 0x554   :  { %492 = vrot.lane.b32.xlu1 %v3102_v35, %s3422_s5 }
 0x5c6   :  { %v493_v36 = vpop.permute.xlu1 %492 }
 0x5c7   :  { %v495_v37 = vmul.f32 %v493_v36, %v478_v29 }
 0x5c9   :  { %497 = vrot.lane.b32.xlu0 %v495_v37, %s3423_s27 }
 0x63b   :  { %v498_v38 = vpop.permute.xlu0 %497 }
 0x63c   :  { %501 = vst.msk [vmem:[#allocation3 + $0x8] sm:$0xff] %vm122_vm0, %v498_v38  ;;  %2743 = vmatmul.mubr.msk.f32.vlgmr.msra.gmra.mrb[2].mxu1 %vm122_vm0, %v498_v38 }
 0x63d   :  { %2980 = vmatpush3.bf16.msra.mxu1 %v3603_v16  ;;  %2753 = vmatprep.mubr.msk.f32.mxu1 %vm3421_vm1, %v3419_v0 }
 0x63e   :  { %2981 = vmatprep.subr.bf16.mxu1 %v3420_v1 }
 0x641   :  { %2983 = vmatpush3.bf16.msra.mxu1 %v3607_v22 }
 0x642   :  { %2984 = vmatprep.subr.bf16.mxu1 %v3420_v1 }
 0x70f   :  { %v576_v39 = vpop.f32.mrb[2].mxu1 }
 0x710   :  { %v580_v40 = vadd.f32 %v576_v39, %v3630_v48  ;;  %v2744_v41 = vpop.f32.mrb[3].mxu1 }
 0x712   :  { %v2495_v42 = vmul.f32 -1.442695, %v580_v40 }
 0x714   :  { %3103 = vpow2.f32 %v2495_v42 }
 0x715   :  { %3105 = vtanh.f32 %v580_v40 }
 0x71e   :  { %v3104_v43 = vpop.eup %3103 }
 0x71f   :  { %v584_v44 = vadd.f32 1.0, %v3104_v43  ;;  %v3106_v45 = vpop.eup %3105 }
 0x721   :  { %3107 = vrcp.f32 %v584_v44 }
 0x72b   :  { %v3108_v47 = vpop.eup %3107 }
 0x72c   :  { %v588_v49 = vsel %vm3641_vm4, %v3106_v45, %v3108_v47 }
 0x72d   :  { %591 = vrot.lane.b32.xlu1 %v588_v49, %s3422_s5  ;;  %v589_v55 = vmul.f32 %v588_v49, %v489_v34 }
 0x79f   :  { %v592_v51 = vpop.permute.xlu1 %591 }
 0x7a0   :  { %v594_v53 = vmul.f32 %v592_v51, %v588_v49 }
 0x7a2   :  { %596 = vrot.lane.b32.xlu0 %v594_v53, %s3423_s27  ;;  %v1176_v53 = vld [vmem:[#allocation11] sm:$0xff] }
 0x814   :  { %v597_v48 = vpop.permute.xlu0 %596 }
 0x815   :  { %v599_v57 = vadd.f32 %v597_v48, %v589_v55  ;;  %v1177_v55 = vld [vmem:[#allocation11 + $0x8] sm:$0xff] }
 0x816   :  { %v3008_v48 = vpack.c.bf16 %v1177_v55, %v1176_v53 }
 0x817   :  { %3109 = vtanh.f32 %v599_v57 }
 0x821   :  { %v3110_v58 = vpop.eup %3109 }
 0x822   :  { %602 = vrot.lane.b32.xlu1 %v3110_v58, %s3422_s5 }
 0x894   :  { %v603_v59 = vpop.permute.xlu1 %602 }
 0x895   :  { %v605_v60 = vmul.f32 %v603_v59, %v588_v49 }
 0x897   :  { %607 = vrot.lane.b32.xlu0 %v605_v60, %s3423_s27  ;;  %v1178_v60 = vld [vmem:[#allocation11 + $0x10] sm:$0xff] }
 0x909   :  { %v608_v61 = vpop.permute.xlu0 %607 }
 0x90a   :  { %611 = vst.msk [vmem:[#allocation3 + $0x10] sm:$0xff] %vm122_vm0, %v608_v61  ;;  %2754 = vmatmul.mubr.msk.f32.vlgmr.msra.gmra.mrb[4].mxu1 %vm122_vm0, %v608_v61  ;;  %v1179_v61 = vld [vmem:[#allocation11 + $0x18] sm:$0xff] }
 0x90b   :  { %2986 = vmatpush3.bf16.msra.mxu1 %v3603_v16  ;;  %2764 = vmatprep.mubr.msk.f32.mxu1 %vm3421_vm1, %v3419_v0 }
 0x90c   :  { %2987 = vmatprep.subr.bf16.mxu1 %v3420_v1 }
 0x90f   :  { %2989 = vmatpush3.bf16.msra.mxu1 %v3607_v22 }
 0x910   :  { %2996 = vmatprep.subr.bf16.mxu1 %v3420_v1 }
 0x9dd   :  { %v686_v62 = vpop.f32.mrb[4].mxu1 }
 0x9de   :  { %v690_v2 = vadd.f32 %v686_v62, %v3628_v46  ;;  %v2755_v3 = vpop.f32.mrb[5].mxu1  ;;  %v3012_v62 = vpack.c.bf16 %v1179_v61, %v1178_v60 }
 0x9df   :  { %v1168_v3 = vld [vmem:[#allocation3] sm:$0xff] }
 0x9e0   :  { %v2497_v5 = vmul.f32 -1.442695, %v690_v2 }
 0x9e2   :  { %3111 = vpow2.f32 %v2497_v5  ;;  %v1169_v5 = vld [vmem:[#allocation3 + $0x8] sm:$0xff] }
 0x9e3   :  { %3113 = vtanh.f32 %v690_v2 }
 0x9ec   :  { %v3112_v6 = vpop.eup %3111 }
 0x9ed   :  { %v694_v7 = vadd.f32 1.0, %v3112_v6  ;;  %v3114_v8 = vpop.eup %3113  ;;  %v1170_v6 = vld [vmem:[#allocation3 + $0x10] sm:$0xff] }
 0x9ef   :  { %3115 = vrcp.f32 %v694_v7 }
 0x9f9   :  { %v3116_v9 = vpop.eup %3115 }
 0x9fa   :  { %v698_v10 = vsel %vm3641_vm4, %v3114_v8, %v3116_v9 }
 0x9fb   :  { %701 = vrot.lane.b32.xlu1 %v698_v10, %s3422_s5  ;;  %v699_v13 = vmul.f32 %v698_v10, %v599_v57 }
 0xa6d   :  { %v702_v11 = vpop.permute.xlu1 %701 }
 0xa6e   :  { %v704_v12 = vmul.f32 %v702_v11, %v698_v10 }
 0xa70   :  { %706 = vrot.lane.b32.xlu0 %v704_v12, %s3423_s27 }
 0xae2   :  { %v707_v46 = vpop.permute.xlu0 %706 }
 0xae3   :  { %v709_v14 = vadd.f32 %v707_v46, %v699_v13 }
 0xae5   :  { %3117 = vtanh.f32 %v709_v14 }
 0xaef   :  { %v3118_v15 = vpop.eup %3117 }
 0xaf0   :  { %712 = vrot.lane.b32.xlu1 %v3118_v15, %s3422_s5 }
 0xb62   :  { %v713_v17 = vpop.permute.xlu1 %712 }
 0xb63   :  { %v715_v18 = vmul.f32 %v713_v17, %v698_v10 }
 0xb65   :  { %717 = vrot.lane.b32.xlu0 %v715_v18, %s3423_s27 }
 0xbd7   :  { %v718_v19 = vpop.permute.xlu0 %717 }
 0xbd8   :  { %721 = vst.msk [vmem:[#allocation3 + $0x18] sm:$0xff] %vm122_vm0, %v718_v19  ;;  %2765 = vmatmul.mubr.msk.f32.vlgmr.msra.gmra.mrb[6].mxu1 %vm122_vm0, %v718_v19 }
 0xbd9   :  { %2998 = vmatpush3.bf16.msra.mxu1 %v3603_v16  ;;  %2786 = vmatprep.mubr.msk.f32.mxu1 %vm3421_vm1, %v3419_v0 }
 0xbda   :  { %2999 = vmatprep.subr.bf16.mxu1 %v3420_v1 }
 0xbdd   :  { %3001 = vmatpush3.bf16.msra.mxu1 %v3607_v22 }
 0xbde   :  { %3009 = vmatprep.subr.bf16.mxu1 %v3008_v48 }
 0xbdf   :  { %v1171_v7 = vld [vmem:[#allocation3 + $0x18] sm:$0xff] }
 0xcab   :  { %v796_v20 = vpop.f32.mrb[6].mxu1 }
 0xcac   :  { %v800_v21 = vadd.f32 %v796_v20, %v3634_v52  ;;  %v2766_v23 = vpop.f32.mrb[7].mxu1 }
 0xcae   :  { %v2499_v24 = vmul.f32 -1.442695, %v800_v21 }
 0xcb0   :  { %3119 = vpow2.f32 %v2499_v24 }
 0xcb1   :  { %3121 = vtanh.f32 %v800_v21 }
 0xcba   :  { %v3120_v25 = vpop.eup %3119 }
 0xcbb   :  { %v804_v26 = vadd.f32 1.0, %v3120_v25  ;;  %v3122_v27 = vpop.eup %3121 }
 0xcbd   :  { %3123 = vrcp.f32 %v804_v26 }
 0xcc7   :  { %v3124_v28 = vpop.eup %3123 }
 0xcc8   :  { %v808_v29 = vsel %vm3641_vm4, %v3122_v27, %v3124_v28 }
 0xcc9   :  { %811 = vrot.lane.b32.xlu1 %v808_v29, %s3422_s5  ;;  %v809_v32 = vmul.f32 %v808_v29, %v709_v14 }
 0xd3b   :  { %v812_v30 = vpop.permute.xlu1 %811 }
 0xd3c   :  { %v814_v31 = vmul.f32 %v812_v30, %v808_v29 }
 0xd3e   :  { %816 = vrot.lane.b32.xlu0 %v814_v31, %s3423_s27  ;;  %v1329_v31 = vld [vmem:[#allocation14] sm:$0xff] }
 0xdb0   :  { %v817_v52 = vpop.permute.xlu0 %816 }
 0xdb1   :  { %v819_v33 = vadd.f32 %v817_v52, %v809_v32  ;;  %v1330_v32 = vld [vmem:[#allocation14 + $0x8] sm:$0xff] }
 0xdb2   :  { %v3753_v52 = vpack.c.bf16 %v1330_v32, %v1329_v31 }
 0xdb3   :  { %3125 = vtanh.f32 %v819_v33 }
 0xdbd   :  { %v3126_v34 = vpop.eup %3125 }
 0xdbe   :  { %822 = vrot.lane.b32.xlu1 %v3126_v34, %s3422_s5  ;;  %v1332_v34 = vld [vmem:[#allocation14 + $0x18] sm:$0xff] }
 0xe30   :  { %v823_v35 = vpop.permute.xlu1 %822 }
 0xe31   :  { %v825_v36 = vmul.f32 %v823_v35, %v808_v29 }
 0xe33   :  { %827 = vrot.lane.b32.xlu0 %v825_v36, %s3423_s27 }
 0xea5   :  { %v828_v37 = vpop.permute.xlu0 %827 }
 0xea6   :  { %831 = vst.msk [vmem:[#allocation3 + $0x20] sm:$0xff] %vm122_vm0, %v828_v37  ;;  %2776 = vmatmul.mubr.msk.f32.vlgmr.msra.gmra.mrb[10].mxu0 %vm122_vm0, %v828_v37 }
 0xea7   :  { %3004 = vmatpush3.bf16.msra.mxu0 %v3603_v16  ;;  %2797 = vmatprep.mubr.msk.f32.mxu0 %vm3421_vm1, %v3419_v0 }
 0xea8   :  { %3005 = vmatprep.subr.bf16.mxu0 %v3420_v1 }
 0xeab   :  { %3007 = vmatpush3.bf16.msra.mxu0 %v3607_v22 }
 0xeac   :  { %3016 = vmatprep.subr.bf16.mxu0 %v3420_v1 }
 0xead   :  { %v1172_v8 = vld [vmem:[#allocation3 + $0x20] sm:$0xff] }
 0xf79   :  { %v906_v38 = vpop.f32.mrb[10].mxu0 }
 0xf7a   :  { %v910_v39 = vadd.f32 %v906_v38, %v3632_v50  ;;  %v2777_v40 = vpop.f32.mrb[11].mxu0  ;;  %v1327_v38 = vld [vmem:[#allocation5 + $0x8] sm:$0xff] }
 0xf7b   :  { %v1325_v40 = vld [vmem:[#allocation4 + $0x8] sm:$0xff] }
 0xf7c   :  { %v2501_v41 = vmul.f32 -1.442695, %v910_v39 }
 0xf7e   :  { %3127 = vpow2.f32 %v2501_v41 }
 0xf7f   :  { %3129 = vtanh.f32 %v910_v39 }
 0xf88   :  { %v3128_v42 = vpop.eup %3127 }
 0xf89   :  { %v914_v43 = vadd.f32 1.0, %v3128_v42  ;;  %v3130_v16 = vpop.eup %3129 }
 0xf8b   :  { %3131 = vrcp.f32 %v914_v43 }
 0xf95   :  { %v3132_v44 = vpop.eup %3131 }
 0xf96   :  { %v918_v45 = vsel %vm3641_vm4, %v3130_v16, %v3132_v44  ;;  %v3783_v44 = vld [vmem:[%s4020_s6] ss:$0 sm:$0xff] }
 0xf97   :  { %921 = vrot.lane.b32.xlu1 %v918_v45, %s3422_s5  ;;  %v919_v49 = vmul.f32 %v918_v45, %v819_v33  ;;  %v1331_v33 = vld [vmem:[#allocation14 + $0x10] sm:$0xff] }
 0xf98   :  { %v3757_v35 = vpack.c.bf16 %v1332_v34, %v1331_v33 }
0x1009   :  { %v922_v22 = vpop.permute.xlu1 %921 }
0x100a   :  { %v924_v47 = vmul.f32 %v922_v22, %v918_v45 }
0x100c   :  { %926 = vrot.lane.b32.xlu0 %v924_v47, %s3423_s27 }
0x107e   :  { %v927_v50 = vpop.permute.xlu0 %926 }
0x107f   :  { %v929_v51 = vadd.f32 %v927_v50, %v919_v49 }
0x1081   :  { %3133 = vtanh.f32 %v929_v51 }
0x108b   :  { %v3134_v57 = vpop.eup %3133 }
0x108c   :  { %932 = vrot.lane.b32.xlu1 %v3134_v57, %s3422_s5 }
0x10fe   :  { %v933_v58 = vpop.permute.xlu1 %932 }
0x10ff   :  { %v935_v59 = vmul.f32 %v933_v58, %v918_v45 }
0x1101   :  { %937 = vrot.lane.b32.xlu0 %v935_v59, %s3423_s27 }
0x1173   :  { %v938_v2 = vpop.permute.xlu0 %937 }
0x1174   :  { %941 = vst.msk [vmem:[#allocation3 + $0x28] sm:$0xff] %vm122_vm0, %v938_v2  ;;  %2787 = vmatmul.mubr.msk.f32.vlgmr.msra.gmra.mrb[8].mxu1 %vm122_vm0, %v938_v2 }
0x1175   :  { %3011 = vmatpush3.bf16.msra.mxu1 %v3008_v48  ;;  %2808 = vmatprep.mubr.msk.f32.mxu1 %vm122_vm0, %v1168_v3 }
0x1176   :  { %3013 = vmatprep.subr.bf16.mxu1 %v3012_v62 }
0x1179   :  { %3015 = vmatpush3.bf16.msra.mxu1 %v3012_v62 }
0x117a   :  { %3028 = vmatprep.subr.bf16.mxu1 %v3420_v1 }
0x117b   :  { %v1173_v9 = vld [vmem:[#allocation3 + $0x28] sm:$0xff] }
0x117c   :  { %2809 = vmatmul.mubr.msk.f32.vlgmr.msra.gmra.mrb[10].mxu1 %vm122_vm0, %v1169_v5 }
0x117d   :  { %2811 = vmatprep.mubr.msk.f32.mxu1 %vm122_vm0, %v1170_v6  ;;  %3030 = vmatpush3.bf16.msra.mxu1 %v3753_v52 }
0x117e   :  { %3031 = vmatprep.subr.bf16.mxu1 %v3420_v1 }
0x1180   :  { %2812 = vmatmul.mubr.msk.f32.gmra.mrb[12].mxu1 %vm122_vm0, %v1171_v7 }
0x1181   :  { %2814 = vmatprep.mubr.msk.f32.mxu1 %vm122_vm0, %v1172_v8  ;;  %3033 = vmatpush3.bf16.msra.mxu1 %v3757_v35 }
0x1182   :  { %3040 = vmatprep.subr.bf16.mxu1 %v3420_v1 }
0x1184   :  { %2815 = vmatmul.mubr.msk.f32.gmra.mrb[14].mxu1 %vm122_vm0, %v1173_v9 }
0x1247   :  { %v1016_v10 = vpop.f32.mrb[8].mxu1 }
0x1248   :  { %v1020_v11 = vadd.f32 %v1016_v10, %v3638_v56  ;;  %v2788_v12 = vpop.f32.mrb[9].mxu1 }
0x124a   :  { %v2503_v13 = vmul.f32 -1.442695, %v1020_v11 }
0x124c   :  { %3135 = vpow2.f32 %v2503_v13 }
0x124d   :  { %3137 = vtanh.f32 %v1020_v11 }
0x124f   :  { %v3735_v46 = vpop.f32.mrb[10].mxu1 }
0x1250   :  { %v1277_v14 = vpop.f32.mrb[11].mxu1 }
0x1251   :  { %v1278_v45 = vadd.f32 %v3783_v44, %v1277_v14 }
0x1253   :  { %v3737_v15 = vpop.f32.mrb[12].mxu1 }
0x1254   :  { %v3739_v17 = vpop.f32.mrb[13].mxu1 }
0x1256   :  { %v3136_v18 = vpop.eup %3135 }
0x1257   :  { %v1024_v19 = vadd.f32 1.0, %v3136_v18  ;;  %v3741_v20 = vpop.f32.mrb[14].mxu1  ;;  %v3138_v23 = vpop.eup %3137 }
0x1258   :  { %v3743_v21 = vpop.f32.mrb[15].mxu1 }
0x1259   :  { %3139 = vrcp.f32 %v1024_v19 }
0x1263   :  { %v3140_v56 = vpop.eup %3139 }
0x1264   :  { %v1028_v24 = vsel %vm3641_vm4, %v3138_v23, %v3140_v56 }
0x1265   :  { %1031 = vrot.lane.b32.xlu1 %v1028_v24, %s3422_s5  ;;  %v1029_v27 = vmul.f32 %v1028_v24, %v929_v51 }
0x12d7   :  { %v1032_v25 = vpop.permute.xlu1 %1031 }
0x12d8   :  { %v1034_v26 = vmul.f32 %v1032_v25, %v1028_v24 }
0x12da   :  { %1036 = vrot.lane.b32.xlu0 %v1034_v26, %s3423_s27  ;;  %v1283_v26 = vadd.f32 %v3735_v46, %v3783_v44 }
0x134c   :  { %v1037_v28 = vpop.permute.xlu0 %1036 }
0x134d   :  { %v3749_v29 = vadd.f32 %v1037_v28, %v1029_v27 }
0x134f   :  { %3141 = vtanh.f32 %v3749_v29 }
0x1359   :  { %v3142_v30 = vpop.eup %3141 }
0x135a   :  { %1042 = vrot.lane.b32.xlu1 %v3142_v30, %s3422_s5 }
0x13cc   :  { %v1043_v36 = vpop.permute.xlu1 %1042 }
0x13cd   :  { %v1045_v37 = vmul.f32 %v1043_v36, %v1028_v24 }
0x13cf   :  { %1047 = vrot.lane.b32.xlu0 %v1045_v37, %s3423_s27 }
0x13d3   :  { %1416 = vrot.lane.b32.xlu0 %v1327_v38, %s3423_s27 }
0x1441   :  { %v1048_v39 = vpop.permute.xlu0 %1047 }
0x1442   :  { %1051 = vst.msk [vmem:[#allocation3 + $0x30] sm:$0xff] %vm122_vm0, %v1048_v39  ;;  %2798 = vmatmul.mubr.msk.f32.vlgmr.msra.gmra.mrb[12].mxu0 %vm122_vm0, %v1048_v39 }
0x1443   :  { %3018 = vmatpush3.bf16.msra.mxu0 %v3753_v52  ;;  %2828 = vmatprep.mubr.msk.f32.mxu0 %vm3421_vm1, %v3419_v0 }
0x1444   :  { %3019 = vmatprep.subr.bf16.mxu0 %v3420_v1 }
0x1445   :  { %v1417_v60 = vpop.permute.xlu0 %1416 }
0x1447   :  { %3021 = vmatpush3.bf16.msra.mxu0 %v3757_v35 }
0x1448   :  { %3022 = vmatprep.subr.bf16.mxu0 %v3420_v1 }
0x1449   :  { %v1174_v41 = vld [vmem:[#allocation3 + $0x30] sm:$0xff] }
0x144a   :  { %2829 = vmatmul.mubr.msk.f32.vlgmr.msra.gmra.mrb[14].mxu0 %vm122_vm0, %v1325_v40  ;;  %2817 = vmatprep.mubr.msk.f32.mxu1 %vm122_vm0, %v1174_v41 }
0x144b   :  { %3024 = vmatpush3.bf16.msra.mxu0 %v3753_v52  ;;  %2839 = vmatprep.mubr.msk.f32.mxu0 %vm3421_vm1, %v3419_v0 }
0x144c   :  { %3025 = vmatprep.subr.bf16.mxu0 %v3420_v1 }
0x144f   :  { %3027 = vmatpush3.bf16.msra.mxu0 %v3757_v35 }
0x1450   :  { %3034 = vmatprep.subr.bf16.mxu0 %v3420_v1 }
0x1515   :  { %v1126_v42 = vpop.f32.mrb[12].mxu0 }
0x1516   :  { %v1130_v43 = vadd.f32 %v1126_v42, %v3636_v54  ;;  %v2799_v16 = vpop.f32.mrb[13].mxu0 }
0x1518   :  { %v2505_v59 = vmul.f32 -1.442695, %v1130_v43 }
0x151d   :  { %v1402_v22 = vpop.f32.mrb[14].mxu0 }
0x151e   :  { %v1406_v47 = vadd.f32 %v1402_v22, %v1278_v45  ;;  %v2830_v49 = vpop.f32.mrb[15].mxu0 }
0x1520   :  { %v2516_v50 = vmul.f32 -1.442695, %v1406_v47 }
0x1522   :  { %3143 = vpow2.f32 %v2516_v50  ;;  %v1288_v50 = vadd.f32 %v3783_v44, %v3739_v17 }
0x1523   :  { %3145 = vtanh.f32 %v1406_v47 }
0x152c   :  { %v3144_v51 = vpop.eup %3143 }
0x152d   :  { %v1410_v53 = vadd.f32 1.0, %v3144_v51  ;;  %v3146_v55 = vpop.eup %3145 }
0x152f   :  { %3147 = vrcp.f32 %v1410_v53 }
0x1530   :  { %3149 = vpow2.f32 %v2505_v59 }
0x1539   :  { %v3148_v48 = vpop.eup %3147 }
0x153a   :  { %v1414_v54 = vsel %vm3641_vm4, %v3146_v55, %v3148_v48  ;;  %v3150_v61 = vpop.eup %3149 }
0x153b   :  { %1421 = vrot.lane.b32.xlu1 %v1414_v54, %s3422_s5  ;;  %v1419_v62 = vmul.f32 %v1417_v60, %v1414_v54  ;;  %v1134_v2 = vadd.f32 1.0, %v3150_v61 }
0x15ad   :  { %v1422_v57 = vpop.permute.xlu1 %1421 }
0x15ae   :  { %v1424_v58 = vmul.f32 %v1422_v57, %v1414_v54 }
0x15b0   :  { %1426 = vrot.lane.b32.xlu1 %v1424_v58, %s3423_s27 }
0x1622   :  { %v1427_v3 = vpop.permute.xlu1 %1426 }
0x1623   :  { %v1429_v5 = vadd.f32 %v1427_v3, %v1419_v62 }
0x1625   :  { %3151 = vtanh.f32 %v1429_v5 }
0x1626   :  { %3153 = vrcp.f32 %v1134_v2 }
0x1627   :  { %3155 = vtanh.f32 %v1130_v43 }
0x162f   :  { %v3152_v6 = vpop.eup %3151 }
0x1630   :  { %v3154_v7 = vpop.eup %3153  ;;  %1432 = vrot.lane.b32.xlu0 %v3152_v6, %s3422_s5 }
0x1631   :  { %v3156_v8 = vpop.eup %3155 }
0x1632   :  { %v1138_v9 = vsel %vm3641_vm4, %v3156_v8, %v3154_v7 }
0x1633   :  { %v1139_v18 = vmul.f32 %v1138_v9, %v3749_v29 }
0x1634   :  { %1141 = vrot.lane.b32.xlu0 %v1138_v9, %s3422_s5 }
0x16a2   :  { %v1433_v10 = vpop.permute.xlu0 %1432 }
0x16a3   :  { %v1435_v11 = vmul.f32 %v1433_v10, %v1414_v54 }
0x16a5   :  { %1437 = vrot.lane.b32.xlu1 %v1435_v11, %s3423_s27 }
0x16a6   :  { %v1142_v12 = vpop.permute.xlu0 %1141 }
0x16a7   :  { %v1144_v13 = vmul.f32 %v1142_v12, %v1138_v9 }
0x16a9   :  { %1146 = vrot.lane.b32.xlu0 %v1144_v13, %s3423_s27 }
0x1717   :  { %v1438_v14 = vpop.permute.xlu1 %1437 }
0x1718   :  { %1440 = vst.msk [vmem:[#allocation3] sm:$0xff] %vm122_vm0, %v1438_v14  ;;  %2840 = vmatmul.mubr.msk.f32.vlgmr.msra.gmra.mrb[16].mxu0 %vm122_vm0, %v1438_v14 }
0x1719   :  { %3036 = vmatpush3.bf16.msra.mxu0 %v3753_v52  ;;  %2861 = vmatprep.mubr.msk.f32.mxu0 %vm3421_vm1, %v3419_v0 }
0x171a   :  { %3037 = vmatprep.subr.bf16.mxu0 %v3420_v1 }
0x171b   :  { %v1147_v19 = vpop.permute.xlu0 %1146 }
0x171c   :  { %v3803_v23 = vadd.f32 %v1147_v19, %v1139_v18 }
0x171d   :  { %3039 = vmatpush3.bf16.msra.mxu0 %v3757_v35 }
0x171e   :  { %3157 = vtanh.f32 %v3803_v23  ;;  %3046 = vmatprep.subr.bf16.mxu0 %v3420_v1 }
0x1728   :  { %v3158_v56 = vpop.eup %3157 }
0x1729   :  { %1152 = vrot.lane.b32.xlu0 %v3158_v56, %s3422_s5 }
0x179b   :  { %v1153_v24 = vpop.permute.xlu0 %1152 }
0x179c   :  { %v1155_v25 = vmul.f32 %v1153_v24, %v1138_v9  ;;  %v1293_v9 = vadd.f32 %v3737_v15, %v3783_v44 }
0x179e   :  { %1157 = vrot.lane.b32.xlu0 %v1155_v25, %s3423_s27 }
0x17eb   :  { %v1514_v27 = vpop.f32.mrb[16].mxu0 }
0x17ec   :  { %v1518_v28 = vadd.f32 %v1514_v27, %v1283_v26  ;;  %v2841_v29 = vpop.f32.mrb[17].mxu0 }
0x17ee   :  { %v2518_v30 = vmul.f32 -1.442695, %v1518_v28 }
0x17f0   :  { %3159 = vpow2.f32 %v2518_v30 }
0x17f1   :  { %3161 = vtanh.f32 %v1518_v28 }
0x17fa   :  { %v3160_v31 = vpop.eup %3159 }
0x17fb   :  { %v1522_v32 = vadd.f32 1.0, %v3160_v31  ;;  %v3162_v33 = vpop.eup %3161 }
0x17fd   :  { %3163 = vrcp.f32 %v1522_v32 }
0x1807   :  { %v3164_v34 = vpop.eup %3163 }
0x1808   :  { %v1526_v36 = vsel %vm3641_vm4, %v3162_v33, %v3164_v34  ;;  %v1298_v33 = vadd.f32 %v3783_v44, %v3743_v21 }
0x1809   :  { %1529 = vrot.lane.b32.xlu1 %v1526_v36, %s3422_s5  ;;  %v1527_v42 = vmul.f32 %v1526_v36, %v1429_v5 }
0x1810   :  { %v1158_v37 = vpop.permute.xlu0 %1157 }
0x1811   :  { %1161 = vst.msk [vmem:[#allocation3 + $0x38] sm:$0xff] %vm122_vm0, %v1158_v37  ;;  %1162 = vst.msk [vmem:[#allocation4] sm:$0xff] %vm122_vm0, %v1158_v37 }
0x1818   :  { %v1175_v46 = vld [vmem:[#allocation3 + $0x38] sm:$0xff] }
0x1819   :  { %2818 = vmatmul.mubr.msk.f32.gmra.mrb[16].mxu1 %vm122_vm0, %v1175_v46 }
0x181a   :  { %2850 = vmatprep.mubr.msk.f32.mxu1 %vm3421_vm1, %v3419_v0 }
0x187b   :  { %v1530_v38 = vpop.permute.xlu1 %1529 }
0x187c   :  { %v1532_v39 = vmul.f32 %v1530_v38, %v1526_v36 }
0x187e   :  { %1534 = vrot.lane.b32.xlu1 %v1532_v39, %s3423_s27 }
0x18ec   :  { %v3821_v40 = vpop.f32.mrb[16].mxu1 }
0x18ed   :  { %v3823_v41 = vpop.f32.mrb[17].mxu1 }
0x18f0   :  { %v1535_v43 = vpop.permute.xlu1 %1534 }
0x18f1   :  { %v1537_v16 = vadd.f32 %v1535_v43, %v1527_v42 }
0x18f3   :  { %3165 = vtanh.f32 %v1537_v16 }
0x18fd   :  { %v3166_v45 = vpop.eup %3165 }
0x18fe   :  { %1540 = vrot.lane.b32.xlu1 %v3166_v45, %s3422_s5 }
0x1970   :  { %v1541_v22 = vpop.permute.xlu1 %1540 }
0x1971   :  { %v1543_v47 = vmul.f32 %v1541_v22, %v1526_v36 }
0x1973   :  { %1545 = vrot.lane.b32.xlu1 %v1543_v47, %s3423_s27 }
0x19e5   :  { %v1546_v49 = vpop.permute.xlu1 %1545 }
0x19e6   :  { %1548 = vst.msk [vmem:[#allocation3 + $0x8] sm:$0xff] %vm122_vm0, %v1546_v49  ;;  %2851 = vmatmul.mubr.msk.f32.vlgmr.msra.gmra.mrb[18].mxu1 %vm122_vm0, %v1546_v49 }
0x19e7   :  { %3042 = vmatpush3.bf16.msra.mxu1 %v3753_v52  ;;  %2872 = vmatprep.mubr.msk.f32.mxu1 %vm3421_vm1, %v3419_v0 }
0x19e8   :  { %3043 = vmatprep.subr.bf16.mxu1 %v3420_v1 }
0x19eb   :  { %3045 = vmatpush3.bf16.msra.mxu1 %v3757_v35 }
0x19ec   :  { %3052 = vmatprep.subr.bf16.mxu1 %v3420_v1 }
0x1ab9   :  { %v1622_v51 = vpop.f32.mrb[18].mxu1 }
0x1aba   :  { %v1626_v53 = vadd.f32 %v1622_v51, %v1288_v50  ;;  %v2852_v55 = vpop.f32.mrb[19].mxu1 }
0x1abc   :  { %v2520_v48 = vmul.f32 -1.442695, %v1626_v53 }
0x1abe   :  { %3167 = vpow2.f32 %v2520_v48  ;;  %v1303_v48 = vadd.f32 %v3741_v20, %v3783_v44 }
0x1abf   :  { %3169 = vtanh.f32 %v1626_v53 }
0x1ac8   :  { %v3168_v54 = vpop.eup %3167 }
0x1ac9   :  { %v1630_v57 = vadd.f32 1.0, %v3168_v54  ;;  %v3170_v58 = vpop.eup %3169 }
0x1acb   :  { %3171 = vrcp.f32 %v1630_v57 }
0x1ad5   :  { %v3172_v59 = vpop.eup %3171 }
0x1ad6   :  { %v1634_v60 = vsel %vm3641_vm4, %v3170_v58, %v3172_v59 }
0x1ad7   :  { %1637 = vrot.lane.b32.xlu0 %v1634_v60, %s3422_s5  ;;  %v1635_v17 = vmul.f32 %v1634_v60, %v1537_v16 }
0x1b49   :  { %v1638_v61 = vpop.permute.xlu0 %1637 }
0x1b4a   :  { %v1640_v62 = vmul.f32 %v1638_v61, %v1634_v60 }
0x1b4c   :  { %1642 = vrot.lane.b32.xlu1 %v1640_v62, %s3423_s27 }
0x1bbe   :  { %v1643_v2 = vpop.permute.xlu1 %1642 }
0x1bbf   :  { %v1645_v3 = vadd.f32 %v1643_v2, %v1635_v17 }
0x1bc1   :  { %3173 = vtanh.f32 %v1645_v3 }
0x1bcb   :  { %v3174_v5 = vpop.eup %3173 }
0x1bcc   :  { %1648 = vrot.lane.b32.xlu0 %v3174_v5, %s3422_s5  ;;  %v2212_v5 = vld [vmem:[#allocation15 + $0x8] sm:$0xff] }
0x1c3e   :  { %v1649_v6 = vpop.permute.xlu0 %1648 }
0x1c3f   :  { %v1651_v7 = vmul.f32 %v1649_v6, %v1634_v60 }
0x1c41   :  { %1653 = vrot.lane.b32.xlu1 %v1651_v7, %s3423_s27 }
0x1cb3   :  { %v1654_v8 = vpop.permute.xlu1 %1653 }
0x1cb4   :  { %1656 = vst.msk [vmem:[#allocation3 + $0x10] sm:$0xff] %vm122_vm0, %v1654_v8  ;;  %2862 = vmatmul.mubr.msk.f32.vlgmr.msra.gmra.mrb[18].mxu0 %vm122_vm0, %v1654_v8 }
0x1cb5   :  { %3048 = vmatpush3.bf16.msra.mxu0 %v3753_v52  ;;  %2883 = vmatprep.mubr.msk.f32.mxu0 %vm3421_vm1, %v3419_v0 }
0x1cb6   :  { %3049 = vmatprep.subr.bf16.mxu0 %v3420_v1 }
0x1cb9   :  { %3051 = vmatpush3.bf16.msra.mxu0 %v3757_v35 }
0x1cba   :  { %3058 = vmatprep.subr.bf16.mxu0 %v3420_v1 }
0x1d87   :  { %v1730_v10 = vpop.f32.mrb[18].mxu0 }
0x1d88   :  { %v1734_v11 = vadd.f32 %v1730_v10, %v1293_v9  ;;  %v2863_v12 = vpop.f32.mrb[19].mxu0  ;;  %v2213_v10 = vld [vmem:[#allocation15 + $0x10] sm:$0xff] }
0x1d8a   :  { %v2522_v13 = vmul.f32 -1.442695, %v1734_v11 }
0x1d8c   :  { %3175 = vpow2.f32 %v2522_v13 }
0x1d8d   :  { %3177 = vtanh.f32 %v1734_v11  ;;  %v2214_v11 = vld [vmem:[#allocation15 + $0x18] sm:$0xff] }
0x1d8e   :  { %v3068_v12 = vpack.c.bf16 %v2214_v11, %v2213_v10 }
0x1d96   :  { %v3176_v14 = vpop.eup %3175 }
0x1d97   :  { %v1738_v18 = vadd.f32 1.0, %v3176_v14  ;;  %v3178_v19 = vpop.eup %3177  ;;  %v2203_v14 = vld [vmem:[#allocation3] sm:$0xff] }
0x1d99   :  { %3179 = vrcp.f32 %v1738_v18  ;;  %v2204_v18 = vld [vmem:[#allocation3 + $0x8] sm:$0xff] }
0x1da3   :  { %v3180_v56 = vpop.eup %3179 }
0x1da4   :  { %v1742_v24 = vsel %vm3641_vm4, %v3178_v19, %v3180_v56  ;;  %v2205_v19 = vld [vmem:[#allocation3 + $0x10] sm:$0xff] }
0x1da5   :  { %1745 = vrot.lane.b32.xlu0 %v1742_v24, %s3422_s5  ;;  %v1743_v15 = vmul.f32 %v1742_v24, %v1645_v3  ;;  %v2211_v3 = vld [vmem:[#allocation15] sm:$0xff] }
0x1da6   :  { %v3064_v6 = vpack.c.bf16 %v2212_v5, %v2211_v3 }
0x1e17   :  { %v1746_v25 = vpop.permute.xlu0 %1745 }
0x1e18   :  { %v1748_v26 = vmul.f32 %v1746_v25, %v1742_v24 }
0x1e1a   :  { %1750 = vrot.lane.b32.xlu1 %v1748_v26, %s3423_s27  ;;  %v1308_v26 = vadd.f32 %v3783_v44, %v3823_v41 }
0x1e8c   :  { %v1751_v27 = vpop.permute.xlu1 %1750 }
0x1e8d   :  { %v1753_v28 = vadd.f32 %v1751_v27, %v1743_v15 }
0x1e8f   :  { %3181 = vtanh.f32 %v1753_v28 }
0x1e99   :  { %v3182_v29 = vpop.eup %3181 }
0x1e9a   :  { %1756 = vrot.lane.b32.xlu0 %v3182_v29, %s3422_s5 }
0x1f0c   :  { %v1757_v30 = vpop.permute.xlu0 %1756 }
0x1f0d   :  { %v1759_v31 = vmul.f32 %v1757_v30, %v1742_v24  ;;  %v3905_v30 = vld [vmem:[%s4022_s8] ss:$0 sm:$0xff] }
0x1f0f   :  { %1761 = vrot.lane.b32.xlu1 %v1759_v31, %s3423_s27 }
0x1f81   :  { %v1762_v32 = vpop.permute.xlu1 %1761 }
0x1f82   :  { %1764 = vst.msk [vmem:[#allocation3 + $0x18] sm:$0xff] %vm122_vm0, %v1762_v32  ;;  %2873 = vmatmul.mubr.msk.f32.vlgmr.msra.gmra.mrb[20].mxu1 %vm122_vm0, %v1762_v32 }
0x1f83   :  { %3054 = vmatpush3.bf16.msra.mxu1 %v3753_v52  ;;  %2894 = vmatprep.mubr.msk.f32.mxu1 %vm3421_vm1, %v3419_v0 }
0x1f84   :  { %3055 = vmatprep.subr.bf16.mxu1 %v3420_v1 }
0x1f87   :  { %3057 = vmatpush3.bf16.msra.mxu1 %v3757_v35 }
0x1f88   :  { %3065 = vmatprep.subr.bf16.mxu1 %v3064_v6 }
0x1f89   :  { %v2206_v56 = vld [vmem:[#allocation3 + $0x18] sm:$0xff] }
0x2055   :  { %v1838_v34 = vpop.f32.mrb[20].mxu1 }
0x2056   :  { %v1842_v36 = vadd.f32 %v1838_v34, %v1298_v33  ;;  %v2874_v37 = vpop.f32.mrb[21].mxu1 }
0x2058   :  { %v2524_v46 = vmul.f32 -1.442695, %v1842_v36 }
0x205a   :  { %3183 = vpow2.f32 %v2524_v46 }
0x205b   :  { %3185 = vtanh.f32 %v1842_v36 }
0x2064   :  { %v3184_v38 = vpop.eup %3183 }
0x2065   :  { %v1846_v39 = vadd.f32 1.0, %v3184_v38  ;;  %v3186_v42 = vpop.eup %3185 }
0x2067   :  { %3187 = vrcp.f32 %v1846_v39 }
0x2071   :  { %v3188_v43 = vpop.eup %3187 }
0x2072   :  { %v1850_v16 = vsel %vm3641_vm4, %v3186_v42, %v3188_v43 }
0x2073   :  { %1853 = vrot.lane.b32.xlu0 %v1850_v16, %s3422_s5  ;;  %v1851_v21 = vmul.f32 %v1850_v16, %v1753_v28 }
0x20e5   :  { %v1854_v45 = vpop.permute.xlu0 %1853 }
0x20e6   :  { %v1856_v22 = vmul.f32 %v1854_v45, %v1850_v16 }
0x20e8   :  { %1858 = vrot.lane.b32.xlu1 %v1856_v22, %s3423_s27 }
0x215a   :  { %v1859_v47 = vpop.permute.xlu1 %1858 }
0x215b   :  { %v1861_v49 = vadd.f32 %v1859_v47, %v1851_v21 }
0x215d   :  { %3189 = vtanh.f32 %v1861_v49 }
0x2167   :  { %v3190_v50 = vpop.eup %3189 }
0x2168   :  { %1864 = vrot.lane.b32.xlu0 %v3190_v50, %s3422_s5 }
0x21da   :  { %v1865_v51 = vpop.permute.xlu0 %1864 }
0x21db   :  { %v1867_v53 = vmul.f32 %v1865_v51, %v1850_v16 }
0x21dd   :  { %1869 = vrot.lane.b32.xlu1 %v1867_v53, %s3423_s27 }
0x224f   :  { %v1870_v55 = vpop.permute.xlu1 %1869 }
0x2250   :  { %1872 = vst.msk [vmem:[#allocation3 + $0x20] sm:$0xff] %vm122_vm0, %v1870_v55  ;;  %2884 = vmatmul.mubr.msk.f32.vlgmr.msra.gmra.mrb[20].mxu0 %vm122_vm0, %v1870_v55 }
0x2251   :  { %3060 = vmatpush3.bf16.msra.mxu0 %v3753_v52  ;;  %2905 = vmatprep.mubr.msk.f32.mxu0 %vm3421_vm1, %v3419_v0 }
0x2252   :  { %3061 = vmatprep.subr.bf16.mxu0 %v3420_v1 }
0x2255   :  { %3063 = vmatpush3.bf16.msra.mxu0 %v3757_v35 }
0x2257   :  { %v2207_v24 = vld [vmem:[#allocation3 + $0x20] sm:$0xff] }
0x2323   :  { %v1946_v54 = vpop.f32.mrb[20].mxu0 }
0x2324   :  { %v1950_v57 = vadd.f32 %v1946_v54, %v1303_v48  ;;  %v2885_v58 = vpop.f32.mrb[21].mxu0 }
0x2326   :  { %v2526_v59 = vmul.f32 -1.442695, %v1950_v57 }
0x2328   :  { %3191 = vpow2.f32 %v2526_v59 }
0x2329   :  { %3193 = vtanh.f32 %v1950_v57 }
0x2332   :  { %v3192_v60 = vpop.eup %3191 }
0x2333   :  { %v1954_v61 = vadd.f32 1.0, %v3192_v60  ;;  %v3194_v52 = vpop.eup %3193 }
0x2335   :  { %3195 = vrcp.f32 %v1954_v61 }
0x233f   :  { %v3196_v62 = vpop.eup %3195 }
0x2340   :  { %v1958_v0 = vsel %vm3641_vm4, %v3194_v52, %v3196_v62 }
0x2341   :  { %1961 = vrot.lane.b32.xlu0 %v1958_v0, %s3422_s5  ;;  %v1959_v20 = vmul.f32 %v1958_v0, %v1861_v49 }
0x23b3   :  { %v1962_v1 = vpop.permute.xlu0 %1961 }
0x23b4   :  { %v1964_v35 = vmul.f32 %v1962_v1, %v1958_v0 }
0x23b6   :  { %1966 = vrot.lane.b32.xlu1 %v1964_v35, %s3423_s27 }
0x2428   :  { %v1967_v17 = vpop.permute.xlu1 %1966 }
0x2429   :  { %v3887_v2 = vadd.f32 %v1967_v17, %v1959_v20 }
0x242b   :  { %3197 = vtanh.f32 %v3887_v2 }
0x2435   :  { %v3198_v7 = vpop.eup %3197 }
0x2436   :  { %1972 = vrot.lane.b32.xlu0 %v3198_v7, %s3422_s5 }
0x24a8   :  { %v1973_v8 = vpop.permute.xlu0 %1972 }
0x24a9   :  { %v1975_v9 = vmul.f32 %v1973_v8, %v1958_v0 }
0x24ab   :  { %1977 = vrot.lane.b32.xlu1 %v1975_v9, %s3423_s27  ;;  %v2426_v9 = vshrl.u32 %v127_v63, 7 }
0x251d   :  { %v1978_v13 = vpop.permute.xlu1 %1977 }
0x251e   :  { %1980 = vst.msk [vmem:[#allocation3 + $0x28] sm:$0xff] %vm122_vm0, %v1978_v13  ;;  %2895 = vmatmul.mubr.msk.f32.vlgmr.msra.gmra.mrb[22].mxu1 %vm122_vm0, %v1978_v13  ;;  %v2423_v13 = vld [vmem:[%s4023_s9] sm:$0x1]  ;;  %s3424_s9 = smov 96  }
0x251f   :  { %3067 = vmatpush3.bf16.msra.mxu1 %v3064_v6  ;;  %2916 = vmatprep.mubr.msk.f32.mxu1 %vm122_vm0, %v2203_v14  ;;  %v2427_v14 = vsub.s32 0, %v2426_v9 }
0x2520   :  { %3069 = vmatprep.subr.bf16.mxu1 %v3068_v12 }
0x2523   :  { %3071 = vmatpush3.bf16.msra.mxu1 %v3068_v12 }
0x2525   :  { %v2208_v25 = vld [vmem:[#allocation3 + $0x28] sm:$0xff] }
0x2526   :  { %2917 = vmatmul.mubr.msk.f32.vlgmr.msra.gmra.mrb[24].mxu1 %vm122_vm0, %v2204_v18 }
0x2527   :  { %2919 = vmatprep.mubr.msk.f32.mxu1 %vm122_vm0, %v2205_v19  ;;  %v2438_v19 = vsub.f32 1.0, %v2423_v13 }
0x252a   :  { %2920 = vmatmul.mubr.msk.f32.gmra.mrb[26].mxu1 %vm122_vm0, %v2206_v56 }
0x252b   :  { %2922 = vmatprep.mubr.msk.f32.mxu1 %vm122_vm0, %v2207_v24 }
0x252e   :  { %2923 = vmatmul.mubr.msk.f32.gmra.mrb[28].mxu1 %vm122_vm0, %v2208_v25 }
0x25f1   :  { %v2054_v15 = vpop.f32.mrb[22].mxu1 }
0x25f2   :  { %v2058_v27 = vadd.f32 %v2054_v15, %v1308_v26  ;;  %v2896_v28 = vpop.f32.mrb[23].mxu1  ;;  %v3941_v26 = vrot.slane %v2423_v13, %v2427_v14 }
0x25f4   :  { %v2528_v29 = vmul.f32 -1.442695, %v2058_v27 }
0x25f6   :  { %3199 = vpow2.f32 %v2528_v29 }
0x25f7   :  { %3201 = vtanh.f32 %v2058_v27  ;;  %v3944_v27 = vrot.slane %v2438_v19, %v2427_v14 }
0x25f9   :  { %v2918_v31 = vpop.f32.mrb[24].mxu1 }
0x25fa   :  { %v3908_v32 = vadd.f32 %v2918_v31, %v3905_v30  ;;  %v2312_v33 = vpop.f32.mrb[25].mxu1 }
0x25fb   :  { %v3911_v34 = vadd.f32 %v3905_v30, %v2312_v33 }
0x25fc   :  { %v2360_v41 = vand.u32 2147483647, %v3908_v32  ;;  %v2352_v63 = vmax.f32 %v3908_v32, 0.0 }
0x25fd   :  { %v2359_v36 = vand.u32 2147483647, %v3911_v34  ;;  %v2921_v37 = vpop.f32.mrb[26].mxu1  ;;  %v2351_v31 = vmax.f32 %v3911_v34, 0.0 }
0x25fe   :  { %v2368_v46 = vsub.f32 0.0, %v2360_v41  ;;  %v3916_v38 = vadd.f32 %v2921_v37, %v3905_v30  ;;  %v2322_v39 = vpop.f32.mrb[27].mxu1 }
0x25ff   :  { %v2367_v42 = vsub.f32 0.0, %v2359_v36  ;;  %v3919_v43 = vadd.f32 %v3905_v30, %v2322_v39  ;;  %v2431_v36 = vmul.f32 %v3941_v26, %v3908_v32 }
0x2600   :  { %v3200_v16 = vpop.eup %3199  ;;  %v2377_v45 = vmul.f32 1.442695, %v2368_v46  ;;  %v2362_v22 = vand.u32 2147483647, %v3916_v38 }
0x2601   :  { %v2062_v21 = vadd.f32 1.0, %v3200_v16  ;;  %v2375_v47 = vmul.f32 1.442695, %v2367_v42  ;;  %v2361_v49 = vand.u32 2147483647, %v3919_v43  ;;  %v2924_v51 = vpop.f32.mrb[28].mxu1  ;;  %v3202_v1 = vpop.eup %3201 }
0x2602   :  { %3203 = vpow2.f32 %v2377_v45  ;;  %v2370_v50 = vsub.f32 0.0, %v2362_v22  ;;  %v3924_v55 = vadd.f32 %v2924_v51, %v3905_v30  ;;  %v2332_v48 = vpop.f32.mrb[29].mxu1  ;;  %v2354_v42 = vmax.f32 %v3916_v38, 0.0 }
0x2603   :  { %3205 = vrcp.f32 %v2062_v21  ;;  %v2369_v53 = vsub.f32 0.0, %v2361_v49  ;;  %v3927_v57 = vadd.f32 %v3905_v30, %v2332_v48  ;;  %v2353_v45 = vmax.f32 %v3919_v43, 0.0 }
0x2604   :  { %3207 = vpow2.f32 %v2375_v47  ;;  %v2381_v54 = vmul.f32 1.442695, %v2370_v50  ;;  %v2364_v59 = vand.u32 2147483647, %v3924_v55  ;;  %v2430_v47 = vmul.f32 %v3941_v26, %v3911_v34 }
0x2605   :  { %v2379_v58 = vmul.f32 1.442695, %v2369_v53  ;;  %v2363_v60 = vand.u32 2147483647, %v3927_v57  ;;  %v2433_v48 = vmul.f32 %v3941_v26, %v3916_v38  ;;  %v2356_v34 = vmax.f32 %v3924_v55, 0.0 }
0x2606   :  { %3209 = vpow2.f32 %v2381_v54  ;;  %v2372_v61 = vsub.f32 0.0, %v2364_v59  ;;  %v2432_v59 = vmul.f32 %v3941_v26, %v3919_v43 }
0x2607   :  { %3211 = vpow2.f32 %v2379_v58  ;;  %v2371_v52 = vsub.f32 0.0, %v2363_v60 }
0x2608   :  { %v2385_v62 = vmul.f32 1.442695, %v2372_v61 }
0x2609   :  { %v2383_v0 = vmul.f32 1.442695, %v2371_v52 }
0x260a   :  { %3213 = vpow2.f32 %v2385_v62  ;;  %v2355_v62 = vmax.f32 %v3927_v57, 0.0 }
0x260b   :  { %3215 = vpow2.f32 %v2383_v0 }
0x260c   :  { %v3204_v35 = vpop.eup %3203 }
0x260d   :  { %v3206_v20 = vpop.eup %3205  ;;  %v2392_v17 = vadd.f32 1.0, %v3204_v35 }
0x260e   :  { %v3208_v3 = vpop.eup %3207  ;;  %v3933_v5 = vsel %vm3641_vm4, %v3202_v1, %v3206_v20  ;;  %v2435_v20 = vmul.f32 %v3941_v26, %v3924_v55 }
0x260f   :  { %3217 = vlog2.f32 %v2392_v17  ;;  %v2391_v6 = vadd.f32 1.0, %v3208_v3  ;;  %2069 = vrot.lane.b32.xlu0 %v3933_v5, %s3422_s5  ;;  %v2434_v17 = vmul.f32 %v3941_v26, %v3927_v57 }
0x2610   :  { %v3210_v7 = vpop.eup %3209 }
0x2611   :  { %v3212_v8 = vpop.eup %3211  ;;  %3219 = vlog2.f32 %v2391_v6  ;;  %v2394_v10 = vadd.f32 1.0, %v3210_v7 }
0x2612   :  { %v2393_v11 = vadd.f32 1.0, %v3212_v8 }
0x2613   :  { %3221 = vlog2.f32 %v2394_v10  ;;  %v2067_v10 = vmul.f32 %v3933_v5, %v3887_v2  ;;  %v1313_v2 = vadd.f32 %v3821_v40, %v3783_v44 }
0x2614   :  { %3223 = vlog2.f32 %v2393_v11  ;;  %v3214_v12 = vpop.eup %3213 }
0x2615   :  { %v3216_v18 = vpop.eup %3215  ;;  %v2396_v56 = vadd.f32 1.0, %v3214_v12 }
0x2616   :  { %v2395_v24 = vadd.f32 1.0, %v3216_v18 }
0x2617   :  { %3225 = vlog2.f32 %v2396_v56 }
0x2618   :  { %3227 = vlog2.f32 %v2395_v24 }
0x2619   :  { %v3218_v25 = vpop.eup %3217 }
0x261a   :  { %v2402_v15 = vmul.f32 0.6931472, %v3218_v25 }
0x261b   :  { %v3220_v28 = vpop.eup %3219 }
0x261c   :  { %v2416_v29 = vadd.f32 %v2402_v15, %v2352_v63  ;;  %v2400_v33 = vmul.f32 0.6931472, %v3220_v28 }
0x261d   :  { %v3222_v41 = vpop.eup %3221 }
0x261e   :  { %v3224_v37 = vpop.eup %3223  ;;  %v2446_v46 = vmul.f32 %v3944_v27, %v2416_v29  ;;  %v2415_v39 = vadd.f32 %v2400_v33, %v2351_v31  ;;  %v2406_v16 = vmul.f32 0.6931472, %v3222_v41 }
0x261f   :  { %v2404_v22 = vmul.f32 0.6931472, %v3224_v37 }
0x2620   :  { %v2454_v21 = vadd.f32 %v2446_v46, %v2431_v36  ;;  %v2445_v49 = vmul.f32 %v3944_v27, %v2415_v39  ;;  %v2418_v50 = vadd.f32 %v2406_v16, %v2354_v42 }
0x2621   :  { %v2417_v51 = vadd.f32 %v2404_v22, %v2353_v45  ;;  %v3226_v53 = vpop.eup %3225 }
0x2622   :  { %2462 = vst [vmem:[#allocation17 + $0x8] sm:$0xff] %v2454_v21  ;;  %v2453_v32 = vadd.f32 %v2445_v49, %v2430_v47  ;;  %v2448_v54 = vmul.f32 %v3944_v27, %v2418_v50  ;;  %v3228_v58 = vpop.eup %3227  ;;  %v2410_v61 = vmul.f32 0.6931472, %v3226_v53 }
0x2623   :  { %v2447_v60 = vmul.f32 %v3944_v27, %v2417_v51  ;;  %v2408_v0 = vmul.f32 0.6931472, %v3228_v58 }
0x2624   :  { %2461 = vst [vmem:[#allocation17] sm:$0xff] %v2453_v32  ;;  %v2456_v52 = vadd.f32 %v2448_v54, %v2433_v48  ;;  %v2420_v35 = vadd.f32 %v2410_v61, %v2356_v34 }
0x2625   :  { %v2455_v1 = vadd.f32 %v2447_v60, %v2432_v59  ;;  %v2419_v38 = vadd.f32 %v2408_v0, %v2355_v62 }
0x2626   :  { %2464 = vst [vmem:[#allocation17 + $0x18] sm:$0xff] %v2456_v52  ;;  %v2450_v43 = vmul.f32 %v3944_v27, %v2420_v35 }
0x2627   :  { %2463 = vst [vmem:[#allocation17 + $0x10] sm:$0xff] %v2455_v1  ;;  %v2449_v3 = vmul.f32 %v3944_v27, %v2419_v38 }
0x2628   :  { %v2458_v6 = vadd.f32 %v2450_v43, %v2435_v20 }
0x2629   :  { %v2457_v7 = vadd.f32 %v2449_v3, %v2434_v17 }
0x262a   :  { %2466 = vst [vmem:[#allocation17 + $0x28] sm:$0xff] %v2458_v6 }
0x262b   :  { %2465 = vst [vmem:[#allocation17 + $0x20] sm:$0xff] %v2457_v7 }
0x2681   :  { %v2070_v8 = vpop.permute.xlu0 %2069 }
0x2682   :  { %v2072_v9 = vmul.f32 %v2070_v8, %v3933_v5 }
0x2684   :  { %2074 = vrot.lane.b32.xlu1 %v2072_v9, %s3423_s27 }
0x26f6   :  { %v2075_v55 = vpop.permute.xlu1 %2074 }
0x26f7   :  { %v2077_v11 = vadd.f32 %v2075_v55, %v2067_v10 }
0x26f9   :  { %3229 = vtanh.f32 %v2077_v11 }
0x2703   :  { %v3230_v12 = vpop.eup %3229 }
0x2704   :  { %2080 = vrot.lane.b32.xlu0 %v3230_v12, %s3422_s5 }
0x2776   :  { %v2081_v57 = vpop.permute.xlu0 %2080 }
0x2777   :  { %v2083_v13 = vmul.f32 %v2081_v57, %v3933_v5 }
0x2779   :  { %2085 = vrot.lane.b32.xlu1 %v2083_v13, %s3423_s27 }
0x27eb   :  { %v2086_v14 = vpop.permute.xlu1 %2085 }
0x27ec   :  { %2088 = vst.msk [vmem:[#allocation3 + $0x30] sm:$0xff] %vm122_vm0, %v2086_v14  ;;  %2906 = vmatmul.mubr.msk.f32.vlgmr.msra.gmra.mrb[22].mxu0 %vm122_vm0, %v2086_v14 }
0x27f3   :  { %v2209_v18 = vld [vmem:[#allocation3 + $0x30] sm:$0xff] }
0x27f4   :  { %2925 = vmatprep.mubr.msk.f32.mxu1 %vm122_vm0, %v2209_v18 }
0x28bf   :  { %v2162_v19 = vpop.f32.mrb[22].mxu0 }
0x28c0   :  { %v2166_v56 = vadd.f32 %v2162_v19, %v1313_v2  ;;  %v2907_v24 = vpop.f32.mrb[23].mxu0 }
0x28c2   :  { %v2530_v25 = vmul.f32 -1.442695, %v2166_v56 }
0x28c4   :  { %3231 = vpow2.f32 %v2530_v25 }
0x28c5   :  { %3233 = vtanh.f32 %v2166_v56 }
0x28ce   :  { %v3232_v63 = vpop.eup %3231 }
0x28cf   :  { %v2170_v5 = vadd.f32 1.0, %v3232_v63  ;;  %v3234_v15 = vpop.eup %3233 }
0x28d1   :  { %3235 = vrcp.f32 %v2170_v5 }
0x28db   :  { %v3236_v28 = vpop.eup %3235 }
0x28dc   :  { %v2174_v29 = vsel %vm3641_vm4, %v3234_v15, %v3236_v28 }
0x28dd   :  { %2177 = vrot.lane.b32.xlu0 %v2174_v29, %s3422_s5  ;;  %v2175_v44 = vmul.f32 %v2174_v29, %v2077_v11 }
0x294f   :  { %v2178_v31 = vpop.permute.xlu0 %2177 }
0x2950   :  { %v2180_v33 = vmul.f32 %v2178_v31, %v2174_v29 }
0x2952   :  { %2182 = vrot.lane.b32.xlu1 %v2180_v33, %s3423_s27 }
0x29c4   :  { %v2183_v40 = vpop.permute.xlu1 %2182 }
0x29c5   :  { %v2185_v41 = vadd.f32 %v2183_v40, %v2175_v44 }
0x29c7   :  { %3237 = vtanh.f32 %v2185_v41 }
0x29d1   :  { %v3238_v36 = vpop.eup %3237 }
0x29d2   :  { %2188 = vrot.lane.b32.xlu0 %v3238_v36, %s3422_s5 }
0x29d6   :  { %1164 = vrot.lane.b32.xlu0 %v3803_v23, %s3424_s9 }
0x2a44   :  { %v2189_v37 = vpop.permute.xlu0 %2188 }
0x2a45   :  { %v2191_v46 = vmul.f32 %v2189_v37, %v2174_v29 }
0x2a47   :  { %2193 = vrot.lane.b32.xlu1 %v2191_v46, %s3423_s27 }
0x2a48   :  { %v1165_v4 = vpop.permute.xlu0 %1164 }
0x2a49   :  { %1167 = vst.msk [vmem:[#allocation5] sm:$0xff] %vm122_vm0, %v1165_v4 }
0x2a4b   :  { %2199 = vrot.lane.b32.xlu1 %v2185_v41, %s3424_s9 }
0x2ab9   :  { %v2194_v39 = vpop.permute.xlu1 %2193 }
0x2aba   :  { %2196 = vst.msk [vmem:[#allocation3 + $0x38] sm:$0xff] %vm122_vm0, %v2194_v39  ;;  %2197 = vst.msk [vmem:[#allocation4 + $0x8] sm:$0xff] %vm122_vm0, %v2194_v39 }
0x2abd   :  { %v2200_v42 = vpop.permute.xlu1 %2199 }
0x2abe   :  { %2202 = vst.msk [vmem:[#allocation5 + $0x8] sm:$0xff] %vm122_vm0, %v2200_v42 }
0x2ac1   :  { %v2210_v16 = vld [vmem:[#allocation3 + $0x38] sm:$0xff] }
0x2ac2   :  { %2926 = vmatmul.mubr.msk.f32.gmra.mrb[30].mxu1 %vm122_vm0, %v2210_v16 }
0x2b95   :  { %v2927_v23 = vpop.f32.mrb[30].mxu1 }
0x2b96   :  { %v2348_v45 = vadd.f32 %v2927_v23, %v3905_v30  ;;  %v2342_v22 = vpop.f32.mrb[31].mxu1 }
0x2b97   :  { %v2343_v21 = vadd.f32 %v3905_v30, %v2342_v22 }
0x2b98   :  { %v2366_v47 = vand.u32 2147483647, %v2348_v45  ;;  %v2358_v61 = vmax.f32 %v2348_v45, 0.0  ;;  %v2437_v35 = vmul.f32 %v3941_v26, %v2348_v45 }
0x2b99   :  { %v2365_v49 = vand.u32 2147483647, %v2343_v21  ;;  %v2357_v62 = vmax.f32 %v2343_v21, 0.0  ;;  %v2436_v20 = vmul.f32 %v3941_v26, %v2343_v21 }
0x2b9a   :  { %v2374_v50 = vsub.f32 0.0, %v2366_v47 }
0x2b9b   :  { %v2373_v51 = vsub.f32 0.0, %v2365_v49 }
0x2b9c   :  { %v2389_v53 = vmul.f32 1.442695, %v2374_v50 }
0x2b9d   :  { %v2387_v32 = vmul.f32 1.442695, %v2373_v51 }
0x2b9e   :  { %3239 = vpow2.f32 %v2389_v53 }
0x2b9f   :  { %3241 = vpow2.f32 %v2387_v32 }
0x2ba8   :  { %v3240_v48 = vpop.eup %3239 }
0x2ba9   :  { %v3242_v54 = vpop.eup %3241  ;;  %v2398_v58 = vadd.f32 1.0, %v3240_v48 }
0x2baa   :  { %v2397_v59 = vadd.f32 1.0, %v3242_v54 }
0x2bab   :  { %3243 = vlog2.f32 %v2398_v58 }
0x2bac   :  { %3245 = vlog2.f32 %v2397_v59 }
0x2bb5   :  { %v3244_v60 = vpop.eup %3243 }
0x2bb6   :  { %v3246_v34 = vpop.eup %3245  ;;  %v2414_v52 = vmul.f32 0.6931472, %v3244_v60 }
0x2bb7   :  { %v2412_v30 = vmul.f32 0.6931472, %v3246_v34 }
0x2bb8   :  { %v2422_v0 = vadd.f32 %v2414_v52, %v2358_v61 }
0x2bb9   :  { %v2421_v1 = vadd.f32 %v2412_v30, %v2357_v62 }
0x2bba   :  { %v2452_v38 = vmul.f32 %v3944_v27, %v2422_v0 }
0x2bbb   :  { %v2451_v43 = vmul.f32 %v3944_v27, %v2421_v1 }
0x2bbc   :  { %v2460_v17 = vadd.f32 %v2452_v38, %v2437_v35 }
0x2bbd   :  { %v2459_v3 = vadd.f32 %v2451_v43, %v2436_v20 }
0x2bbe   :  { %2468 = vst [vmem:[#allocation17 + $0x38] sm:$0xff] %v2460_v17 }
0x2bbf   :  { %2467 = vst [vmem:[#allocation17 + $0x30] sm:$0xff] %v2459_v3 }
0x2bc0   :  { %3390 = shalt.err (!%p3387_p10)
}
0x2bc1   :  { %s3391_s22 = scalar_lea.hbm %s4024_s10, 1024 }
0x2bc2   :  { %p3392_p11 = scmp.ne.s32.totalorder %s4024_s10, %s3391_s22  ;;  %p3395_p12 = scmp.lt.u32.totalorder %s3391_s22, %s4024_s10 }
0x2bc4   :  { %p3397_p13 = pnand %p3395_p12, %p3392_p11 }
0x2bc6   :  { %3400 = shalt.err (!%p3397_p13)
}
0x2bc7   :  { %2480 = dma.vmem_to_hbm [thread:$0]  %s2475_s16, 1024, %s4024_s10, [#allocation8], %s3413_s25, %s3413_s25, %s3414_s26  }
0x2bc8   :  { %3409 = dma.done.wait [#allocation8], 1024  }
0x2bc9   :  { %3410 = vsyncadd [#allocation8], 4294966272 }
0x2bca   :  { %2484 = vsyncpa [#allocation7], 1 }
0x2bcb   :  { %2485 = vsyncpa [#allocation10], 1 }
0x2bcc   :  { %2486 = vsyncpa [#allocation13], 1 }
0x2bcd   :  { %2487 = vsyncpa [#allocation16], 1 }
0x2bce   :  { %2488 = vsyncpa [#allocation8], 1 }

</bundles_post_ra>
